<compile_context>
chip_gen: v5e
topology: v5e:2x2
jax: 0.10.0
libtpu: 0.0.40
codegen_flags: <defaults>
</compile_context>

<pallas_src>
import functools
import math

import jax
import jax.numpy as jnp
from jax.experimental import pallas as pl
from jax.experimental.pallas import tpu as pltpu

_EPS = 1e-5
_LANE = 128
_SUBLANE = 8
_VMEM_BLOCK_BUDGET = 4 << 20  # per-grid-step block budget (v7x-safe with 2x buffering)


# --------------------------------------------------------------------------- #
# helpers
# --------------------------------------------------------------------------- #
def _round_up(x, m):
    return (x + m - 1) // m * m


def _pick_tile_rows(out_rows, max_rows):
    """Largest divisor of out_rows that is <= max_rows (>= 1)."""
    best = 1
    for d in range(1, out_rows + 1):
        if out_rows % d == 0 and d <= max_rows:
            best = d
    return best


def _prep_conv_weight(w, c_in_pad, c_out_pad):
    """PyTorch Conv2d weight (Cout, Cin, 3, 3) -> (9, Cin_pad, Cout_pad)."""
    c_out, c_in = int(w.shape[0]), int(w.shape[1])
    wt = jnp.transpose(w, (2, 3, 1, 0)).reshape(9, c_in, c_out)
    return jnp.pad(wt, ((0, 0), (0, c_in_pad - c_in), (0, c_out_pad - c_out)))


def _pad_channels(v, c_pad):
    return jnp.pad(v, (0, c_pad - v.shape[0]))


def _col_mask(tile_rows, w_lay, wo_valid):
    """(tile_rows*w_lay, 1) f32 mask: 1 for valid output columns, 0 for junk."""
    col = (jnp.arange(w_lay) < wo_valid).astype(jnp.float32)
    return jnp.tile(col, tile_rows).reshape(tile_rows * w_lay, 1)


def _fold_bn(stats, count, gamma_pad, beta_pad):
    """Global (sum, sumsq) partials -> folded scale/shift for y*scale + shift."""
    s = jnp.sum(stats, axis=(0, 1))                       # (2, Cpad)
    mean = s[0] / count
    var = jnp.maximum(s[1] / count - mean * mean, 0.0)    # biased variance
    inv = jax.lax.rsqrt(var + _EPS)
    scale = gamma_pad * inv
    shift = beta_pad - mean * scale
    return scale.reshape(1, -1), shift.reshape(1, -1)


# --------------------------------------------------------------------------- #
# kernels
# --------------------------------------------------------------------------- #
def _make_conv_stats_kernel(tile_rows, w_lay, wo_valid, apply_input_bn):
    """Fused per-(image, row-tile) body:
       [optional: previous-stage BN (folded scale/shift) + ReLU on the slab]
       3x3 valid conv as 9 shifted 2-D MXU matmuls + bias,
       masked single-pass per-tile (sum, sum_sq) BatchNorm partials.
    """

    def kernel(*refs):
        if apply_input_bn:
            (xm_ref, xa_ref, xb_ref, scale_ref, shift_ref,
             w_ref, b_ref, mask_ref, y_ref, st_ref) = refs
        else:
            (xm_ref, xa_ref, xb_ref,
             w_ref, b_ref, mask_ref, y_ref, st_ref) = refs

        c_in = xm_ref.shape[-1]
        c_pad = y_ref.shape[-1]
        m = tile_rows * w_lay

        # Flat (rows*w_lay, C) slab: tile rows + 2 halo rows + 8 zero pad rows
        # so every shifted tap slice below stays in bounds.
        slab = jnp.concatenate(
            [xm_ref[0], xa_ref[0], xb_ref[0],
             jnp.zeros((_SUBLANE, c_in), xm_ref.dtype)],
            axis=0,
        ).astype(jnp.float32)

        if apply_input_bn:
            # Previous stage's BatchNorm + ReLU applied in VMEM, so the
            # normalized activation never round-trips through HBM.
            slab = jnp.maximum(slab * scale_ref[...] + shift_ref[...], 0.0)

        # Direct 3x3 valid conv in flat layout: output position p = r*w_lay + c
        # gets tap (dy, dx) from flat input position p + dy*w_lay + dx.
        # Columns c >= wo_valid wrap into the next row -> junk, zeroed below.
        acc = jnp.zeros((m, c_pad), jnp.float32)
        for dy in range(3):                 # statically unrolled 9-tap loop
            for dx in range(3):
                off = dy * w_lay + dx
                acc = acc + jnp.dot(
                    slab[off:off + m, :],
                    w_ref[dy * 3 + dx],
                    preferred_element_type=jnp.float32,
                )
        y = (acc + b_ref[...].astype(jnp.float32)) * mask_ref[...]

        y_ref[...] = y.reshape(1, m, c_pad).astype(y_ref.dtype)

        # Single-pass partial BatchNorm statistics (global reduction in wrapper).
        s = jnp.sum(y, axis=0, keepdims=True)
        sq = jnp.sum(y * y, axis=0, keepdims=True)
        st_ref[...] = jnp.concatenate([s, sq], axis=0).reshape(1, 1, 2, c_pad)

    return kernel


def _make_bn_relu_kernel(c_out):
    """Final pass: y*scale + shift, ReLU, drop lane padding of the channels."""

    def kernel(y_ref, scale_ref, shift_ref, o_ref):
        y = y_ref[0].astype(jnp.float32)
        z = jnp.maximum(y * scale_ref[...] + shift_ref[...], 0.0)
        o_ref[...] = z[:, :c_out].reshape(1, y.shape[0], c_out).astype(o_ref.dtype)

    return kernel


# --------------------------------------------------------------------------- #
# pallas_call wrappers
# --------------------------------------------------------------------------- #
def _conv_stage(x_flat, w_mat, bias, n_rows_in, tile_rows, w_lay, wo_valid,
                scale=None, shift=None):
    """One 3x3-valid-conv stage over flat-layout input.

    x_flat : (N, n_rows_in * w_lay, Cin)   raw previous activation (flat NHWC)
    w_mat  : (9, Cin, Cpad), bias: (1, Cpad)
    scale/shift : optional (1, Cpad) folded BatchNorm of the *previous* stage.
    Returns (y_raw (N, (n_rows_in-2)*w_lay, Cpad), stats (N, T, 2, Cpad)).
    """
    n = x_flat.shape[0]
    c_in = x_flat.shape[-1]
    c_pad = w_mat.shape[-1]
    n_rows_out = n_rows_in - 2
    assert n_rows_out % tile_rows == 0
    t = n_rows_out // tile_rows
    m_tile = tile_rows * w_lay
    apply_bn = scale is not None

    x_main = pl.BlockSpec((1, m_tile, c_in), lambda i, j: (i, j, 0))
    x_halo_a = pl.BlockSpec((1, w_lay, c_in),
                            lambda i, j: (i, (j + 1) * tile_rows, 0))
    x_halo_b = pl.BlockSpec((1, w_lay, c_in),
                            lambda i, j: (i, (j + 1) * tile_rows + 1, 0))
    vec_spec = pl.BlockSpec((1, c_pad), lambda i, j: (0, 0))
    w_spec = pl.BlockSpec((9, c_in, c_pad), lambda i, j: (0, 0, 0))
    mask_spec = pl.BlockSpec((m_tile, 1), lambda i, j: (0, 0))

    in_specs = [x_main, x_halo_a, x_halo_b]
    args = [x_flat, x_flat, x_flat]
    if apply_bn:
        in_specs += [vec_spec, vec_spec]
        args += [scale, shift]
    in_specs += [w_spec, vec_spec, mask_spec]
    args += [w_mat, bias, _col_mask(tile_rows, w_lay, wo_valid)]

    out_shape = (
        jax.ShapeDtypeStruct((n, n_rows_out * w_lay, c_pad), jnp.float32),
        jax.ShapeDtypeStruct((n, t, 2, c_pad), jnp.float32),
    )
    out_specs = (
        pl.BlockSpec((1, m_tile, c_pad), lambda i, j: (i, j, 0)),
        pl.BlockSpec((1, 1, 2, c_pad), lambda i, j: (i, j, 0, 0)),
    )

    # VMEM sizing (generous; blocks are budgeted so 2x buffering stays far
    # under v7x's 64 MiB physical / 32 MiB default scoped VMEM).
    block_bytes = 4 * ((tile_rows + 2) * w_lay * c_in + 4 * m_tile * c_pad + 2 * c_pad)
    fixed_bytes = 4 * (9 * c_in * c_pad + 4 * c_pad + m_tile)
    vmem_limit = int(min(max(3 * (2 * block_bytes + fixed_bytes), 16 << 20), 32 << 20))

    flops = 2 * n * n_rows_out * w_lay * 9 * c_in * c_pad
    bytes_accessed = 4 * (n * n_rows_in * w_lay * c_in
                          + n * n_rows_out * w_lay * c_pad
                          + n * t * 2 * c_pad
                          + 9 * c_in * c_pad)

    return pl.pallas_call(
        _make_conv_stats_kernel(tile_rows, w_lay, wo_valid, apply_bn),
        grid=(n, t),
        in_specs=in_specs,
        out_specs=out_specs,
        out_shape=out_shape,
        compiler_params=pltpu.CompilerParams(
            dimension_semantics=("parallel", "parallel"),
            vmem_limit_bytes=vmem_limit,
        ),
        cost_estimate=pl.CostEstimate(
            flops=flops, transcendentals=0, bytes_accessed=bytes_accessed),
    )(*args)


def _bn_relu_stage(y_flat, scale, shift, tile_rows, w_lay, c_out):
    """Tiled BN(scale/shift) + ReLU pass; emits only the real output channels."""
    n, rows_flat, c_pad = y_flat.shape
    n_rows = rows_flat // w_lay
    assert n_rows % tile_rows == 0
    t = n_rows // tile_rows
    m_tile = tile_rows * w_lay

    vmem_limit = int(min(max(8 * 4 * m_tile * (c_pad + c_out), 16 << 20), 32 << 20))
    return pl.pallas_call(
        _make_bn_relu_kernel(c_out),
        grid=(n, t),
        in_specs=[
            pl.BlockSpec((1, m_tile, c_pad), lambda i, j: (i, j, 0)),
            pl.BlockSpec((1, c_pad), lambda i, j: (0, 0)),
            pl.BlockSpec((1, c_pad), lambda i, j: (0, 0)),
        ],
        out_specs=pl.BlockSpec((1, m_tile, c_out), lambda i, j: (i, j, 0)),
        out_shape=jax.ShapeDtypeStruct((n, rows_flat, c_out), jnp.float32),
        compiler_params=pltpu.CompilerParams(
            dimension_semantics=("parallel", "parallel"),
            vmem_limit_bytes=vmem_limit,
        ),
        cost_estimate=pl.CostEstimate(
            flops=3 * n * rows_flat * c_pad,
            transcendentals=0,
            bytes_accessed=4 * (n * rows_flat * (c_pad + c_out) + 4 * c_pad),
        ),
    )(y_flat, scale, shift)


# --------------------------------------------------------------------------- #
# module forward
# --------------------------------------------------------------------------- #
def double_convolution(x_nchw, params, *, max_tile_rows=None):
    """Forward of Double_Convolution(in_ch, out_ch, up_conv=False), training-mode BN."""
    (w1, b1, g1, be1, w2, b2, g2, be2) = params
    n, c_in, h, w = x_nchw.shape
    c_out = int(w1.shape[0])
    assert h >= 5 and w >= 5, "need at least 5x5 spatial for two valid 3x3 convs"

    w_lay = _round_up(w, _SUBLANE)           # flat layout width (zero-padded cols)
    c_pad = _round_up(c_out, _LANE)          # lane-dense channel padding
    ho1, wo1 = h - 2, w - 2
    ho2, wo2 = h - 4, w - 4

    # glue: NCHW -> flat NHWC layout (N, rows * w_lay, C)
    x = jnp.transpose(x_nchw, (0, 2, 3, 1))
    if w_lay != w:
        x = jnp.pad(x, ((0, 0), (0, 0), (0, w_lay - w), (0, 0)))
    x_flat = x.reshape(n, h * w_lay, c_in)

    # parameters in kernel layout (channel-padded, zero gamma/beta on pads)
    w1m = _prep_conv_weight(w1, c_in, c_pad)
    w2m = _prep_conv_weight(w2, c_pad, c_pad)
    b1p = _pad_channels(b1, c_pad).reshape(1, c_pad)
    b2p = _pad_channels(b2, c_pad).reshape(1, c_pad)
    g1p, be1p = _pad_channels(g1, c_pad), _pad_channels(be1, c_pad)
    g2p, be2p = _pad_channels(g2, c_pad), _pad_channels(be2, c_pad)

    # row-tile sizes from the VMEM block budget (optionally capped by caller)
    budget1 = max(1, _VMEM_BLOCK_BUDGET // (4 * w_lay * (c_in + 2 * c_pad)))
    budget2 = max(1, _VMEM_BLOCK_BUDGET // (4 * w_lay * (3 * c_pad)))
    if max_tile_rows is not None:
        budget1 = min(budget1, max_tile_rows)
        budget2 = min(budget2, max_tile_rows)
    th1 = _pick_tile_rows(ho1, budget1)
    th2 = _pick_tile_rows(ho2, budget2)

    # stage 1: conv1 + bias, global BN1 statistics
    y1raw, stats1 = _conv_stage(x_flat, w1m, b1p, h, th1, w_lay, wo1)
    scale1, shift1 = _fold_bn(stats1, n * ho1 * wo1, g1p, be1p)

    # stage 2: (BN1 + ReLU fused in-VMEM) + conv2 + bias, global BN2 statistics
    y2raw, stats2 = _conv_stage(y1raw, w2m, b2p, ho1, th2, w_lay, wo2,
                                scale=scale1, shift=shift1)
    scale2, shift2 = _fold_bn(stats2, n * ho2 * wo2, g2p, be2p)

    # stage 3: BN2 + ReLU, drop channel padding
    out_flat = _bn_relu_stage(y2raw, scale2, shift2, th2, w_lay, c_out)

    # glue: flat layout -> NCHW, drop junk columns
    out = out_flat.reshape(n, ho2, w_lay, c_out)[:, :, :wo2, :]
    return jnp.transpose(out, (0, 3, 1, 2))


# --------------------------------------------------------------------------- #
# params / reference / demo
# --------------------------------------------------------------------------- #
def init_params(key, c_in, c_out):
    """Deterministic init mimicking PyTorch defaults (uniform +/- 1/sqrt(fan_in))."""
    k = jax.random.split(key, 4)
    bnd1 = 1.0 / math.sqrt(c_in * 9)
    bnd2 = 1.0 / math.sqrt(c_out * 9)
    w1 = jax.random.uniform(k[0], (c_out, c_in, 3, 3), jnp.float32, -bnd1, bnd1)
    b1 = jax.random.uniform(k[1], (c_out,), jnp.float32, -bnd1, bnd1)
    w2 = jax.random.uniform(k[2], (c_out, c_out, 3, 3), jnp.float32, -bnd2, bnd2)
    b2 = jax.random.uniform(k[3], (c_out,), jnp.float32, -bnd2, bnd2)
    g1 = jnp.ones((c_out,), jnp.float32)
    be1 = jnp.zeros((c_out,), jnp.float32)
    g2 = jnp.ones((c_out,), jnp.float32)
    be2 = jnp.zeros((c_out,), jnp.float32)
    return (w1, b1, g1, be1, w2, b2, g2, be2)


def _reference(x_nchw, params):
    """Pure-JAX reference mirroring the PyTorch module (training-mode BN)."""
    (w1, b1, g1, be1, w2, b2, g2, be2) = params

    def conv(x, w, b):
        y = jax.lax.conv_general_dilated(
            x, w, window_strides=(1, 1), padding="VALID",
            dimension_numbers=("NCHW", "OIHW", "NCHW"),
            precision=jax.lax.Precision.HIGHEST)
        return y + b.reshape(1, -1, 1, 1)

    def bn_relu(y, g, be):
        mean = jnp.mean(y, axis=(0, 2, 3), keepdims=True)
        var = jnp.mean((y - mean) ** 2, axis=(0, 2, 3), keepdims=True)
        yh = (y - mean) * jax.lax.rsqrt(var + _EPS)
        yh = yh * g.reshape(1, -1, 1, 1) + be.reshape(1, -1, 1, 1)
        return jnp.maximum(yh, 0.0)

    y = bn_relu(conv(x_nchw, w1, b1), g1, be1)
    return bn_relu(conv(y, w2, b2), g2, be2)


if __name__ == "__main__":
    key = jax.random.PRNGKey(0)
    kx, kp = jax.random.split(key)

    N, C_IN, C_OUT, H, W = 2, 4, 8, 16, 16
    x = jax.random.normal(kx, (N, C_IN, H, W), jnp.float32)
    params = init_params(kp, C_IN, C_OUT)

    # Small row-tile cap so the demo exercises the multi-tile path (halo blocks
    # + cross-tile BatchNorm reduction); real sizes use the VMEM-budget default.
    fwd = jax.jit(functools.partial(double_convolution, max_tile_rows=7))
    out = jax.block_until_ready(fwd(x, params))

    assert out.shape == (N, C_OUT, H - 4, W - 4), out.shape
    assert out.dtype == jnp.float32
    assert bool(jnp.all(out >= 0.0))  # ReLU output

    ref = jax.block_until_ready(jax.jit(_reference)(x, params))
    err = float(jnp.max(jnp.abs(out - ref)))
    assert err < 5e-3, f"mismatch vs reference: max abs err {err}"
    print("KERNEL_OK")
</pallas_src>

<mosaic_0001>
module attributes {stable_mosaic.version = 11 : i64} {
  func.func @kernel(%arg0: i32, %arg1: i32, %arg2: memref<1x96x128xf32, #tpu.memory_space<vmem>>, %arg3: memref<1x128xf32, #tpu.memory_space<vmem>>, %arg4: memref<1x128xf32, #tpu.memory_space<vmem>>, %arg5: memref<1x96x8xf32, #tpu.memory_space<vmem>>) attributes {dimension_semantics = [#tpu.dimension_semantics<parallel>, #tpu.dimension_semantics<parallel>], iteration_bounds = array<i64: 2, 2>, scalar_prefetch = 0 : i64, scratch_operands = 0 : i64, tpu.core_type = #tpu.core_type<tc>, window_params = [{transform_indices = @transform_0, window_bounds = array<i64: 1, 96, 128>}, {pipeline_mode = #tpu.pipeline_mode<synchronous>, transform_indices = @transform_1, window_bounds = array<i64: 1, 128>}, {pipeline_mode = #tpu.pipeline_mode<synchronous>, transform_indices = @transform_2, window_bounds = array<i64: 1, 128>}, {transform_indices = @transform_3, window_bounds = array<i64: 1, 96, 8>}]} {
    %c0 = arith.constant 0 : index
    %c0_0 = arith.constant 0 : index
    %c0_1 = arith.constant 0 : index
    %0 = vector.load %arg2[%c0, %c0_0, %c0_1] : memref<1x96x128xf32, #tpu.memory_space<vmem>>, vector<1x96x128xf32>
    %1 = vector.shape_cast %0 : vector<1x96x128xf32> to vector<96x128xf32>
    %c0_2 = arith.constant 0 : index
    %c0_3 = arith.constant 0 : index
    %2 = vector.load %arg3[%c0_2, %c0_3] : memref<1x128xf32, #tpu.memory_space<vmem>>, vector<1x128xf32>
    %3 = vector.broadcast %2 : vector<1x128xf32> to vector<96x128xf32>
    %4 = arith.mulf %1, %3 : vector<96x128xf32>
    %c0_4 = arith.constant 0 : index
    %c0_5 = arith.constant 0 : index
    %5 = vector.load %arg4[%c0_4, %c0_5] : memref<1x128xf32, #tpu.memory_space<vmem>>, vector<1x128xf32>
    %6 = vector.broadcast %5 : vector<1x128xf32> to vector<96x128xf32>
    %7 = arith.addf %4, %6 : vector<96x128xf32>
    %cst = arith.constant 0.000000e+00 : f32
    %8 = vector.broadcast %cst : f32 to vector<96x128xf32>
    %9 = arith.maximumf %7, %8 : vector<96x128xf32>
    %10 = vector.extract_strided_slice %9 {offsets = [0, 0], sizes = [96, 8], strides = [1, 1]} : vector<96x128xf32> to vector<96x8xf32>
    %11 = vector.shape_cast %10 : vector<96x8xf32> to vector<1x96x8xf32>
    %c0_6 = arith.constant 0 : index
    %c0_7 = arith.constant 0 : index
    %c0_8 = arith.constant 0 : index
    %12 = vector.load %arg5[%c0_6, %c0_7, %c0_8] : memref<1x96x8xf32, #tpu.memory_space<vmem>>, vector<1x96x8xf32>
    tpu.vector_store %arg5[%c0_6, %c0_7, %c0_8], %11 {strides = array<i32>} : memref<1x96x8xf32, #tpu.memory_space<vmem>>, vector<1x96x8xf32>,
    return
  }
  func.func @transform_0(%arg0: i32, %arg1: i32) -> (i32, i32, i32) {
    %c0_i32 = arith.constant 0 : i32
    %c0_i32_0 = arith.constant 0 : i32
    return %arg0, %arg1, %c0_i32 : i32, i32, i32
  }
  func.func @transform_1(%arg0: i32, %arg1: i32) -> (i32, i32) {
    %c0_i32 = arith.constant 0 : i32
    %c0_i32_0 = arith.constant 0 : i32
    %c0_i32_1 = arith.constant 0 : i32
    return %c0_i32, %c0_i32_0 : i32, i32
  }
  func.func @transform_2(%arg0: i32, %arg1: i32) -> (i32, i32) {
    %c0_i32 = arith.constant 0 : i32
    %c0_i32_0 = arith.constant 0 : i32
    %c0_i32_1 = arith.constant 0 : i32
    return %c0_i32, %c0_i32_0 : i32, i32
  }
  func.func @transform_3(%arg0: i32, %arg1: i32) -> (i32, i32, i32) {
    %c0_i32 = arith.constant 0 : i32
    %c0_i32_0 = arith.constant 0 : i32
    return %arg0, %arg1, %c0_i32 : i32, i32, i32
  }
}

module attributes {stable_mosaic.version = 11 : i64} {
  func.func @kernel(%arg0: i32, %arg1: i32, %arg2: memref<1x96x128xf32, #tpu.memory_space<vmem>>, %arg3: memref<1x16x128xf32, #tpu.memory_space<vmem>>, %arg4: memref<1x16x128xf32, #tpu.memory_space<vmem>>, %arg5: memref<1x128xf32, #tpu.memory_space<vmem>>, %arg6: memref<1x128xf32, #tpu.memory_space<vmem>>, %arg7: memref<9x128x128xf32, #tpu.memory_space<vmem>>, %arg8: memref<1x128xf32, #tpu.memory_space<vmem>>, %arg9: memref<96x1xf32, #tpu.memory_space<vmem>>, %arg10: memref<1x96x128xf32, #tpu.memory_space<vmem>>, %arg11: memref<1x1x2x128xf32, #tpu.memory_space<vmem>>) attributes {dimension_semantics = [#tpu.dimension_semantics<parallel>, #tpu.dimension_semantics<parallel>], iteration_bounds = array<i64: 2, 2>, scalar_prefetch = 0 : i64, scratch_operands = 0 : i64, tpu.core_type = #tpu.core_type<tc>, window_params = [{transform_indices = @transform_0, window_bounds = array<i64: 1, 96, 128>}, {transform_indices = @transform_1, window_bounds = array<i64: 1, 16, 128>}, {transform_indices = @transform_2, window_bounds = array<i64: 1, 16, 128>}, {pipeline_mode = #tpu.pipeline_mode<synchronous>, transform_indices = @transform_3, window_bounds = array<i64: 1, 128>}, {pipeline_mode = #tpu.pipeline_mode<synchronous>, transform_indices = @transform_4, window_bounds = array<i64: 1, 128>}, {pipeline_mode = #tpu.pipeline_mode<synchronous>, transform_indices = @transform_5, window_bounds = array<i64: 9, 128, 128>}, {pipeline_mode = #tpu.pipeline_mode<synchronous>, transform_indices = @transform_6, window_bounds = array<i64: 1, 128>}, {pipeline_mode = #tpu.pipeline_mode<synchronous>, transform_indices = @transform_7, window_bounds = array<i64: 96, 1>}, {transform_indices = @transform_8, window_bounds = array<i64: 1, 96, 128>}, {transform_indices = @transform_9, window_bounds = array<i64: 1, 1, 2, 128>}]} {
    %c0 = arith.constant 0 : index
    %c0_0 = arith.constant 0 : index
    %c0_1 = arith.constant 0 : index
    %0 = vector.load %arg2[%c0, %c0_0, %c0_1] : memref<1x96x128xf32, #tpu.memory_space<vmem>>, vector<1x96x128xf32>
    %1 = vector.shape_cast %0 : vector<1x96x128xf32> to vector<96x128xf32>
    %c0_2 = arith.constant 0 : index
    %c0_3 = arith.constant 0 : index
    %c0_4 = arith.constant 0 : index
    %2 = vector.load %arg3[%c0_2, %c0_3, %c0_4] : memref<1x16x128xf32, #tpu.memory_space<vmem>>, vector<1x16x128xf32>
    %3 = vector.shape_cast %2 : vector<1x16x128xf32> to vector<16x128xf32>
    %c0_5 = arith.constant 0 : index
    %c0_6 = arith.constant 0 : index
    %c0_7 = arith.constant 0 : index
    %4 = vector.load %arg4[%c0_5, %c0_6, %c0_7] : memref<1x16x128xf32, #tpu.memory_space<vmem>>, vector<1x16x128xf32>
    %5 = vector.shape_cast %4 : vector<1x16x128xf32> to vector<16x128xf32>
    %cst = arith.constant 0.000000e+00 : f32
    %6 = vector.broadcast %cst : f32 to vector<8x128xf32>
    %7 = tpu.concatenate %1, %3, %5, %6 in 0 : vector<96x128xf32>, vector<16x128xf32>, vector<16x128xf32>, vector<8x128xf32> -> vector<136x128xf32>
    %c0_8 = arith.constant 0 : index
    %c0_9 = arith.constant 0 : index
    %8 = vector.load %arg5[%c0_8, %c0_9] : memref<1x128xf32, #tpu.memory_space<vmem>>, vector<1x128xf32>
    %9 = vector.broadcast %8 : vector<1x128xf32> to vector<136x128xf32>
    %10 = arith.mulf %7, %9 : vector<136x128xf32>
    %c0_10 = arith.constant 0 : index
    %c0_11 = arith.constant 0 : index
    %11 = vector.load %arg6[%c0_10, %c0_11] : memref<1x128xf32, #tpu.memory_space<vmem>>, vector<1x128xf32>
    %12 = vector.broadcast %11 : vector<1x128xf32> to vector<136x128xf32>
    %13 = arith.addf %10, %12 : vector<136x128xf32>
    %cst_12 = arith.constant 0.000000e+00 : f32
    %14 = vector.broadcast %cst_12 : f32 to vector<136x128xf32>
    %15 = arith.maximumf %13, %14 : vector<136x128xf32>
    %cst_13 = arith.constant 0.000000e+00 : f32
    %16 = vector.broadcast %cst_13 : f32 to vector<96x128xf32>
    %17 = vector.extract_strided_slice %15 {offsets = [0, 0], sizes = [96, 128], strides = [1, 1]} : vector<136x128xf32> to vector<96x128xf32>
    %c0_14 = arith.constant 0 : index
    %c0_15 = arith.constant 0 : index
    %c0_16 = arith.constant 0 : index
    %18 = vector.load %arg7[%c0_14, %c0_15, %c0_16] : memref<9x128x128xf32, #tpu.memory_space<vmem>>, vector<1x128x128xf32>
    %19 = vector.shape_cast %18 : vector<1x128x128xf32> to vector<128x128xf32>
    %cst_17 = arith.constant dense<0.000000e+00> : vector<96x128xf32>
    %20 = tpu.matmul %17, %19, %cst_17 {dimension_numbers = #tpu.dot_dimension_numbers<[1], [0], [0], [1], [0, 0, 1, 1], [], []>} : vector<96x128xf32>, vector<128x128xf32>, vector<96x128xf32> -> vector<96x128xf32>
    %21 = arith.addf %16, %20 : vector<96x128xf32>
    %22 = vector.extract_strided_slice %15 {offsets = [1, 0], sizes = [96, 128], strides = [1, 1]} : vector<136x128xf32> to vector<96x128xf32>
    %c1 = arith.constant 1 : index
    %c0_18 = arith.constant 0 : index
    %c0_19 = arith.constant 0 : index
    %23 = vector.load %arg7[%c1, %c0_18, %c0_19] : memref<9x128x128xf32, #tpu.memory_space<vmem>>, vector<1x128x128xf32>
    %24 = vector.shape_cast %23 : vector<1x128x128xf32> to vector<128x128xf32>
    %cst_20 = arith.constant dense<0.000000e+00> : vector<96x128xf32>
    %25 = tpu.matmul %22, %24, %cst_20 {dimension_numbers = #tpu.dot_dimension_numbers<[1], [0], [0], [1], [0, 0, 1, 1], [], []>} : vector<96x128xf32>, vector<128x128xf32>, vector<96x128xf32> -> vector<96x128xf32>
    %26 = arith.addf %21, %25 : vector<96x128xf32>
    %27 = vector.extract_strided_slice %15 {offsets = [2, 0], sizes = [96, 128], strides = [1, 1]} : vector<136x128xf32> to vector<96x128xf32>
    %c2 = arith.constant 2 : index
    %c0_21 = arith.constant 0 : index
    %c0_22 = arith.constant 0 : index
    %28 = vector.load %arg7[%c2, %c0_21, %c0_22] : memref<9x128x128xf32, #tpu.memory_space<vmem>>, vector<1x128x128xf32>
    %29 = vector.shape_cast %28 : vector<1x128x128xf32> to vector<128x128xf32>
    %cst_23 = arith.constant dense<0.000000e+00> : vector<96x128xf32>
    %30 = tpu.matmul %27, %29, %cst_23 {dimension_numbers = #tpu.dot_dimension_numbers<[1], [0], [0], [1], [0, 0, 1, 1], [], []>} : vector<96x128xf32>, vector<128x128xf32>, vector<96x128xf32> -> vector<96x128xf32>
    %31 = arith.addf %26, %30 : vector<96x128xf32>
    %32 = vector.extract_strided_slice %15 {offsets = [16, 0], sizes = [96, 128], strides = [1, 1]} : vector<136x128xf32> to vector<96x128xf32>
    %c3 = arith.constant 3 : index
    %c0_24 = arith.constant 0 : index
    %c0_25 = arith.constant 0 : index
    %33 = vector.load %arg7[%c3, %c0_24, %c0_25] : memref<9x128x128xf32, #tpu.memory_space<vmem>>, vector<1x128x128xf32>
    %34 = vector.shape_cast %33 : vector<1x128x128xf32> to vector<128x128xf32>
    %cst_26 = arith.constant dense<0.000000e+00> : vector<96x128xf32>
    %35 = tpu.matmul %32, %34, %cst_26 {dimension_numbers = #tpu.dot_dimension_numbers<[1], [0], [0], [1], [0, 0, 1, 1], [], []>} : vector<96x128xf32>, vector<128x128xf32>, vector<96x128xf32> -> vector<96x128xf32>
    %36 = arith.addf %31, %35 : vector<96x128xf32>
    %37 = vector.extract_strided_slice %15 {offsets = [17, 0], sizes = [96, 128], strides = [1, 1]} : vector<136x128xf32> to vector<96x128xf32>
    %c4 = arith.constant 4 : index
    %c0_27 = arith.constant 0 : index
    %c0_28 = arith.constant 0 : index
    %38 = vector.load %arg7[%c4, %c0_27, %c0_28] : memref<9x128x128xf32, #tpu.memory_space<vmem>>, vector<1x128x128xf32>
    %39 = vector.shape_cast %38 : vector<1x128x128xf32> to vector<128x128xf32>
    %cst_29 = arith.constant dense<0.000000e+00> : vector<96x128xf32>
    %40 = tpu.matmul %37, %39, %cst_29 {dimension_numbers = #tpu.dot_dimension_numbers<[1], [0], [0], [1], [0, 0, 1, 1], [], []>} : vector<96x128xf32>, vector<128x128xf32>, vector<96x128xf32> -> vector<96x128xf32>
    %41 = arith.addf %36, %40 : vector<96x128xf32>
    %42 = vector.extract_strided_slice %15 {offsets = [18, 0], sizes = [96, 128], strides = [1, 1]} : vector<136x128xf32> to vector<96x128xf32>
    %c5 = arith.constant 5 : index
    %c0_30 = arith.constant 0 : index
    %c0_31 = arith.constant 0 : index
    %43 = vector.load %arg7[%c5, %c0_30, %c0_31] : memref<9x128x128xf32, #tpu.memory_space<vmem>>, vector<1x128x128xf32>
    %44 = vector.shape_cast %43 : vector<1x128x128xf32> to vector<128x128xf32>
    %cst_32 = arith.constant dense<0.000000e+00> : vector<96x128xf32>
    %45 = tpu.matmul %42, %44, %cst_32 {dimension_numbers = #tpu.dot_dimension_numbers<[1], [0], [0], [1], [0, 0, 1, 1], [], []>} : vector<96x128xf32>, vector<128x128xf32>, vector<96x128xf32> -> vector<96x128xf32>
    %46 = arith.addf %41, %45 : vector<96x128xf32>
    %47 = vector.extract_strided_slice %15 {offsets = [32, 0], sizes = [96, 128], strides = [1, 1]} : vector<136x128xf32> to vector<96x128xf32>
    %c6 = arith.constant 6 : index
    %c0_33 = arith.constant 0 : index
    %c0_34 = arith.constant 0 : index
    %48 = vector.load %arg7[%c6, %c0_33, %c0_34] : memref<9x128x128xf32, #tpu.memory_space<vmem>>, vector<1x128x128xf32>
    %49 = vector.shape_cast %48 : vector<1x128x128xf32> to vector<128x128xf32>
    %cst_35 = arith.constant dense<0.000000e+00> : vector<96x128xf32>
    %50 = tpu.matmul %47, %49, %cst_35 {dimension_numbers = #tpu.dot_dimension_numbers<[1], [0], [0], [1], [0, 0, 1, 1], [], []>} : vector<96x128xf32>, vector<128x128xf32>, vector<96x128xf32> -> vector<96x128xf32>
    %51 = arith.addf %46, %50 : vector<96x128xf32>
    %52 = vector.extract_strided_slice %15 {offsets = [33, 0], sizes = [96, 128], strides = [1, 1]} : vector<136x128xf32> to vector<96x128xf32>
    %c7 = arith.constant 7 : index
    %c0_36 = arith.constant 0 : index
    %c0_37 = arith.constant 0 : index
    %53 = vector.load %arg7[%c7, %c0_36, %c0_37] : memref<9x128x128xf32, #tpu.memory_space<vmem>>, vector<1x128x128xf32>
    %54 = vector.shape_cast %53 : vector<1x128x128xf32> to vector<128x128xf32>
    %cst_38 = arith.constant dense<0.000000e+00> : vector<96x128xf32>
    %55 = tpu.matmul %52, %54, %cst_38 {dimension_numbers = #tpu.dot_dimension_numbers<[1], [0], [0], [1], [0, 0, 1, 1], [], []>} : vector<96x128xf32>, vector<128x128xf32>, vector<96x128xf32> -> vector<96x128xf32>
    %56 = arith.addf %51, %55 : vector<96x128xf32>
    %57 = vector.extract_strided_slice %15 {offsets = [34, 0], sizes = [96, 128], strides = [1, 1]} : vector<136x128xf32> to vector<96x128xf32>
    %c8 = arith.constant 8 : index
    %c0_39 = arith.constant 0 : index
    %c0_40 = arith.constant 0 : index
    %58 = vector.load %arg7[%c8, %c0_39, %c0_40] : memref<9x128x128xf32, #tpu.memory_space<vmem>>, vector<1x128x128xf32>
    %59 = vector.shape_cast %58 : vector<1x128x128xf32> to vector<128x128xf32>
    %cst_41 = arith.constant dense<0.000000e+00> : vector<96x128xf32>
    %60 = tpu.matmul %57, %59, %cst_41 {dimension_numbers = #tpu.dot_dimension_numbers<[1], [0], [0], [1], [0, 0, 1, 1], [], []>} : vector<96x128xf32>, vector<128x128xf32>, vector<96x128xf32> -> vector<96x128xf32>
    %61 = arith.addf %56, %60 : vector<96x128xf32>
    %c0_42 = arith.constant 0 : index
    %c0_43 = arith.constant 0 : index
    %62 = vector.load %arg8[%c0_42, %c0_43] : memref<1x128xf32, #tpu.memory_space<vmem>>, vector<1x128xf32>
    %63 = vector.broadcast %62 : vector<1x128xf32> to vector<96x128xf32>
    %64 = arith.addf %61, %63 : vector<96x128xf32>
    %c0_44 = arith.constant 0 : index
    %c0_45 = arith.constant 0 : index
    %65 = vector.load %arg9[%c0_44, %c0_45] : memref<96x1xf32, #tpu.memory_space<vmem>>, vector<96x1xf32>
    %66 = vector.broadcast %65 : vector<96x1xf32> to vector<96x128xf32>
    %67 = arith.mulf %64, %66 : vector<96x128xf32>
    %68 = vector.shape_cast %67 : vector<96x128xf32> to vector<1x96x128xf32>
    %c0_46 = arith.constant 0 : index
    %c0_47 = arith.constant 0 : index
    %c0_48 = arith.constant 0 : index
    %69 = vector.load %arg10[%c0_46, %c0_47, %c0_48] : memref<1x96x128xf32, #tpu.memory_space<vmem>>, vector<1x96x128xf32>
    tpu.vector_store %arg10[%c0_46, %c0_47, %c0_48], %68 {strides = array<i32>} : memref<1x96x128xf32, #tpu.memory_space<vmem>>, vector<1x96x128xf32>,
    %cst_49 = arith.constant dense<0.000000e+00> : vector<128xf32>
    %70 = vector.multi_reduction <add>, %67, %cst_49 [0] : vector<96x128xf32> to vector<128xf32>
    %71 = vector.shape_cast %70 : vector<128xf32> to vector<1x128xf32>
    %72 = arith.mulf %67, %67 : vector<96x128xf32>
    %cst_50 = arith.constant dense<0.000000e+00> : vector<128xf32>
    %73 = vector.multi_reduction <add>, %72, %cst_50 [0] : vector<96x128xf32> to vector<128xf32>
    %74 = vector.shape_cast %73 : vector<128xf32> to vector<1x128xf32>
    %75 = tpu.concatenate %71, %74 in 0 : vector<1x128xf32>, vector<1x128xf32> -> vector<2x128xf32>
    %76 = vector.shape_cast %75 : vector<2x128xf32> to vector<1x1x2x128xf32>
    %c0_51 = arith.constant 0 : index
    %c0_52 = arith.constant 0 : index
    %c0_53 = arith.constant 0 : index
    %c0_54 = arith.constant 0 : index
    %77 = vector.load %arg11[%c0_51, %c0_52, %c0_53, %c0_54] : memref<1x1x2x128xf32, #tpu.memory_space<vmem>>, vector<1x1x2x128xf32>
    tpu.vector_store %arg11[%c0_51, %c0_52, %c0_53, %c0_54], %76 {strides = array<i32>} : memref<1x1x2x128xf32, #tpu.memory_space<vmem>>, vector<1x1x2x128xf32>,
    return
  }
  func.func @transform_0(%arg0: i32, %arg1: i32) -> (i32, i32, i32) {
    %c0_i32 = arith.constant 0 : i32
    %c0_i32_0 = arith.constant 0 : i32
    return %arg0, %arg1, %c0_i32 : i32, i32, i32
  }
  func.func @transform_1(%arg0: i32, %arg1: i32) -> (i32, i32, i32) {
    %c1_i32 = arith.constant 1 : i32
    %0 = arith.addi %arg1, %c1_i32 : i32
    %c6_i32 = arith.constant 6 : i32
    %1 = arith.muli %0, %c6_i32 : i32
    %c0_i32 = arith.constant 0 : i32
    %c0_i32_0 = arith.constant 0 : i32
    return %arg0, %1, %c0_i32 : i32, i32, i32
  }
  func.func @transform_2(%arg0: i32, %arg1: i32) -> (i32, i32, i32) {
    %c1_i32 = arith.constant 1 : i32
    %0 = arith.addi %arg1, %c1_i32 : i32
    %c6_i32 = arith.constant 6 : i32
    %1 = arith.muli %0, %c6_i32 : i32
    %c1_i32_0 = arith.constant 1 : i32
    %2 = arith.addi %1, %c1_i32_0 : i32
    %c0_i32 = arith.constant 0 : i32
    %c0_i32_1 = arith.constant 0 : i32
    return %arg0, %2, %c0_i32 : i32, i32, i32
  }
  func.func @transform_3(%arg0: i32, %arg1: i32) -> (i32, i32) {
    %c0_i32 = arith.constant 0 : i32
    %c0_i32_0 = arith.constant 0 : i32
    %c0_i32_1 = arith.constant 0 : i32
    return %c0_i32, %c0_i32_0 : i32, i32
  }
  func.func @transform_4(%arg0: i32, %arg1: i32) -> (i32, i32) {
    %c0_i32 = arith.constant 0 : i32
    %c0_i32_0 = arith.constant 0 : i32
    %c0_i32_1 = arith.constant 0 : i32
    return %c0_i32, %c0_i32_0 : i32, i32
  }
  func.func @transform_5(%arg0: i32, %arg1: i32) -> (i32, i32, i32) {
    %c0_i32 = arith.constant 0 : i32
    %c0_i32_0 = arith.constant 0 : i32
    %c0_i32_1 = arith.constant 0 : i32
    %c0_i32_2 = arith.constant 0 : i32
    return %c0_i32, %c0_i32_0, %c0_i32_1 : i32, i32, i32
  }
  func.func @transform_6(%arg0: i32, %arg1: i32) -> (i32, i32) {
    %c0_i32 = arith.constant 0 : i32
    %c0_i32_0 = arith.constant 0 : i32
    %c0_i32_1 = arith.constant 0 : i32
    return %c0_i32, %c0_i32_0 : i32, i32
  }
  func.func @transform_7(%arg0: i32, %arg1: i32) -> (i32, i32) {
    %c0_i32 = arith.constant 0 : i32
    %c0_i32_0 = arith.constant 0 : i32
    %c0_i32_1 = arith.constant 0 : i32
    return %c0_i32, %c0_i32_0 : i32, i32
  }
  func.func @transform_8(%arg0: i32, %arg1: i32) -> (i32, i32, i32) {
    %c0_i32 = arith.constant 0 : i32
    %c0_i32_0 = arith.constant 0 : i32
    return %arg0, %arg1, %c0_i32 : i32, i32, i32
  }
  func.func @transform_9(%arg0: i32, %arg1: i32) -> (i32, i32, i32, i32) {
    %c0_i32 = arith.constant 0 : i32
    %c0_i32_0 = arith.constant 0 : i32
    %c0_i32_1 = arith.constant 0 : i32
    return %arg0, %arg1, %c0_i32, %c0_i32_0 : i32, i32, i32, i32
  }
}

module attributes {stable_mosaic.version = 11 : i64} {
  func.func @kernel(%arg0: i32, %arg1: i32, %arg2: memref<1x112x4xf32, #tpu.memory_space<vmem>>, %arg3: memref<1x16x4xf32, #tpu.memory_space<vmem>>, %arg4: memref<1x16x4xf32, #tpu.memory_space<vmem>>, %arg5: memref<9x4x128xf32, #tpu.memory_space<vmem>>, %arg6: memref<1x128xf32, #tpu.memory_space<vmem>>, %arg7: memref<112x1xf32, #tpu.memory_space<vmem>>, %arg8: memref<1x112x128xf32, #tpu.memory_space<vmem>>, %arg9: memref<1x1x2x128xf32, #tpu.memory_space<vmem>>) attributes {dimension_semantics = [#tpu.dimension_semantics<parallel>, #tpu.dimension_semantics<parallel>], iteration_bounds = array<i64: 2, 2>, scalar_prefetch = 0 : i64, scratch_operands = 0 : i64, tpu.core_type = #tpu.core_type<tc>, window_params = [{transform_indices = @transform_0, window_bounds = array<i64: 1, 112, 4>}, {transform_indices = @transform_1, window_bounds = array<i64: 1, 16, 4>}, {transform_indices = @transform_2, window_bounds = array<i64: 1, 16, 4>}, {pipeline_mode = #tpu.pipeline_mode<synchronous>, transform_indices = @transform_3, window_bounds = array<i64: 9, 4, 128>}, {pipeline_mode = #tpu.pipeline_mode<synchronous>, transform_indices = @transform_4, window_bounds = array<i64: 1, 128>}, {pipeline_mode = #tpu.pipeline_mode<synchronous>, transform_indices = @transform_5, window_bounds = array<i64: 112, 1>}, {transform_indices = @transform_6, window_bounds = array<i64: 1, 112, 128>}, {transform_indices = @transform_7, window_bounds = array<i64: 1, 1, 2, 128>}]} {
    %c0 = arith.constant 0 : index
    %c0_0 = arith.constant 0 : index
    %c0_1 = arith.constant 0 : index
    %0 = vector.load %arg2[%c0, %c0_0, %c0_1] : memref<1x112x4xf32, #tpu.memory_space<vmem>>, vector<1x112x4xf32>
    %1 = vector.shape_cast %0 : vector<1x112x4xf32> to vector<112x4xf32>
    %c0_2 = arith.constant 0 : index
    %c0_3 = arith.constant 0 : index
    %c0_4 = arith.constant 0 : index
    %2 = vector.load %arg3[%c0_2, %c0_3, %c0_4] : memref<1x16x4xf32, #tpu.memory_space<vmem>>, vector<1x16x4xf32>
    %3 = vector.shape_cast %2 : vector<1x16x4xf32> to vector<16x4xf32>
    %c0_5 = arith.constant 0 : index
    %c0_6 = arith.constant 0 : index
    %c0_7 = arith.constant 0 : index
    %4 = vector.load %arg4[%c0_5, %c0_6, %c0_7] : memref<1x16x4xf32, #tpu.memory_space<vmem>>, vector<1x16x4xf32>
    %5 = vector.shape_cast %4 : vector<1x16x4xf32> to vector<16x4xf32>
    %cst = arith.constant 0.000000e+00 : f32
    %6 = vector.broadcast %cst : f32 to vector<8x4xf32>
    %7 = tpu.concatenate %1, %3, %5, %6 in 0 : vector<112x4xf32>, vector<16x4xf32>, vector<16x4xf32>, vector<8x4xf32> -> vector<152x4xf32>
    %cst_8 = arith.constant 0.000000e+00 : f32
    %8 = vector.broadcast %cst_8 : f32 to vector<112x128xf32>
    %9 = vector.extract_strided_slice %7 {offsets = [0, 0], sizes = [112, 4], strides = [1, 1]} : vector<152x4xf32> to vector<112x4xf32>
    %c0_9 = arith.constant 0 : index
    %c0_10 = arith.constant 0 : index
    %c0_11 = arith.constant 0 : index
    %10 = vector.load %arg5[%c0_9, %c0_10, %c0_11] : memref<9x4x128xf32, #tpu.memory_space<vmem>>, vector<1x4x128xf32>
    %11 = vector.shape_cast %10 : vector<1x4x128xf32> to vector<4x128xf32>
    %cst_12 = arith.constant dense<0.000000e+00> : vector<112x128xf32>
    %12 = tpu.matmul %9, %11, %cst_12 {dimension_numbers = #tpu.dot_dimension_numbers<[1], [0], [0], [1], [0, 0, 1, 1], [], []>} : vector<112x4xf32>, vector<4x128xf32>, vector<112x128xf32> -> vector<112x128xf32>
    %13 = arith.addf %8, %12 : vector<112x128xf32>
    %14 = vector.extract_strided_slice %7 {offsets = [1, 0], sizes = [112, 4], strides = [1, 1]} : vector<152x4xf32> to vector<112x4xf32>
    %c1 = arith.constant 1 : index
    %c0_13 = arith.constant 0 : index
    %c0_14 = arith.constant 0 : index
    %15 = vector.load %arg5[%c1, %c0_13, %c0_14] : memref<9x4x128xf32, #tpu.memory_space<vmem>>, vector<1x4x128xf32>
    %16 = vector.shape_cast %15 : vector<1x4x128xf32> to vector<4x128xf32>
    %cst_15 = arith.constant dense<0.000000e+00> : vector<112x128xf32>
    %17 = tpu.matmul %14, %16, %cst_15 {dimension_numbers = #tpu.dot_dimension_numbers<[1], [0], [0], [1], [0, 0, 1, 1], [], []>} : vector<112x4xf32>, vector<4x128xf32>, vector<112x128xf32> -> vector<112x128xf32>
    %18 = arith.addf %13, %17 : vector<112x128xf32>
    %19 = vector.extract_strided_slice %7 {offsets = [2, 0], sizes = [112, 4], strides = [1, 1]} : vector<152x4xf32> to vector<112x4xf32>
    %c2 = arith.constant 2 : index
    %c0_16 = arith.constant 0 : index
    %c0_17 = arith.constant 0 : index
    %20 = vector.load %arg5[%c2, %c0_16, %c0_17] : memref<9x4x128xf32, #tpu.memory_space<vmem>>, vector<1x4x128xf32>
    %21 = vector.shape_cast %20 : vector<1x4x128xf32> to vector<4x128xf32>
    %cst_18 = arith.constant dense<0.000000e+00> : vector<112x128xf32>
    %22 = tpu.matmul %19, %21, %cst_18 {dimension_numbers = #tpu.dot_dimension_numbers<[1], [0], [0], [1], [0, 0, 1, 1], [], []>} : vector<112x4xf32>, vector<4x128xf32>, vector<112x128xf32> -> vector<112x128xf32>
    %23 = arith.addf %18, %22 : vector<112x128xf32>
    %24 = vector.extract_strided_slice %7 {offsets = [16, 0], sizes = [112, 4], strides = [1, 1]} : vector<152x4xf32> to vector<112x4xf32>
    %c3 = arith.constant 3 : index
    %c0_19 = arith.constant 0 : index
    %c0_20 = arith.constant 0 : index
    %25 = vector.load %arg5[%c3, %c0_19, %c0_20] : memref<9x4x128xf32, #tpu.memory_space<vmem>>, vector<1x4x128xf32>
    %26 = vector.shape_cast %25 : vector<1x4x128xf32> to vector<4x128xf32>
    %cst_21 = arith.constant dense<0.000000e+00> : vector<112x128xf32>
    %27 = tpu.matmul %24, %26, %cst_21 {dimension_numbers = #tpu.dot_dimension_numbers<[1], [0], [0], [1], [0, 0, 1, 1], [], []>} : vector<112x4xf32>, vector<4x128xf32>, vector<112x128xf32> -> vector<112x128xf32>
    %28 = arith.addf %23, %27 : vector<112x128xf32>
    %29 = vector.extract_strided_slice %7 {offsets = [17, 0], sizes = [112, 4], strides = [1, 1]} : vector<152x4xf32> to vector<112x4xf32>
    %c4 = arith.constant 4 : index
    %c0_22 = arith.constant 0 : index
    %c0_23 = arith.constant 0 : index
    %30 = vector.load %arg5[%c4, %c0_22, %c0_23] : memref<9x4x128xf32, #tpu.memory_space<vmem>>, vector<1x4x128xf32>
    %31 = vector.shape_cast %30 : vector<1x4x128xf32> to vector<4x128xf32>
    %cst_24 = arith.constant dense<0.000000e+00> : vector<112x128xf32>
    %32 = tpu.matmul %29, %31, %cst_24 {dimension_numbers = #tpu.dot_dimension_numbers<[1], [0], [0], [1], [0, 0, 1, 1], [], []>} : vector<112x4xf32>, vector<4x128xf32>, vector<112x128xf32> -> vector<112x128xf32>
    %33 = arith.addf %28, %32 : vector<112x128xf32>
    %34 = vector.extract_strided_slice %7 {offsets = [18, 0], sizes = [112, 4], strides = [1, 1]} : vector<152x4xf32> to vector<112x4xf32>
    %c5 = arith.constant 5 : index
    %c0_25 = arith.constant 0 : index
    %c0_26 = arith.constant 0 : index
    %35 = vector.load %arg5[%c5, %c0_25, %c0_26] : memref<9x4x128xf32, #tpu.memory_space<vmem>>, vector<1x4x128xf32>
    %36 = vector.shape_cast %35 : vector<1x4x128xf32> to vector<4x128xf32>
    %cst_27 = arith.constant dense<0.000000e+00> : vector<112x128xf32>
    %37 = tpu.matmul %34, %36, %cst_27 {dimension_numbers = #tpu.dot_dimension_numbers<[1], [0], [0], [1], [0, 0, 1, 1], [], []>} : vector<112x4xf32>, vector<4x128xf32>, vector<112x128xf32> -> vector<112x128xf32>
    %38 = arith.addf %33, %37 : vector<112x128xf32>
    %39 = vector.extract_strided_slice %7 {offsets = [32, 0], sizes = [112, 4], strides = [1, 1]} : vector<152x4xf32> to vector<112x4xf32>
    %c6 = arith.constant 6 : index
    %c0_28 = arith.constant 0 : index
    %c0_29 = arith.constant 0 : index
    %40 = vector.load %arg5[%c6, %c0_28, %c0_29] : memref<9x4x128xf32, #tpu.memory_space<vmem>>, vector<1x4x128xf32>
    %41 = vector.shape_cast %40 : vector<1x4x128xf32> to vector<4x128xf32>
    %cst_30 = arith.constant dense<0.000000e+00> : vector<112x128xf32>
    %42 = tpu.matmul %39, %41, %cst_30 {dimension_numbers = #tpu.dot_dimension_numbers<[1], [0], [0], [1], [0, 0, 1, 1], [], []>} : vector<112x4xf32>, vector<4x128xf32>, vector<112x128xf32> -> vector<112x128xf32>
    %43 = arith.addf %38, %42 : vector<112x128xf32>
    %44 = vector.extract_strided_slice %7 {offsets = [33, 0], sizes = [112, 4], strides = [1, 1]} : vector<152x4xf32> to vector<112x4xf32>
    %c7 = arith.constant 7 : index
    %c0_31 = arith.constant 0 : index
    %c0_32 = arith.constant 0 : index
    %45 = vector.load %arg5[%c7, %c0_31, %c0_32] : memref<9x4x128xf32, #tpu.memory_space<vmem>>, vector<1x4x128xf32>
    %46 = vector.shape_cast %45 : vector<1x4x128xf32> to vector<4x128xf32>
    %cst_33 = arith.constant dense<0.000000e+00> : vector<112x128xf32>
    %47 = tpu.matmul %44, %46, %cst_33 {dimension_numbers = #tpu.dot_dimension_numbers<[1], [0], [0], [1], [0, 0, 1, 1], [], []>} : vector<112x4xf32>, vector<4x128xf32>, vector<112x128xf32> -> vector<112x128xf32>
    %48 = arith.addf %43, %47 : vector<112x128xf32>
    %49 = vector.extract_strided_slice %7 {offsets = [34, 0], sizes = [112, 4], strides = [1, 1]} : vector<152x4xf32> to vector<112x4xf32>
    %c8 = arith.constant 8 : index
    %c0_34 = arith.constant 0 : index
    %c0_35 = arith.constant 0 : index
    %50 = vector.load %arg5[%c8, %c0_34, %c0_35] : memref<9x4x128xf32, #tpu.memory_space<vmem>>, vector<1x4x128xf32>
    %51 = vector.shape_cast %50 : vector<1x4x128xf32> to vector<4x128xf32>
    %cst_36 = arith.constant dense<0.000000e+00> : vector<112x128xf32>
    %52 = tpu.matmul %49, %51, %cst_36 {dimension_numbers = #tpu.dot_dimension_numbers<[1], [0], [0], [1], [0, 0, 1, 1], [], []>} : vector<112x4xf32>, vector<4x128xf32>, vector<112x128xf32> -> vector<112x128xf32>
    %53 = arith.addf %48, %52 : vector<112x128xf32>
    %c0_37 = arith.constant 0 : index
    %c0_38 = arith.constant 0 : index
    %54 = vector.load %arg6[%c0_37, %c0_38] : memref<1x128xf32, #tpu.memory_space<vmem>>, vector<1x128xf32>
    %55 = vector.broadcast %54 : vector<1x128xf32> to vector<112x128xf32>
    %56 = arith.addf %53, %55 : vector<112x128xf32>
    %c0_39 = arith.constant 0 : index
    %c0_40 = arith.constant 0 : index
    %57 = vector.load %arg7[%c0_39, %c0_40] : memref<112x1xf32, #tpu.memory_space<vmem>>, vector<112x1xf32>
    %58 = vector.broadcast %57 : vector<112x1xf32> to vector<112x128xf32>
    %59 = arith.mulf %56, %58 : vector<112x128xf32>
    %60 = vector.shape_cast %59 : vector<112x128xf32> to vector<1x112x128xf32>
    %c0_41 = arith.constant 0 : index
    %c0_42 = arith.constant 0 : index
    %c0_43 = arith.constant 0 : index
    %61 = vector.load %arg8[%c0_41, %c0_42, %c0_43] : memref<1x112x128xf32, #tpu.memory_space<vmem>>, vector<1x112x128xf32>
    tpu.vector_store %arg8[%c0_41, %c0_42, %c0_43], %60 {strides = array<i32>} : memref<1x112x128xf32, #tpu.memory_space<vmem>>, vector<1x112x128xf32>,
    %cst_44 = arith.constant dense<0.000000e+00> : vector<128xf32>
    %62 = vector.multi_reduction <add>, %59, %cst_44 [0] : vector<112x128xf32> to vector<128xf32>
    %63 = vector.shape_cast %62 : vector<128xf32> to vector<1x128xf32>
    %64 = arith.mulf %59, %59 : vector<112x128xf32>
    %cst_45 = arith.constant dense<0.000000e+00> : vector<128xf32>
    %65 = vector.multi_reduction <add>, %64, %cst_45 [0] : vector<112x128xf32> to vector<128xf32>
    %66 = vector.shape_cast %65 : vector<128xf32> to vector<1x128xf32>
    %67 = tpu.concatenate %63, %66 in 0 : vector<1x128xf32>, vector<1x128xf32> -> vector<2x128xf32>
    %68 = vector.shape_cast %67 : vector<2x128xf32> to vector<1x1x2x128xf32>
    %c0_46 = arith.constant 0 : index
    %c0_47 = arith.constant 0 : index
    %c0_48 = arith.constant 0 : index
    %c0_49 = arith.constant 0 : index
    %69 = vector.load %arg9[%c0_46, %c0_47, %c0_48, %c0_49] : memref<1x1x2x128xf32, #tpu.memory_space<vmem>>, vector<1x1x2x128xf32>
    tpu.vector_store %arg9[%c0_46, %c0_47, %c0_48, %c0_49], %68 {strides = array<i32>} : memref<1x1x2x128xf32, #tpu.memory_space<vmem>>, vector<1x1x2x128xf32>,
    return
  }
  func.func @transform_0(%arg0: i32, %arg1: i32) -> (i32, i32, i32) {
    %c0_i32 = arith.constant 0 : i32
    %c0_i32_0 = arith.constant 0 : i32
    return %arg0, %arg1, %c0_i32 : i32, i32, i32
  }
  func.func @transform_1(%arg0: i32, %arg1: i32) -> (i32, i32, i32) {
    %c1_i32 = arith.constant 1 : i32
    %0 = arith.addi %arg1, %c1_i32 : i32
    %c7_i32 = arith.constant 7 : i32
    %1 = arith.muli %0, %c7_i32 : i32
    %c0_i32 = arith.constant 0 : i32
    %c0_i32_0 = arith.constant 0 : i32
    return %arg0, %1, %c0_i32 : i32, i32, i32
  }
  func.func @transform_2(%arg0: i32, %arg1: i32) -> (i32, i32, i32) {
    %c1_i32 = arith.constant 1 : i32
    %0 = arith.addi %arg1, %c1_i32 : i32
    %c7_i32 = arith.constant 7 : i32
    %1 = arith.muli %0, %c7_i32 : i32
    %c1_i32_0 = arith.constant 1 : i32
    %2 = arith.addi %1, %c1_i32_0 : i32
    %c0_i32 = arith.constant 0 : i32
    %c0_i32_1 = arith.constant 0 : i32
    return %arg0, %2, %c0_i32 : i32, i32, i32
  }
  func.func @transform_3(%arg0: i32, %arg1: i32) -> (i32, i32, i32) {
    %c0_i32 = arith.constant 0 : i32
    %c0_i32_0 = arith.constant 0 : i32
    %c0_i32_1 = arith.constant 0 : i32
    %c0_i32_2 = arith.constant 0 : i32
    return %c0_i32, %c0_i32_0, %c0_i32_1 : i32, i32, i32
  }
  func.func @transform_4(%arg0: i32, %arg1: i32) -> (i32, i32) {
    %c0_i32 = arith.constant 0 : i32
    %c0_i32_0 = arith.constant 0 : i32
    %c0_i32_1 = arith.constant 0 : i32
    return %c0_i32, %c0_i32_0 : i32, i32
  }
  func.func @transform_5(%arg0: i32, %arg1: i32) -> (i32, i32) {
    %c0_i32 = arith.constant 0 : i32
    %c0_i32_0 = arith.constant 0 : i32
    %c0_i32_1 = arith.constant 0 : i32
    return %c0_i32, %c0_i32_0 : i32, i32
  }
  func.func @transform_6(%arg0: i32, %arg1: i32) -> (i32, i32, i32) {
    %c0_i32 = arith.constant 0 : i32
    %c0_i32_0 = arith.constant 0 : i32
    return %arg0, %arg1, %c0_i32 : i32, i32, i32
  }
  func.func @transform_7(%arg0: i32, %arg1: i32) -> (i32, i32, i32, i32) {
    %c0_i32 = arith.constant 0 : i32
    %c0_i32_0 = arith.constant 0 : i32
    %c0_i32_1 = arith.constant 0 : i32
    return %arg0, %arg1, %c0_i32, %c0_i32_0 : i32, i32, i32, i32
  }
}

</mosaic_0001>

<bundles_post_ra>
// kernel: tile.18
= control target key start
LH: loop header
LB: loop body
LE: loop exit
PB: predicated region body
PF: predicated region fallthrough
CT: control target
= control target key end

     0   :  { %s22_s0 = inlined_call_operand.vmem [shape: f32[16], index: 0, kind: input, shape index: {}]   ;;  %s23_s1 = inlined_call_operand.vmem [shape: f32[6,16], index: 1, kind: output, shape index: {}]  }
   0x1   :  { %v4_v0 = vld [vmem:[%s22_s0] ss:$0 sm:$0xff] }
   0x2   :  { %5 = vst [vmem:[%s23_s1] sm:$0xff] %v4_v0 }

// kernel: tile.13
= control target key start
LH: loop header
LB: loop body
LE: loop exit
PB: predicated region body
PF: predicated region fallthrough
CT: control target
= control target key end

     0   :  { %s22_s0 = inlined_call_operand.vmem [shape: f32[16], index: 0, kind: input, shape index: {}]   ;;  %s23_s1 = inlined_call_operand.vmem [shape: f32[7,16], index: 1, kind: output, shape index: {}]  }
   0x1   :  { %v4_v0 = vld [vmem:[%s22_s0] ss:$0 sm:$0xff] }
   0x2   :  { %5 = vst [vmem:[%s23_s1] sm:$0xff] %v4_v0 }

// kernel: tile.1
= control target key start
LH: loop header
LB: loop body
LE: loop exit
PB: predicated region body
PF: predicated region fallthrough
CT: control target
= control target key end

     0   :  { %s217_s10 = smov 125   ;;  %s218_s11 = smov 127   ;;  %vm3_vm0 = vcmask 7168   ;;  %s482_s0 = inlined_call_operand.vmem [shape: f32[6,16], index: 0, kind: input, shape index: {}]   ;;  %s483_s1 = inlined_call_operand.vmem [shape: f32[96,1], index: 1, kind: output, shape index: {}]  }
   0x1   :  { %v27_v0 = vld [vmem:[%s482_s0] sm:$0x3f]   ;;  %s219_s14 = smov 123   ;;  %s220_s19 = smov 124  }
   0x2   :  { %v7_v1 = vld [vmem:[%s482_s0] sm:$0x3f]   ;;  %28 = vrot.lane.b32.xlu1 %v27_v0, %s217_s10  ;;  %s221_s20 = smov 126   ;;  %s222_s23 = smov 122  }
   0x3   :  { %8 = vrot.lane.b32.xlu0 %v7_v1, %s218_s11  ;;  %v47_v2 = vld [vmem:[%s482_s0] sm:$0x3f]   ;;  %s223_s28 = smov 120   ;;  %s224_s29 = smov 121  }
   0x4   :  { %48 = vrot.lane.b32.xlu2 %v47_v2, %s219_s14  ;;  %v37_v3 = vld [vmem:[%s482_s0] sm:$0x3f]   ;;  %s225_s3 = smov 119   ;;  %s226_s8 = smov 117  }
   0x5   :  { %v17_v4 = vld [vmem:[%s482_s0] sm:$0x3f]   ;;  %s227_s9 = smov 118   ;;  %s228_s12 = smov 116  }
   0x6   :  { %v57_v5 = vld [vmem:[%s482_s0] sm:$0x3f]   ;;  %s229_s17 = smov 114   ;;  %s230_s18 = smov 115  }
   0x7   :  { %v77_v6 = vld [vmem:[%s482_s0] sm:$0x3f]   ;;  %s231_s21 = smov 113  }
   0x8   :  { %v67_v7 = vld [vmem:[%s482_s0] sm:$0x3f]  }
   0x9   :  { %v87_v8 = vld [vmem:[%s482_s0] sm:$0x3f]  }
   0xa   :  { %38 = vrot.lane.b32.xlu1 %v37_v3, %s220_s19  ;;  %v107_v9 = vld [vmem:[%s482_s0] sm:$0x3f]  }
   0xb   :  { %18 = vrot.lane.b32.xlu0 %v17_v4, %s221_s20  ;;  %v97_v10 = vld [vmem:[%s482_s0] sm:$0x3f]  }
   0xc   :  { %58 = vrot.lane.b32.xlu2 %v57_v5, %s222_s23  ;;  %v117_v11 = vld [vmem:[%s482_s0] sm:$0x3f]  }
   0xd   :  { %v137_v12 = vld [vmem:[%s482_s0] sm:$0x3f]  }
   0xe   :  { %v127_v13 = vld [vmem:[%s482_s0] sm:$0x3f]  }
   0xf   :  { %v147_v14 = vld [vmem:[%s482_s0] sm:$0x3f]  }
  0x10   :  { %v2_v28 = vld [vmem:[%s482_s0] sm:$0x3f]  }
  0x11   :  { %4 = vst.msk [vmem:[%s483_s1] ss:$16 sm:$0x3] %vm3_vm0, %v2_v28  }
  0x12   :  { %78 = vrot.lane.b32.xlu1 %v77_v6, %s223_s28  ;;  %5 = vst.msk [vmem:[%s483_s1] ss:$16 sm:$0xc] %vm3_vm0, %v2_v28  }
  0x13   :  { %68 = vrot.lane.b32.xlu0 %v67_v7, %s224_s29  ;;  %6 = vst.msk [vmem:[%s483_s1] ss:$16 sm:$0x30] %vm3_vm0, %v2_v28  }
  0x14   :  { %88 = vrot.lane.b32.xlu2 %v87_v8, %s225_s3 }
  0x1a   :  { %108 = vrot.lane.b32.xlu1 %v107_v9, %s226_s8 }
  0x1b   :  { %98 = vrot.lane.b32.xlu0 %v97_v10, %s227_s9 }
  0x1c   :  { %118 = vrot.lane.b32.xlu2 %v117_v11, %s228_s12 }
  0x22   :  { %138 = vrot.lane.b32.xlu1 %v137_v12, %s229_s17 }
  0x23   :  { %128 = vrot.lane.b32.xlu0 %v127_v13, %s230_s18 }
  0x24   :  { %148 = vrot.lane.b32.xlu2 %v147_v14, %s231_s21 }
  0x5e   :  { %v49_v15 = vpop.permute.xlu2 %48  }
  0x5f   :  { %169 = vst.msk [vmem:[%s483_s1 + $0x5] ss:$16 sm:$0x3] %vm3_vm0, %v49_v15  }
  0x60   :  { %170 = vst.msk [vmem:[%s483_s1 + $0x5] ss:$16 sm:$0xc] %vm3_vm0, %v49_v15  }
  0x61   :  { %171 = vst.msk [vmem:[%s483_s1 + $0x5] ss:$16 sm:$0x30] %vm3_vm0, %v49_v15  }
  0x66   :  { %v59_v16 = vpop.permute.xlu2 %58  }
  0x67   :  { %172 = vst.msk [vmem:[%s483_s1 + $0x6] ss:$16 sm:$0x3] %vm3_vm0, %v59_v16  }
  0x68   :  { %173 = vst.msk [vmem:[%s483_s1 + $0x6] ss:$16 sm:$0xc] %vm3_vm0, %v59_v16  }
  0x69   :  { %174 = vst.msk [vmem:[%s483_s1 + $0x6] ss:$16 sm:$0x30] %vm3_vm0, %v59_v16  }
  0x6e   :  { %v89_v17 = vpop.permute.xlu2 %88  }
  0x6f   :  { %181 = vst.msk [vmem:[%s483_s1 + $0x9] ss:$16 sm:$0x3] %vm3_vm0, %v89_v17  }
  0x70   :  { %182 = vst.msk [vmem:[%s483_s1 + $0x9] ss:$16 sm:$0xc] %vm3_vm0, %v89_v17  }
  0x71   :  { %183 = vst.msk [vmem:[%s483_s1 + $0x9] ss:$16 sm:$0x30] %vm3_vm0, %v89_v17  }
  0x74   :  { %v29_v18 = vpop.permute.xlu1 %28  }
  0x75   :  { %v9_v19 = vpop.permute.xlu0 %8   ;;  %163 = vst.msk [vmem:[%s483_s1 + $0x3] ss:$16 sm:$0x3] %vm3_vm0, %v29_v18  }
  0x76   :  { %164 = vst.msk [vmem:[%s483_s1 + $0x3] ss:$16 sm:$0xc] %vm3_vm0, %v29_v18   ;;  %v119_v20 = vpop.permute.xlu2 %118  }
  0x77   :  { %165 = vst.msk [vmem:[%s483_s1 + $0x3] ss:$16 sm:$0x30] %vm3_vm0, %v29_v18  }
  0x78   :  { %157 = vst.msk [vmem:[%s483_s1 + $0x1] ss:$16 sm:$0x3] %vm3_vm0, %v9_v19  }
  0x79   :  { %158 = vst.msk [vmem:[%s483_s1 + $0x1] ss:$16 sm:$0xc] %vm3_vm0, %v9_v19  }
  0x7a   :  { %159 = vst.msk [vmem:[%s483_s1 + $0x1] ss:$16 sm:$0x30] %vm3_vm0, %v9_v19  }
  0x7b   :  { %190 = vst.msk [vmem:[%s483_s1 + $0xc] ss:$16 sm:$0x3] %vm3_vm0, %v119_v20  }
  0x7c   :  { %v39_v21 = vpop.permute.xlu1 %38   ;;  %191 = vst.msk [vmem:[%s483_s1 + $0xc] ss:$16 sm:$0xc] %vm3_vm0, %v119_v20  }
  0x7d   :  { %v19_v22 = vpop.permute.xlu0 %18   ;;  %166 = vst.msk [vmem:[%s483_s1 + $0x4] ss:$16 sm:$0x3] %vm3_vm0, %v39_v21  }
  0x7e   :  { %167 = vst.msk [vmem:[%s483_s1 + $0x4] ss:$16 sm:$0xc] %vm3_vm0, %v39_v21   ;;  %v149_v23 = vpop.permute.xlu2 %148  }
  0x7f   :  { %168 = vst.msk [vmem:[%s483_s1 + $0x4] ss:$16 sm:$0x30] %vm3_vm0, %v39_v21  }
  0x80   :  { %160 = vst.msk [vmem:[%s483_s1 + $0x2] ss:$16 sm:$0x3] %vm3_vm0, %v19_v22  }
  0x81   :  { %161 = vst.msk [vmem:[%s483_s1 + $0x2] ss:$16 sm:$0xc] %vm3_vm0, %v19_v22  }
  0x82   :  { %162 = vst.msk [vmem:[%s483_s1 + $0x2] ss:$16 sm:$0x30] %vm3_vm0, %v19_v22  }
  0x83   :  { %192 = vst.msk [vmem:[%s483_s1 + $0xc] ss:$16 sm:$0x30] %vm3_vm0, %v119_v20  }
  0x84   :  { %v79_v24 = vpop.permute.xlu1 %78   ;;  %199 = vst.msk [vmem:[%s483_s1 + $0xf] ss:$16 sm:$0x3] %vm3_vm0, %v149_v23  }
  0x85   :  { %v69_v25 = vpop.permute.xlu0 %68   ;;  %178 = vst.msk [vmem:[%s483_s1 + $0x8] ss:$16 sm:$0x3] %vm3_vm0, %v79_v24  }
  0x86   :  { %179 = vst.msk [vmem:[%s483_s1 + $0x8] ss:$16 sm:$0xc] %vm3_vm0, %v79_v24  }
  0x87   :  { %180 = vst.msk [vmem:[%s483_s1 + $0x8] ss:$16 sm:$0x30] %vm3_vm0, %v79_v24  }
  0x88   :  { %175 = vst.msk [vmem:[%s483_s1 + $0x7] ss:$16 sm:$0x3] %vm3_vm0, %v69_v25  }
  0x89   :  { %176 = vst.msk [vmem:[%s483_s1 + $0x7] ss:$16 sm:$0xc] %vm3_vm0, %v69_v25  }
  0x8a   :  { %177 = vst.msk [vmem:[%s483_s1 + $0x7] ss:$16 sm:$0x30] %vm3_vm0, %v69_v25  }
  0x8b   :  { %200 = vst.msk [vmem:[%s483_s1 + $0xf] ss:$16 sm:$0xc] %vm3_vm0, %v149_v23  }
  0x8c   :  { %v109_v26 = vpop.permute.xlu1 %108   ;;  %201 = vst.msk [vmem:[%s483_s1 + $0xf] ss:$16 sm:$0x30] %vm3_vm0, %v149_v23  }
  0x8d   :  { %v99_v27 = vpop.permute.xlu0 %98   ;;  %187 = vst.msk [vmem:[%s483_s1 + $0xb] ss:$16 sm:$0x3] %vm3_vm0, %v109_v26  }
  0x8e   :  { %188 = vst.msk [vmem:[%s483_s1 + $0xb] ss:$16 sm:$0xc] %vm3_vm0, %v109_v26  }
  0x8f   :  { %189 = vst.msk [vmem:[%s483_s1 + $0xb] ss:$16 sm:$0x30] %vm3_vm0, %v109_v26  }
  0x90   :  { %184 = vst.msk [vmem:[%s483_s1 + $0xa] ss:$16 sm:$0x3] %vm3_vm0, %v99_v27  }
  0x91   :  { %185 = vst.msk [vmem:[%s483_s1 + $0xa] ss:$16 sm:$0xc] %vm3_vm0, %v99_v27  }
  0x92   :  { %186 = vst.msk [vmem:[%s483_s1 + $0xa] ss:$16 sm:$0x30] %vm3_vm0, %v99_v27  }
  0x94   :  { %v139_v29 = vpop.permute.xlu1 %138  }
  0x95   :  { %v129_v30 = vpop.permute.xlu0 %128   ;;  %196 = vst.msk [vmem:[%s483_s1 + $0xe] ss:$16 sm:$0x3] %vm3_vm0, %v139_v29  }
  0x96   :  { %197 = vst.msk [vmem:[%s483_s1 + $0xe] ss:$16 sm:$0xc] %vm3_vm0, %v139_v29  }
  0x97   :  { %198 = vst.msk [vmem:[%s483_s1 + $0xe] ss:$16 sm:$0x30] %vm3_vm0, %v139_v29  }
  0x98   :  { %193 = vst.msk [vmem:[%s483_s1 + $0xd] ss:$16 sm:$0x3] %vm3_vm0, %v129_v30  }
  0x99   :  { %194 = vst.msk [vmem:[%s483_s1 + $0xd] ss:$16 sm:$0xc] %vm3_vm0, %v129_v30  }
  0x9a   :  { %195 = vst.msk [vmem:[%s483_s1 + $0xd] ss:$16 sm:$0x30] %vm3_vm0, %v129_v30  }

// kernel: tile.0
= control target key start
LH: loop header
LB: loop body
LE: loop exit
PB: predicated region body
PF: predicated region fallthrough
CT: control target
= control target key end

     0   :  { %s265_s10 = smov 125   ;;  %s266_s11 = smov 127   ;;  %vm3_vm0 = vcmask 7168   ;;  %s594_s0 = inlined_call_operand.vmem [shape: f32[7,16], index: 0, kind: input, shape index: {}]   ;;  %s595_s1 = inlined_call_operand.vmem [shape: f32[112,1], index: 1, kind: output, shape index: {}]  }
   0x1   :  { %v33_v0 = vld [vmem:[%s594_s0] sm:$0x7f]   ;;  %s267_s14 = smov 123   ;;  %s268_s19 = smov 124  }
   0x2   :  { %v9_v1 = vld [vmem:[%s594_s0] sm:$0x7f]   ;;  %34 = vrot.lane.b32.xlu1 %v33_v0, %s265_s10  ;;  %s269_s20 = smov 126   ;;  %s270_s23 = smov 122  }
   0x3   :  { %10 = vrot.lane.b32.xlu0 %v9_v1, %s266_s11  ;;  %v57_v2 = vld [vmem:[%s594_s0] sm:$0x7f]   ;;  %s271_s28 = smov 120   ;;  %s272_s29 = smov 121  }
   0x4   :  { %58 = vrot.lane.b32.xlu2 %v57_v2, %s267_s14  ;;  %v45_v3 = vld [vmem:[%s594_s0] sm:$0x7f]   ;;  %s273_s3 = smov 119   ;;  %s274_s8 = smov 117  }
   0x5   :  { %v21_v4 = vld [vmem:[%s594_s0] sm:$0x7f]   ;;  %s275_s9 = smov 118   ;;  %s276_s12 = smov 116  }
   0x6   :  { %v69_v5 = vld [vmem:[%s594_s0] sm:$0x7f]   ;;  %s277_s17 = smov 114   ;;  %s278_s18 = smov 115  }
   0x7   :  { %v93_v6 = vld [vmem:[%s594_s0] sm:$0x7f]   ;;  %s279_s21 = smov 113  }
   0x8   :  { %v81_v7 = vld [vmem:[%s594_s0] sm:$0x7f]  }
   0x9   :  { %v105_v8 = vld [vmem:[%s594_s0] sm:$0x7f]  }
   0xa   :  { %46 = vrot.lane.b32.xlu1 %v45_v3, %s268_s19  ;;  %v129_v9 = vld [vmem:[%s594_s0] sm:$0x7f]  }
   0xb   :  { %22 = vrot.lane.b32.xlu0 %v21_v4, %s269_s20  ;;  %v117_v10 = vld [vmem:[%s594_s0] sm:$0x7f]  }
   0xc   :  { %70 = vrot.lane.b32.xlu2 %v69_v5, %s270_s23  ;;  %v141_v11 = vld [vmem:[%s594_s0] sm:$0x7f]  }
   0xd   :  { %v165_v12 = vld [vmem:[%s594_s0] sm:$0x7f]  }
   0xe   :  { %v153_v13 = vld [vmem:[%s594_s0] sm:$0x7f]  }
   0xf   :  { %v177_v14 = vld [vmem:[%s594_s0] sm:$0x7f]  }
  0x10   :  { %v2_v30 = vld [vmem:[%s594_s0] sm:$0x7f]  }
  0x11   :  { %4 = vst.msk [vmem:[%s595_s1] ss:$16 sm:$0x3] %vm3_vm0, %v2_v30  }
  0x12   :  { %94 = vrot.lane.b32.xlu1 %v93_v6, %s271_s28  ;;  %5 = vst.msk [vmem:[%s595_s1] ss:$16 sm:$0xc] %vm3_vm0, %v2_v30  }
  0x13   :  { %82 = vrot.lane.b32.xlu0 %v81_v7, %s272_s29  ;;  %6 = vst.msk [vmem:[%s595_s1] ss:$16 sm:$0x30] %vm3_vm0, %v2_v30  }
  0x14   :  { %106 = vrot.lane.b32.xlu2 %v105_v8, %s273_s3  ;;  %189 = vst.msk [vmem:[%s595_s1 + $0x5a] sm:$0x40] %vm3_vm0, %v2_v30  }
  0x1a   :  { %130 = vrot.lane.b32.xlu1 %v129_v9, %s274_s8 }
  0x1b   :  { %118 = vrot.lane.b32.xlu0 %v117_v10, %s275_s9 }
  0x1c   :  { %142 = vrot.lane.b32.xlu2 %v141_v11, %s276_s12 }
  0x22   :  { %166 = vrot.lane.b32.xlu1 %v165_v12, %s277_s17 }
  0x23   :  { %154 = vrot.lane.b32.xlu0 %v153_v13, %s278_s18 }
  0x24   :  { %178 = vrot.lane.b32.xlu2 %v177_v14, %s279_s21 }
  0x5e   :  { %v59_v15 = vpop.permute.xlu2 %58  }
  0x5f   :  { %206 = vst.msk [vmem:[%s595_s1 + $0x5] ss:$16 sm:$0x3] %vm3_vm0, %v59_v15  }
  0x60   :  { %207 = vst.msk [vmem:[%s595_s1 + $0x5] ss:$16 sm:$0xc] %vm3_vm0, %v59_v15  }
  0x61   :  { %208 = vst.msk [vmem:[%s595_s1 + $0x5] ss:$16 sm:$0x30] %vm3_vm0, %v59_v15  }
  0x62   :  { %209 = vst.msk [vmem:[%s595_s1 + $0x5f] sm:$0x40] %vm3_vm0, %v59_v15  }
  0x66   :  { %v71_v16 = vpop.permute.xlu2 %70  }
  0x67   :  { %210 = vst.msk [vmem:[%s595_s1 + $0x6] ss:$16 sm:$0x3] %vm3_vm0, %v71_v16  }
  0x68   :  { %211 = vst.msk [vmem:[%s595_s1 + $0x6] ss:$16 sm:$0xc] %vm3_vm0, %v71_v16  }
  0x69   :  { %212 = vst.msk [vmem:[%s595_s1 + $0x6] ss:$16 sm:$0x30] %vm3_vm0, %v71_v16  }
  0x6a   :  { %213 = vst.msk [vmem:[%s595_s1 + $0x60] sm:$0x40] %vm3_vm0, %v71_v16  }
  0x6e   :  { %v107_v17 = vpop.permute.xlu2 %106  }
  0x6f   :  { %222 = vst.msk [vmem:[%s595_s1 + $0x9] ss:$16 sm:$0x3] %vm3_vm0, %v107_v17  }
  0x70   :  { %223 = vst.msk [vmem:[%s595_s1 + $0x9] ss:$16 sm:$0xc] %vm3_vm0, %v107_v17  }
  0x71   :  { %224 = vst.msk [vmem:[%s595_s1 + $0x9] ss:$16 sm:$0x30] %vm3_vm0, %v107_v17  }
  0x72   :  { %225 = vst.msk [vmem:[%s595_s1 + $0x63] sm:$0x40] %vm3_vm0, %v107_v17  }
  0x74   :  { %v35_v18 = vpop.permute.xlu1 %34  }
  0x75   :  { %v11_v19 = vpop.permute.xlu0 %10   ;;  %198 = vst.msk [vmem:[%s595_s1 + $0x3] ss:$16 sm:$0x3] %vm3_vm0, %v35_v18  }
  0x76   :  { %199 = vst.msk [vmem:[%s595_s1 + $0x3] ss:$16 sm:$0xc] %vm3_vm0, %v35_v18   ;;  %v143_v20 = vpop.permute.xlu2 %142  }
  0x77   :  { %200 = vst.msk [vmem:[%s595_s1 + $0x3] ss:$16 sm:$0x30] %vm3_vm0, %v35_v18  }
  0x78   :  { %201 = vst.msk [vmem:[%s595_s1 + $0x5d] sm:$0x40] %vm3_vm0, %v35_v18  }
  0x79   :  { %190 = vst.msk [vmem:[%s595_s1 + $0x1] ss:$16 sm:$0x3] %vm3_vm0, %v11_v19  }
  0x7a   :  { %191 = vst.msk [vmem:[%s595_s1 + $0x1] ss:$16 sm:$0xc] %vm3_vm0, %v11_v19  }
  0x7b   :  { %192 = vst.msk [vmem:[%s595_s1 + $0x1] ss:$16 sm:$0x30] %vm3_vm0, %v11_v19  }
  0x7c   :  { %193 = vst.msk [vmem:[%s595_s1 + $0x5b] sm:$0x40] %vm3_vm0, %v11_v19   ;;  %v47_v21 = vpop.permute.xlu1 %46  }
  0x7d   :  { %v23_v22 = vpop.permute.xlu0 %22   ;;  %202 = vst.msk [vmem:[%s595_s1 + $0x4] ss:$16 sm:$0x3] %vm3_vm0, %v47_v21  }
  0x7e   :  { %203 = vst.msk [vmem:[%s595_s1 + $0x4] ss:$16 sm:$0xc] %vm3_vm0, %v47_v21   ;;  %v179_v23 = vpop.permute.xlu2 %178  }
  0x7f   :  { %204 = vst.msk [vmem:[%s595_s1 + $0x4] ss:$16 sm:$0x30] %vm3_vm0, %v47_v21  }
  0x80   :  { %205 = vst.msk [vmem:[%s595_s1 + $0x5e] sm:$0x40] %vm3_vm0, %v47_v21  }
  0x81   :  { %194 = vst.msk [vmem:[%s595_s1 + $0x2] ss:$16 sm:$0x3] %vm3_vm0, %v23_v22  }
  0x82   :  { %195 = vst.msk [vmem:[%s595_s1 + $0x2] ss:$16 sm:$0xc] %vm3_vm0, %v23_v22  }
  0x83   :  { %196 = vst.msk [vmem:[%s595_s1 + $0x2] ss:$16 sm:$0x30] %vm3_vm0, %v23_v22  }
  0x84   :  { %197 = vst.msk [vmem:[%s595_s1 + $0x5c] sm:$0x40] %vm3_vm0, %v23_v22   ;;  %v95_v24 = vpop.permute.xlu1 %94  }
  0x85   :  { %v83_v25 = vpop.permute.xlu0 %82   ;;  %218 = vst.msk [vmem:[%s595_s1 + $0x8] ss:$16 sm:$0x3] %vm3_vm0, %v95_v24  }
  0x86   :  { %219 = vst.msk [vmem:[%s595_s1 + $0x8] ss:$16 sm:$0xc] %vm3_vm0, %v95_v24  }
  0x87   :  { %220 = vst.msk [vmem:[%s595_s1 + $0x8] ss:$16 sm:$0x30] %vm3_vm0, %v95_v24  }
  0x88   :  { %221 = vst.msk [vmem:[%s595_s1 + $0x62] sm:$0x40] %vm3_vm0, %v95_v24  }
  0x89   :  { %214 = vst.msk [vmem:[%s595_s1 + $0x7] ss:$16 sm:$0x3] %vm3_vm0, %v83_v25  }
  0x8a   :  { %215 = vst.msk [vmem:[%s595_s1 + $0x7] ss:$16 sm:$0xc] %vm3_vm0, %v83_v25  }
  0x8b   :  { %216 = vst.msk [vmem:[%s595_s1 + $0x7] ss:$16 sm:$0x30] %vm3_vm0, %v83_v25  }
  0x8c   :  { %217 = vst.msk [vmem:[%s595_s1 + $0x61] sm:$0x40] %vm3_vm0, %v83_v25   ;;  %v131_v26 = vpop.permute.xlu1 %130  }
  0x8d   :  { %v119_v27 = vpop.permute.xlu0 %118   ;;  %234 = vst.msk [vmem:[%s595_s1 + $0xc] ss:$16 sm:$0x3] %vm3_vm0, %v143_v20  }
  0x8e   :  { %235 = vst.msk [vmem:[%s595_s1 + $0xc] ss:$16 sm:$0xc] %vm3_vm0, %v143_v20  }
  0x8f   :  { %236 = vst.msk [vmem:[%s595_s1 + $0xc] ss:$16 sm:$0x30] %vm3_vm0, %v143_v20  }
  0x90   :  { %237 = vst.msk [vmem:[%s595_s1 + $0x66] sm:$0x40] %vm3_vm0, %v143_v20  }
  0x91   :  { %230 = vst.msk [vmem:[%s595_s1 + $0xb] ss:$16 sm:$0x3] %vm3_vm0, %v131_v26  }
  0x92   :  { %231 = vst.msk [vmem:[%s595_s1 + $0xb] ss:$16 sm:$0xc] %vm3_vm0, %v131_v26  }
  0x93   :  { %232 = vst.msk [vmem:[%s595_s1 + $0xb] ss:$16 sm:$0x30] %vm3_vm0, %v131_v26  }
  0x94   :  { %233 = vst.msk [vmem:[%s595_s1 + $0x65] sm:$0x40] %vm3_vm0, %v131_v26   ;;  %v167_v28 = vpop.permute.xlu1 %166  }
  0x95   :  { %v155_v29 = vpop.permute.xlu0 %154   ;;  %226 = vst.msk [vmem:[%s595_s1 + $0xa] ss:$16 sm:$0x3] %vm3_vm0, %v119_v27  }
  0x96   :  { %227 = vst.msk [vmem:[%s595_s1 + $0xa] ss:$16 sm:$0xc] %vm3_vm0, %v119_v27  }
  0x97   :  { %228 = vst.msk [vmem:[%s595_s1 + $0xa] ss:$16 sm:$0x30] %vm3_vm0, %v119_v27  }
  0x98   :  { %229 = vst.msk [vmem:[%s595_s1 + $0x64] sm:$0x40] %vm3_vm0, %v119_v27  }
  0x99   :  { %246 = vst.msk [vmem:[%s595_s1 + $0xf] ss:$16 sm:$0x3] %vm3_vm0, %v179_v23  }
  0x9a   :  { %247 = vst.msk [vmem:[%s595_s1 + $0xf] ss:$16 sm:$0xc] %vm3_vm0, %v179_v23  }
  0x9b   :  { %248 = vst.msk [vmem:[%s595_s1 + $0xf] ss:$16 sm:$0x30] %vm3_vm0, %v179_v23  }
  0x9c   :  { %249 = vst.msk [vmem:[%s595_s1 + $0x69] sm:$0x40] %vm3_vm0, %v179_v23  }
  0x9d   :  { %242 = vst.msk [vmem:[%s595_s1 + $0xe] ss:$16 sm:$0x3] %vm3_vm0, %v167_v28  }
  0x9e   :  { %243 = vst.msk [vmem:[%s595_s1 + $0xe] ss:$16 sm:$0xc] %vm3_vm0, %v167_v28  }
  0x9f   :  { %244 = vst.msk [vmem:[%s595_s1 + $0xe] ss:$16 sm:$0x30] %vm3_vm0, %v167_v28  }
  0xa0   :  { %245 = vst.msk [vmem:[%s595_s1 + $0x68] sm:$0x40] %vm3_vm0, %v167_v28  }
  0xa1   :  { %238 = vst.msk [vmem:[%s595_s1 + $0xd] ss:$16 sm:$0x3] %vm3_vm0, %v155_v29  }
  0xa2   :  { %239 = vst.msk [vmem:[%s595_s1 + $0xd] ss:$16 sm:$0xc] %vm3_vm0, %v155_v29  }
  0xa3   :  { %240 = vst.msk [vmem:[%s595_s1 + $0xd] ss:$16 sm:$0x30] %vm3_vm0, %v155_v29  }
  0xa4   :  { %241 = vst.msk [vmem:[%s595_s1 + $0x67] sm:$0x40] %vm3_vm0, %v155_v29  }

// kernel: double_convolution.5
= control target key start
LH: loop header
LB: loop body
LE: loop exit
PB: predicated region body
PF: predicated region fallthrough
CT: control target
= control target key end

     0   :  { %s481_s12 = smov 0   ;;  %s483_s13 = smov 0   ;;  %s578_s0 = inlined_call_operand.vmem [shape: f32[2,192,128], index: 0, kind: input, shape index: {}]   ;;  %s579_s1 = inlined_call_operand.vmem [shape: f32[1,128], index: 1, kind: input, shape index: {}]   ;;  %s580_s2 = inlined_call_operand.vmem [shape: f32[1,128], index: 2, kind: input, shape index: {}]   ;;  %s581_s3 = inlined_call_operand.vmem [shape: f32[2,192,8], index: 3, kind: output, shape index: {}]  }
   0x1   :  { %s485_s14 = smov 0   ;;  %s487_s15 = smov 0  }
   0x2   :  { %s489_s16 = smov 0  }
   0x3 LB: > { %s22_s17 = sadd.s32 1, %s451_s14  ;;  %s25_s18 = sadd.s32 1, %s455_s15  ;;  %s459_s16 = sphi %s489_s16, %s13_s16   ;;  %s455_s15 = sphi %s487_s15, %s585_s15   ;;  %s451_s14 = sphi %s485_s14, %s584_s14   ;;  %s447_s13 = sphi %s483_s13, %s583_s13   ;;  %s443_s12 = sphi %s481_s12, %s582_s12  }
   0x4   : > { %p23_p0 = scmp.ge.s32.totalorder %s22_s17, 2  ;;  %p373_p1 = scmp.ge.s32.totalorder %s459_s16, 1 }
   0x5   : > { %p158_p2 = scmp.lt.s32.totalorder %s459_s16, 5 }
   0x6   : > { %s587_s17 = smov (%p23_p0, %s22_s17), 0  ;;  %s589_s18 = smov (!%p23_p0, %s25_s18), %s455_s15 }
   0x7   : > { %p159_p3 = pnand %p373_p1, %p158_p2  ;;  %p27_p4 = scmp.ge.s32.totalorder %s589_s18, 2 }
   0x8   : > { %s190_s19 = smul.u32 (!%p159_p3), 12, %s443_s12  ;;  %p191_p5 = scmp.lt.s32.totalorder (!%p159_p3), %s447_s13, 1 }
   0x9   : > { %s591_s18 = smov (%p27_p4, %s589_s18), 0  ;;  %162 = sbr.rel (%p159_p3) target bundleno = 39 (0x27), region = 32 }
   0xa   : > { %p193_p6 = scmp.lt.s32.totalorder (!%p159_p3), %s190_s19, 23 }
   0xe   : > { %s593_s13 = smov (!%p191_p5, %s447_s13), 1  ;;  %s595_s19 = smov (!%p193_p6, %s190_s19), 23  ;;  %v419_v0 = vld [vmem:[%s579_s1] ss:$0 sm:$0xff]  ;;  %vm266_vm0 = vcmask 64512  }
   0xf   : > { %s378_s20 = smul.u32 24, %s593_s13  ;;  %v420_v1 = vld [vmem:[%s580_s2] ss:$0 sm:$0xff] }
  0x11   : > { %s196_s21 = sadd.s32 %s378_s20, %s595_s19 }
  0x12   : > { %s374_s24 = sshll.u32 %s196_s21, 3 }
  0x13   : > { %s517_s27 = scalar_lea.vmem %s578_s0, %s374_s24  ;;  %s533_s5 = scalar_lea.vmem %s581_s3, %s374_s24 }
  0x14   : > { %v210_v2 = vld [vmem:[%s517_s27] sm:$0xff]  ;;  %v211_v3 = vld [vmem:[%s517_s27 + $0x8] sm:$0xff]  ;;  %v212_v4 = vld [vmem:[%s517_s27 + $0x10] sm:$0xff] }
  0x15   : > { %v226_v5 = vmul.f32 %v419_v0, %v210_v2  ;;  %v227_v6 = vmul.f32 %v419_v0, %v211_v3  ;;  %v228_v7 = vmul.f32 %v419_v0, %v212_v4  ;;  %v213_v8 = vld [vmem:[%s517_s27 + $0x18] sm:$0xff]  ;;  %v214_v9 = vld [vmem:[%s517_s27 + $0x20] sm:$0xff]  ;;  %v215_v10 = vld [vmem:[%s517_s27 + $0x28] sm:$0xff] }
  0x16   : > { %v229_v11 = vmul.f32 %v419_v0, %v213_v8  ;;  %v230_v12 = vmul.f32 %v419_v0, %v214_v9  ;;  %v231_v13 = vmul.f32 %v419_v0, %v215_v10  ;;  %v216_v14 = vld [vmem:[%s517_s27 + $0x30] sm:$0xff]  ;;  %v217_v15 = vld [vmem:[%s517_s27 + $0x38] sm:$0xff]  ;;  %v218_v24 = vld [vmem:[%s517_s27 + $0x40] sm:$0xff] }
  0x17   : > { %v242_v16 = vadd.f32 %v420_v1, %v226_v5  ;;  %v243_v17 = vadd.f32 %v420_v1, %v227_v6  ;;  %v244_v18 = vadd.f32 %v420_v1, %v228_v7  ;;  %v232_v19 = vmul.f32 %v419_v0, %v216_v14  ;;  %v219_v25 = vld [vmem:[%s517_s27 + $0x48] sm:$0xff]  ;;  %v220_v26 = vld [vmem:[%s517_s27 + $0x50] sm:$0xff]  ;;  %v221_v31 = vld [vmem:[%s517_s27 + $0x58] sm:$0xff] }
  0x18   : > { %v245_v20 = vadd.f32 %v420_v1, %v229_v11  ;;  %v246_v21 = vadd.f32 %v420_v1, %v230_v12  ;;  %v247_v22 = vadd.f32 %v420_v1, %v231_v13  ;;  %v233_v23 = vmul.f32 %v419_v0, %v217_v15 }
  0x19   : > { %v254_v27 = vmax.f32 %v242_v16, 0.0  ;;  %v255_v28 = vmax.f32 %v243_v17, 0.0  ;;  %v256_v29 = vmax.f32 %v244_v18, 0.0  ;;  %v248_v30 = vadd.f32 %v420_v1, %v232_v19 }
  0x1a   : > { %v257_v32 = vmax.f32 %v245_v20, 0.0  ;;  %v249_v33 = vadd.f32 %v420_v1, %v233_v23  ;;  %v258_v34 = vmax.f32 %v246_v21, 0.0  ;;  %v234_v35 = vmul.f32 %v419_v0, %v218_v24 }
  0x1b   : > { %267 = vst.msk [vmem:[%s533_s5] sm:$0xff] %vm266_vm0, %v254_v27  ;;  %v235_v36 = vmul.f32 %v419_v0, %v219_v25  ;;  %v236_v37 = vmul.f32 %v419_v0, %v220_v26  ;;  %v259_v38 = vmax.f32 %v247_v22, 0.0  ;;  %v237_v39 = vmul.f32 %v419_v0, %v221_v31 }
  0x1c   : > { %268 = vst.msk [vmem:[%s533_s5 + $0x8] sm:$0xff] %vm266_vm0, %v255_v28  ;;  %v260_v40 = vmax.f32 %v248_v30, 0.0  ;;  %v250_v41 = vadd.f32 %v420_v1, %v234_v35  ;;  %v261_v44 = vmax.f32 %v249_v33, 0.0 }
  0x1d   : > { %269 = vst.msk [vmem:[%s533_s5 + $0x10] sm:$0xff] %vm266_vm0, %v256_v29  ;;  %v251_v42 = vadd.f32 %v420_v1, %v235_v36  ;;  %v252_v43 = vadd.f32 %v420_v1, %v236_v37  ;;  %v253_v45 = vadd.f32 %v420_v1, %v237_v39 }
  0x1e   : > { %270 = vst.msk [vmem:[%s533_s5 + $0x18] sm:$0xff] %vm266_vm0, %v257_v32  ;;  %v262_v46 = vmax.f32 %v250_v41, 0.0 }
  0x1f   : > { %271 = vst.msk [vmem:[%s533_s5 + $0x20] sm:$0xff] %vm266_vm0, %v258_v34  ;;  %v263_v47 = vmax.f32 %v251_v42, 0.0  ;;  %v264_v48 = vmax.f32 %v252_v43, 0.0  ;;  %v265_v49 = vmax.f32 %v253_v45, 0.0 }
  0x20   : > { %272 = vst.msk [vmem:[%s533_s5 + $0x28] sm:$0xff] %vm266_vm0, %v259_v38 }
  0x21   : > { %273 = vst.msk [vmem:[%s533_s5 + $0x30] sm:$0xff] %vm266_vm0, %v260_v40 }
  0x22   : > { %274 = vst.msk [vmem:[%s533_s5 + $0x38] sm:$0xff] %vm266_vm0, %v261_v44 }
  0x23   : > { %275 = vst.msk [vmem:[%s533_s5 + $0x40] sm:$0xff] %vm266_vm0, %v262_v46 }
  0x24   : > { %276 = vst.msk [vmem:[%s533_s5 + $0x48] sm:$0xff] %vm266_vm0, %v263_v47 }
  0x25   : > { %277 = vst.msk [vmem:[%s533_s5 + $0x50] sm:$0xff] %vm266_vm0, %v264_v48 }
  0x26   : > { %278 = vst.msk [vmem:[%s533_s5 + $0x58] sm:$0xff] %vm266_vm0, %v265_v49 }
  0x27 PF: > { %s13_s16 = sadd.s32 1, %s459_s16   ;;  %s582_s12 = smov %s451_s14 }
  0x28   : > { %p10_p7 = scmp.ge.s32.totalorder %s13_s16, 6   ;;  %s583_s13 = smov %s455_s15 }
  0x29   : > { %s584_s14 = smov %s587_s17  ;;  %s585_s15 = smov %s591_s18 }
  0x2a   :  { %12 = sbr.rel (!%p10_p7) target bundleno = 3 (0x3), region = 62 }

// kernel: double_convolution.3
= control target key start
LH: loop header
LB: loop body
LE: loop exit
PB: predicated region body
PF: predicated region fallthrough
CT: control target
= control target key end

     0   :  { %s2016_s24 = smov 0   ;;  %s2018_s25 = smov 0   ;;  %s2718_s0 = inlined_call_operand.vmem [shape: f32[2,256,4], index: 0, kind: input, shape index: {}, may-alias: {0,1,2}]   ;;  %s2719_s1 = inlined_call_operand.vmem [shape: f32[2,256,4], index: 1, kind: input, shape index: {}, may-alias: {0,1,2}]   ;;  %s2720_s2 = inlined_call_operand.vmem [shape: f32[2,256,4], index: 2, kind: input, shape index: {}, may-alias: {0,1,2}]   ;;  %s2721_s3 = inlined_call_operand.vmem [shape: f32[9,4,128], index: 3, kind: input, shape index: {}]   ;;  %s2722_s4 = inlined_call_operand.vmem [shape: f32[1,128], index: 4, kind: input, shape index: {}]   ;;  %s2723_s5 = inlined_call_operand.vmem [shape: f32[112,1], index: 5, kind: input, shape index: {}]   ;;  %s2724_s6 = inlined_call_operand.vmem [shape: f32[2,224,128], index: 6, kind: output, shape index: {0}]   ;;  %s2725_s7 = inlined_call_operand.vmem [shape: f32[2,2,2,128], index: 7, kind: output, shape index: {1}]  }
   0x1   :  { %s2020_s26 = smov 0   ;;  %s2022_s27 = smov 0  }
   0x2   :  { %s2024_s28 = smov 0  }
   0x3 LB: > { %s27_s29 = sadd.s32 1, %s1964_s26  ;;  %s30_s30 = sadd.s32 1, %s1968_s27  ;;  %s1972_s28 = sphi %s2024_s28, %s18_s28   ;;  %s1968_s27 = sphi %s2022_s27, %s2729_s27   ;;  %s1964_s26 = sphi %s2020_s26, %s2728_s26   ;;  %s1960_s25 = sphi %s2018_s25, %s2727_s25   ;;  %s1956_s24 = sphi %s2016_s24, %s2726_s24  }
   0x4   : > { %p28_p0 = scmp.ge.s32.totalorder %s27_s29, 2  ;;  %p1724_p1 = scmp.ge.s32.totalorder %s1972_s28, 1 }
   0x5   : > { %p325_p2 = scmp.lt.s32.totalorder %s1972_s28, 5 }
   0x6   : > { %s2731_s29 = smov (%p28_p0, %s27_s29), 0  ;;  %s2733_s30 = smov (!%p28_p0, %s30_s30), %s1968_s27 }
   0x7   : > { %p326_p3 = pnand %p1724_p1, %p325_p2  ;;  %p32_p4 = scmp.ge.s32.totalorder %s2733_s30, 2 }
   0x8   : > { %s2052_s10 = smul.u32 (!%p326_p3), 14, %s1956_s24  ;;  %p405_p5 = scmp.lt.s32.totalorder (!%p326_p3), %s1960_s25, 1 }
   0x9   : > { %s2735_s30 = smov (%p32_p4, %s2733_s30), 0  ;;  %329 = sbr.rel (%p326_p3) target bundleno = 435 (0x1b3), region = 44 }
   0xa   : > { %s418_s15 = sadd.s32 (!%p326_p3), 1, %s1956_s24  ;;  %p407_p6 = scmp.lt.s32.totalorder (!%p326_p3), %s2052_s10, 31 }
   0xb   : > { %s2076_s20 = smul.u32 (!%p326_p3), 14, %s418_s15  ;;  %p451_p9 = scmp.lt.s32.totalorder (!%p326_p3), %s2052_s10, 27 }
   0xc   : > { %p460_p10 = scmp.lt.s32.totalorder (!%p326_p3), %s1956_s24, 1 }
   0xd   : > { %p423_p7 = scmp.lt.s32.totalorder (!%p326_p3), %s2076_s20, 31 }
   0xe   : > { %v1736_v0 = vld [vmem:[%s2721_s3 + $0x4] sm:$0xf]  ;;  %vm561_vm0 = vcmask 1043456   ;;  %v1767_v1 = vld [vmem:[%s2721_s3 + $0x8] sm:$0xf]  ;;  %s2737_s25 = smov (!%p405_p5, %s1960_s25), 1 }
   0xf   : > { %1884 = vmatpush.msk.msra.mxu1 %vm561_vm0, %v1736_v0  ;;  %1885 = vmatpush.msk.msra.mxu2 %vm561_vm0, %v1736_v0  ;;  %v484_v2 = vld [vmem:[%s2721_s3] sm:$0xf]  ;;  %v1799_v3 = vld [vmem:[%s2721_s3 + $0x10] sm:$0xf]  ;;  %v1783_v4 = vld [vmem:[%s2721_s3 + $0xc] sm:$0xf] }
  0x10   : > { %1737 = vmatpush.msk.msra.mxu0 %vm561_vm0, %v1736_v0  ;;  %1886 = vmatpush.msk.msra.mxu3 %vm561_vm0, %v1736_v0  ;;  %s2079_s21 = sshll.u32 %s2737_s25, 5  ;;  %vm502_vm1 = vcmask 1046528   ;;  %vm532_vm2 = vcmask 31744   ;;  %v1831_v27 = vld [vmem:[%s2721_s3 + $0x18] sm:$0xf]  ;;  %vm716_vm3 = vcmask 1045504  }
  0x11   : > { %1768 = vmatpush.msk.msrb.mxu2 %vm561_vm0, %v1767_v1  ;;  %1752 = vmatpush.msk.msrb.mxu1 %vm561_vm0, %v484_v2  ;;  %s408_s22 = scalar_select %p407_p6, %s2052_s10, 31  ;;  %v1815_v30 = vld [vmem:[%s2721_s3 + $0x14] sm:$0xf]  ;;  %v1847_v33 = vld [vmem:[%s2721_s3 + $0x1c] sm:$0xf]  ;;  %vm1544_vm4 = vcmask 1040384  }
  0x12   : > { %1800 = vmatpush.msk.msrb.mxu0 %vm561_vm0, %v1799_v3  ;;  %1784 = vmatpush.msk.msrb.mxu3 %vm561_vm0, %v1783_v4  ;;  %s424_s13 = scalar_select %p423_p7, %s2076_s20, 31  ;;  %v1863_v43 = vld [vmem:[%s2721_s3 + $0x20] sm:$0xf] }
  0x13   : > { %s410_s23 = sadd.s32 %s2079_s21, %s408_s22  ;;  %s1887_s17 = smul.u32 28, %s2737_s25 }
  0x14   : > { %s1726_s8 = sshll.u32 %s410_s23, 3  ;;  %s426_s14 = sadd.s32 %s2079_s21, %s424_s13 }
  0x15   : > { %s2089_s12 = scalar_lea.vmem %s2718_s0, %s1726_s8  ;;  %s1729_s15 = sshll.u32 %s426_s14, 3 }
  0x16   : > { %v2092_v5 = vld [vmem:[%s2089_s12 + $0x20] sm:$0xff]  ;;  %v2095_v6 = vld [vmem:[%s2089_s12 + $0x28] sm:$0xff]  ;;  %v2109_v13 = vld [vmem:[%s2089_s12 + $0x30] sm:$0xff]  ;;  %s2150_s18 = scalar_lea.vmem %s2719_s1, %s1729_s15  ;;  %s1882_s13 = sadd.s32 2, %s2076_s20 }
  0x17   : > { %v2098_v7 = vld [vmem:[%s2089_s12 + $0x40] sm:$0xff]  ;;  %v510_v8 = vrot.slane %v2092_v5, 1  ;;  %v512_v9 = vrot.slane %v2095_v6, 1  ;;  %v2104_v10 = vld [vmem:[%s2089_s12 + $0x48] sm:$0xff]  ;;  %v2124_v17 = vld [vmem:[%s2089_s12 + $0x50] sm:$0xff]  ;;  %v514_v24 = vrot.slane %v2109_v13, 1 }
  0x18   : > { %v518_v11 = vrot.slane %v2098_v7, 1  ;;  %v520_v12 = vrot.slane %v2104_v10, 1  ;;  %v2112_v14 = vld [vmem:[%s2089_s12] sm:$0xff]  ;;  %v2115_v15 = vld [vmem:[%s2089_s12 + $0x8] sm:$0xff]  ;;  %v2137_v22 = vld [vmem:[%s2089_s12 + $0x10] sm:$0xff]  ;;  %v522_v28 = vrot.slane %v2124_v17, 1 }
  0x19   : > { %v2121_v16 = vsel %vm502_vm1, %v510_v8, %v512_v9  ;;  %v503_v18 = vrot.slane %v2112_v14, 1  ;;  %v504_v19 = vrot.slane %v2115_v15, 1  ;;  %v2129_v20 = vld [vmem:[%s2089_s12 + $0x60] sm:$0xff]  ;;  %v2140_v23 = vld [vmem:[%s2089_s12 + $0x68] sm:$0xff]  ;;  %v506_v31 = vrot.slane %v2137_v22, 1  ;;  %v2182_v37 = vld [vmem:[%s2089_s12 + $0x38] sm:$0xff] }
  0x1a   : > { %1742 = vmatmul.msk.f32.vlgmr.msra.gmra.mxu1 %vm532_vm2, %v2121_v16  ;;  %v2134_v21 = vsel %vm502_vm1, %v518_v11, %v520_v12  ;;  %v526_v26 = vrot.slane %v2129_v20, 1  ;;  %v528_v29 = vrot.slane %v2140_v23, 1  ;;  %v2164_v32 = vld [vmem:[%s2150_s18] sm:$0xff]  ;;  %v2174_v35 = vsel %vm502_vm1, %v512_v9, %v514_v24  ;;  %v2187_v39 = vld [vmem:[%s2089_s12 + $0x58] sm:$0xff]  ;;  %p438_p8 = scmp.lt.s32.totalorder %s1882_s13, 31  ;;  %s2741_s10 = smov (!%p451_p9, %s2052_s10), 27 }
  0x1b   : > { %1746 = vmatmul.msk.f32.vlgmr.msra.gmra.mxu2 %vm532_vm2, %v2134_v21  ;;  %v505_v25 = vsel %vm502_vm1, %v503_v18, %v504_v19  ;;  %1816 = vmatpush.msk.msra.mxu1 %vm561_vm0, %v1815_v30  ;;  %v2179_v36 = vsel %vm502_vm1, %v520_v12, %v522_v28  ;;  %v530_v38 = vrot.slane %v2164_v32, 1  ;;  %v507_v40 = vsel %vm502_vm1, %v504_v19, %v506_v31  ;;  %v469_v41 = vld [vmem:[%s2089_s12 + $0x18] sm:$0xff]  ;;  %s2743_s24 = smov (!%p460_p10, %s1956_s24), 1 }
  0x1c   : > { %1738 = vmatmul.msk.f32.vlgmr.msra.gmra.mxu0 %vm532_vm2, %v505_v25  ;;  %1832 = vmatpush.msk.msra.mxu2 %vm561_vm0, %v1831_v27  ;;  %v2171_v34 = vsel %vm502_vm1, %v526_v26, %v528_v29  ;;  %v516_v42 = vrot.slane %v2182_v37, 1  ;;  %v524_v44 = vrot.slane %v2187_v39, 1  ;;  %s2739_s13 = smov (!%p438_p8, %s1882_s13), 31  ;;  %v508_v46 = vrot.slane %v469_v41, 1 }
  0x1d   : > { %1750 = vmatmul.msk.f32.vlgmr.msra.gmra.mxu3 %vm532_vm2, %v2171_v34  ;;  %v2205_v45 = vsel %vm502_vm1, %v528_v29, %v530_v38  ;;  %1864 = vmatpush.msk.msra.mxu0 %vm561_vm0, %v1863_v43  ;;  %s441_s20 = sadd.s32 %s2079_s21, %s2739_s13  ;;  %v717_v53 = vrot.slane %v2112_v14, 2  ;;  %v718_v54 = vrot.slane %v2115_v15, 2  ;;  %v720_v56 = vrot.slane %v2137_v22, 2  ;;  %s454_s21 = sadd.s32 %s1887_s17, %s2741_s10 }
  0x1e   : > { %1848 = vmatpush.msk.msra.mxu3 %vm561_vm0, %v1847_v33  ;;  %v2213_v47 = vsel %vm502_vm1, %v514_v24, %v516_v42  ;;  %v2218_v48 = vsel %vm502_vm1, %v522_v28, %v524_v44  ;;  %v509_v49 = vsel %vm502_vm1, %v506_v31, %v508_v46  ;;  %v2227_v50 = vsel %vm502_vm1, %v516_v42, %v518_v11  ;;  %v2373_v24 = vld [vmem:[%s2150_s18 + $0x8] sm:$0xff]  ;;  %s1732_s12 = sshll.u32 %s441_s20, 3  ;;  %s1733_s23 = sshll.u32 %s454_s21, 3 }
  0x1f   : > { %v2232_v51 = vsel %vm502_vm1, %v524_v44, %v526_v26  ;;  %v511_v52 = vsel %vm502_vm1, %v508_v46, %v510_v8  ;;  %v719_v55 = vsel %vm716_vm3, %v717_v53, %v718_v54  ;;  %v721_v57 = vsel %vm716_vm3, %v718_v54, %v720_v56  ;;  %s2391_s18 = scalar_lea.vmem %s2720_s2, %s1732_s12  ;;  %s2656_s11 = scalar_lea.vmem %s2724_s6, %s1733_s23 }
  0x20   : > { %v722_v58 = vrot.slane %v469_v41, 2  ;;  %v724_v60 = vrot.slane %v2092_v5, 2  ;;  %v726_v62 = vrot.slane %v2095_v6, 2  ;;  %v728_v0 = vrot.slane %v2109_v13, 2  ;;  %v2404_v31 = vld [vmem:[%s2391_s18] sm:$0xff]  ;;  %s1734_s10 = sshll.u32 %s2737_s25, 1 }
  0x21   : > { %v730_v2 = vrot.slane %v2182_v37, 2  ;;  %v732_v4 = vrot.slane %v2098_v7, 2  ;;  %v734_v9 = vrot.slane %v2104_v10, 2  ;;  %v736_v12 = vrot.slane %v2124_v17, 2  ;;  %s463_s13 = sadd.s32 %s1734_s10, %s2743_s24 }
  0x22   : > { %1743 = vmatmul.msk.f32.gmra.mxu1 %vm532_vm2, %v2174_v35  ;;  %v2261_v59 = vsel %vm716_vm3, %v720_v56, %v722_v58  ;;  %v2273_v61 = vsel %vm716_vm3, %v722_v58, %v724_v60  ;;  %v2284_v63 = vsel %vm716_vm3, %v724_v60, %v726_v62  ;;  %v2296_v1 = vsel %vm716_vm3, %v726_v62, %v728_v0  ;;  %v1381_v56 = vld [vmem:[%s2723_s5 + $0x8] sm:$0xff]  ;;  %s1735_s14 = sshll.u32 %s463_s13, 1 }
  0x23   : > { %1747 = vmatmul.msk.f32.gmra.mxu2 %vm532_vm2, %v2179_v36  ;;  %v2308_v3 = vsel %vm716_vm3, %v728_v0, %v730_v2  ;;  %v2320_v8 = vsel %vm716_vm3, %v730_v2, %v732_v4  ;;  %v2332_v11 = vsel %vm716_vm3, %v732_v4, %v734_v9  ;;  %v740_v19 = vrot.slane %v2129_v20, 2  ;;  %s465_s20 = scalar_lea.vmem %s2725_s7, %s1735_s14 }
  0x24   : > { %1739 = vmatmul.msk.f32.gmra.mxu0 %vm532_vm2, %v507_v40  ;;  %v742_v25 = vrot.slane %v2140_v23, 2  ;;  %v936_v26 = vrot.slane %v2373_v24, 1  ;;  %v744_v33 = vrot.slane %v2164_v32, 2  ;;  %v938_v40 = vrot.slane %v2404_v31, 1 }
  0x25   : > { %1751 = vmatmul.msk.f32.gmra.mxu3 %vm532_vm2, %v2205_v45 }
  0x26   : > { %v2394_v28 = vsel %vm716_vm3, %v740_v19, %v742_v25  ;;  %v2399_v30 = vsel %vm502_vm1, %v530_v38, %v936_v26  ;;  %v2421_v38 = vsel %vm716_vm3, %v742_v25, %v744_v33  ;;  %v2426_v44 = vsel %vm502_vm1, %v936_v26, %v938_v40 }
  0x2a   : > { %1744 = vmatmul.msk.f32.gmra.mxu1 %vm532_vm2, %v2213_v47 }
  0x2b   : > { %1748 = vmatmul.msk.f32.gmra.mxu2 %vm532_vm2, %v2218_v48 }
  0x2c   : > { %1740 = vmatmul.msk.f32.gmra.mxu0 %vm532_vm2, %v509_v49 }
  0x2d   : > { %1785 = vmatmul.msk.f32.vlgmr.msrb.gmra.mxu3 %vm532_vm2, %v2137_v22 }
  0x32   : > { %1745 = vmatmul.msk.f32.gmra.mxu1 %vm532_vm2, %v2227_v50 }
  0x33   : > { %1749 = vmatmul.msk.f32.gmra.mxu2 %vm532_vm2, %v2232_v51 }
  0x34   : > { %1741 = vmatmul.msk.f32.gmra.mxu0 %vm532_vm2, %v511_v52 }
  0x35   : > { %1786 = vmatmul.msk.f32.gmra.mxu3 %vm532_vm2, %v469_v41 }
  0x3a   : > { %1753 = vmatmul.msk.f32.vlgmr.msrb.gmra.mxu1 %vm532_vm2, %v2112_v14  ;;  %v2344_v14 = vsel %vm716_vm3, %v734_v9, %v736_v12 }
  0x3b   : > { %1769 = vmatmul.msk.f32.vlgmr.msrb.gmra.mxu2 %vm532_vm2, %v719_v55 }
  0x3c   : > { %1801 = vmatmul.msk.f32.vlgmr.msrb.gmra.mxu0 %vm532_vm2, %v509_v49  ;;  %v1380_v49 = vld [vmem:[%s2723_s5] sm:$0xff] }
  0x3d   : > { %1787 = vmatmul.msk.f32.gmra.mxu3 %vm532_vm2, %v2092_v5 }
  0x42   : > { %1754 = vmatmul.msk.f32.gmra.mxu1 %vm532_vm2, %v2115_v15  ;;  %v738_v15 = vrot.slane %v2187_v39, 2 }
  0x43   : > { %1770 = vmatmul.msk.f32.gmra.mxu2 %vm532_vm2, %v721_v57 }
  0x44   : > { %1802 = vmatmul.msk.f32.gmra.mxu0 %vm532_vm2, %v511_v52  ;;  %v2356_v18 = vsel %vm716_vm3, %v736_v12, %v738_v15 }
  0x45   : > { %1788 = vmatmul.msk.f32.gmra.mxu3 %vm532_vm2, %v2095_v6 }
  0x4a   : > { %1755 = vmatmul.msk.f32.gmra.mxu1 %vm532_vm2, %v2137_v22  ;;  %v2368_v22 = vsel %vm716_vm3, %v738_v15, %v740_v19 }
  0x4b   : > { %1771 = vmatmul.msk.f32.gmra.mxu2 %vm532_vm2, %v2261_v59 }
  0x4c   : > { %1803 = vmatmul.msk.f32.gmra.mxu0 %vm532_vm2, %v2121_v16 }
  0x4d   : > { %1789 = vmatmul.msk.f32.gmra.mxu3 %vm532_vm2, %v2109_v13 }
  0x52   : > { %1756 = vmatmul.msk.f32.gmra.mxu1 %vm532_vm2, %v469_v41 }
  0x53   : > { %1772 = vmatmul.msk.f32.gmra.mxu2 %vm532_vm2, %v2273_v61 }
  0x54   : > { %1804 = vmatmul.msk.f32.gmra.mxu0 %vm532_vm2, %v2174_v35 }
  0x55   : > { %1790 = vmatmul.msk.f32.gmra.mxu3 %vm532_vm2, %v2182_v37 }
  0x5a   : > { %1757 = vmatmul.msk.f32.gmra.mxu1 %vm532_vm2, %v2092_v5 }
  0x5b   : > { %1773 = vmatmul.msk.f32.gmra.mxu2 %vm532_vm2, %v2284_v63 }
  0x5c   : > { %1805 = vmatmul.msk.f32.gmra.mxu0 %vm532_vm2, %v2213_v47 }
  0x5d   : > { %1791 = vmatmul.msk.f32.gmra.mxu3 %vm532_vm2, %v2098_v7 }
  0x62   : > { %1758 = vmatmul.msk.f32.gmra.mxu1 %vm532_vm2, %v2095_v6 }
  0x63   : > { %1774 = vmatmul.msk.f32.gmra.mxu2 %vm532_vm2, %v2296_v1 }
  0x64   : > { %1806 = vmatmul.msk.f32.gmra.mxu0 %vm532_vm2, %v2227_v50 }
  0x65   : > { %1792 = vmatmul.msk.f32.gmra.mxu3 %vm532_vm2, %v2104_v10 }
  0x6a   : > { %1759 = vmatmul.msk.f32.gmra.mxu1 %vm532_vm2, %v2109_v13 }
  0x6b   : > { %1775 = vmatmul.msk.f32.gmra.mxu2 %vm532_vm2, %v2308_v3 }
  0x6c   : > { %1807 = vmatmul.msk.f32.gmra.mxu0 %vm532_vm2, %v2134_v21 }
  0x6d   : > { %1793 = vmatmul.msk.f32.gmra.mxu3 %vm532_vm2, %v2124_v17 }
  0x72   : > { %1760 = vmatmul.msk.f32.gmra.mxu1 %vm532_vm2, %v2182_v37 }
  0x73   : > { %1776 = vmatmul.msk.f32.gmra.mxu2 %vm532_vm2, %v2320_v8 }
  0x74   : > { %1808 = vmatmul.msk.f32.gmra.mxu0 %vm532_vm2, %v2179_v36 }
  0x75   : > { %1794 = vmatmul.msk.f32.gmra.mxu3 %vm532_vm2, %v2187_v39 }
  0x7a   : > { %1761 = vmatmul.msk.f32.gmra.mxu1 %vm532_vm2, %v2098_v7 }
  0x7b   : > { %1777 = vmatmul.msk.f32.gmra.mxu2 %vm532_vm2, %v2332_v11 }
  0x7c   : > { %1809 = vmatmul.msk.f32.gmra.mxu0 %vm532_vm2, %v2218_v48 }
  0x7d   : > { %1795 = vmatmul.msk.f32.gmra.mxu3 %vm532_vm2, %v2129_v20 }
  0x82   : > { %1762 = vmatmul.msk.f32.gmra.mxu1 %vm532_vm2, %v2104_v10 }
  0x83   : > { %1778 = vmatmul.msk.f32.gmra.mxu2 %vm532_vm2, %v2344_v14 }
  0x84   : > { %1810 = vmatmul.msk.f32.gmra.mxu0 %vm532_vm2, %v2232_v51 }
  0x85   : > { %1796 = vmatmul.msk.f32.gmra.mxu3 %vm532_vm2, %v2140_v23 }
  0x8a   : > { %1763 = vmatmul.msk.f32.gmra.mxu1 %vm532_vm2, %v2124_v17 }
  0x8b   : > { %1779 = vmatmul.msk.f32.gmra.mxu2 %vm532_vm2, %v2356_v18 }
  0x8c   : > { %1811 = vmatmul.msk.f32.gmra.mxu0 %vm532_vm2, %v2171_v34 }
  0x8d   : > { %1797 = vmatmul.msk.f32.gmra.mxu3 %vm532_vm2, %v2164_v32 }
  0x92   : > { %1764 = vmatmul.msk.f32.gmra.mxu1 %vm532_vm2, %v2187_v39 }
  0x93   : > { %1780 = vmatmul.msk.f32.gmra.mxu2 %vm532_vm2, %v2368_v22 }
  0x94   : > { %1812 = vmatmul.msk.f32.gmra.mxu0 %vm532_vm2, %v2205_v45 }
  0x95   : > { %1798 = vmatmul.msk.f32.gmra.mxu3 %vm532_vm2, %v2373_v24 }
  0x97   : > { %v2384_v27 = vpop.f32.mrf.mxu1 }
  0x99   : > { %v582_v29 = vpop.f32.mrf.mxu0 }
  0x9a   : > { %1765 = vmatmul.msk.f32.gmra.mxu1 %vm532_vm2, %v2129_v20 }
  0x9b   : > { %1781 = vmatmul.msk.f32.gmra.mxu2 %vm532_vm2, %v2394_v28 }
  0x9c   : > { %1813 = vmatmul.msk.f32.gmra.mxu0 %vm532_vm2, %v2399_v30 }
  0x9d   : > { %1849 = vmatmul.msk.f32.vlgmr.msra.gmra.mxu3 %vm532_vm2, %v2121_v16  ;;  %v1974_v16 = vmov 0  }
  0x9e   : > { %v2412_v41 = vpop.f32.mrf.mxu2  ;;  %1930 = vset.pattern.permute.xlu0 %v1974_v16  ;;  %1931 = vset.pattern.permute.xlu1 %v1974_v16 }
  0x9f   : > { %v2414_v42 = vpop.f32.mrf.mxu1  ;;  %1396 = vperm.xlu0 %1930, %v1380_v49   ;;  %1932 = vset.pattern.permute.xlu2 %v1974_v16 }
  0xa0   : > { %v2430_v46 = vpop.f32.mrf.mxu3 }
  0xa1   : > { %v585_v43 = vpop.f32.mrf.mxu0 }
  0xa2   : > { %1766 = vmatmul.msk.f32.gmra.mxu1 %vm532_vm2, %v2140_v23 }
  0xa3   : > { %1782 = vmatmul.msk.f32.gmra.mxu2 %vm532_vm2, %v2421_v38 }
  0xa4   : > { %1814 = vmatmul.msk.f32.gmra.mxu0 %vm532_vm2, %v2426_v44 }
  0xa5   : > { %1850 = vmatmul.msk.f32.gmra.mxu3 %vm532_vm2, %v2174_v35 }
  0xa6   : > { %v2439_v52 = vpop.f32.mrf.mxu2 }
  0xa7   : > { %v2441_v53 = vpop.f32.mrf.mxu1  ;;  %1401 = vperm.xlu0 %1930, %v1381_v56  }
  0xa8   : > { %v2447_v55 = vpop.f32.mrf.mxu3 }
  0xa9   : > { %v588_v54 = vpop.f32.mrf.mxu0 }
  0xaa   : > { %1817 = vmatmul.msk.f32.vlgmr.msra.gmra.mxu1 %vm532_vm2, %v2261_v59  ;;  %v1382_v59 = vld [vmem:[%s2723_s5 + $0x10] sm:$0xff] }
  0xab   : > { %1833 = vmatmul.msk.f32.vlgmr.msra.gmra.mxu2 %vm532_vm2, %v2092_v5  ;;  %1406 = vperm.xlu1 %1931, %v1382_v59  }
  0xac   : > { %1865 = vmatmul.msk.f32.vlgmr.msra.gmra.mxu0 %vm532_vm2, %v2284_v63 }
  0xad   : > { %1851 = vmatmul.msk.f32.gmra.mxu3 %vm532_vm2, %v2213_v47 }
  0xae   : > { %v2456_v57 = vpop.f32.mrf.mxu2 }
  0xaf   : > { %v2458_v35 = vpop.f32.mrf.mxu1 }
  0xb0   : > { %v877_v5 = vpop.f32.mrf.mxu3 }
  0xb1   : > { %v591_v58 = vpop.f32.mrf.mxu0 }
  0xb2   : > { %1818 = vmatmul.msk.f32.gmra.mxu1 %vm532_vm2, %v2273_v61 }
  0xb3   : > { %1834 = vmatmul.msk.f32.gmra.mxu2 %vm532_vm2, %v2095_v6  ;;  %v1383_v6 = vld [vmem:[%s2723_s5 + $0x18] sm:$0xff] }
  0xb4   : > { %1866 = vmatmul.msk.f32.gmra.mxu0 %vm532_vm2, %v2296_v1  ;;  %1411 = vperm.xlu1 %1931, %v1383_v6  }
  0xb5   : > { %1852 = vmatmul.msk.f32.gmra.mxu3 %vm532_vm2, %v2227_v50 }
  0xb6   : > { %v2471_v60 = vpop.f32.mrf.mxu2 }
  0xb7   : > { %v672_v62 = vpop.f32.mrf.mxu1 }
  0xb8   : > { %v880_v61 = vpop.f32.mrf.mxu3  ;;  %v673_v0 = vadd.f32 %v672_v62, %v582_v29 }
  0xb9   : > { %v964_v47 = vpop.f32.mrf.mxu0 }
  0xba   : > { %1819 = vmatmul.msk.f32.gmra.mxu1 %vm532_vm2, %v2284_v63 }
  0xbb   : > { %1835 = vmatmul.msk.f32.gmra.mxu2 %vm532_vm2, %v2109_v13 }
  0xbc   : > { %1867 = vmatmul.msk.f32.gmra.mxu0 %vm532_vm2, %v2308_v3 }
  0xbd   : > { %1853 = vmatmul.msk.f32.gmra.mxu3 %vm532_vm2, %v2134_v21 }
  0xbe   : > { %v794_v2 = vpop.f32.mrf.mxu2 }
  0xbf   : > { %v836_v4 = vadd.f32 %v794_v2, %v673_v0  ;;  %v675_v50 = vpop.f32.mrf.mxu1 }
  0xc0   : > { %v883_v13 = vpop.f32.mrf.mxu3  ;;  %v676_v15 = vadd.f32 %v675_v50, %v585_v43 }
  0xc1   : > { %v919_v63 = vadd.f32 %v877_v5, %v836_v4  ;;  %v967_v9 = vpop.f32.mrf.mxu0 }
  0xc2   : > { %1820 = vmatmul.msk.f32.gmra.mxu1 %vm532_vm2, %v2296_v1 }
  0xc3   : > { %v2488_v12 = vadd.f32 %v964_v47, %v919_v63  ;;  %1836 = vmatmul.msk.f32.gmra.mxu2 %vm532_vm2, %v2182_v37  ;;  %v1389_v63 = vld [vmem:[%s2723_s5 + $0x48] sm:$0xff] }
  0xc4   : > { %1868 = vmatmul.msk.f32.gmra.mxu0 %vm532_vm2, %v2320_v8 }
  0xc5   : > { %1854 = vmatmul.msk.f32.gmra.mxu3 %vm532_vm2, %v2179_v36 }
  0xc6   : > { %v797_v19 = vpop.f32.mrf.mxu2 }
  0xc7   : > { %v837_v25 = vadd.f32 %v797_v19, %v676_v15  ;;  %v678_v26 = vpop.f32.mrf.mxu1 }
  0xc8   : > { %v886_v1 = vpop.f32.mrf.mxu3  ;;  %v679_v37 = vadd.f32 %v678_v26, %v588_v54 }
  0xc9   : > { %v920_v21 = vadd.f32 %v880_v61, %v837_v25  ;;  %v970_v29 = vpop.f32.mrf.mxu0 }
  0xca   : > { %1821 = vmatmul.msk.f32.gmra.mxu1 %vm532_vm2, %v2308_v3 }
  0xcb   : > { %v2498_v16 = vadd.f32 %v967_v9, %v920_v21  ;;  %1837 = vmatmul.msk.f32.gmra.mxu2 %vm532_vm2, %v2098_v7  ;;  %v1386_v7 = vld [vmem:[%s2723_s5 + $0x30] sm:$0xff]  ;;  %v1392_v21 = vld [vmem:[%s2723_s5 + $0x60] sm:$0xff] }
  0xcc   : > { %1869 = vmatmul.msk.f32.gmra.mxu0 %vm532_vm2, %v2332_v11  ;;  %1426 = vperm.xlu0 %1930, %v1386_v7  }
  0xcd   : > { %1855 = vmatmul.msk.f32.gmra.mxu3 %vm532_vm2, %v2218_v48 }
  0xce   : > { %v800_v43 = vpop.f32.mrf.mxu2 }
  0xcf   : > { %v838_v49 = vadd.f32 %v800_v43, %v679_v37  ;;  %v681_v56 = vpop.f32.mrf.mxu1 }
  0xd0   : > { %v889_v3 = vpop.f32.mrf.mxu3  ;;  %v682_v48 = vadd.f32 %v681_v56, %v591_v58  ;;  %v1384_v58 = vld [vmem:[%s2723_s5 + $0x20] sm:$0xff] }
  0xd1   : > { %v921_v36 = vadd.f32 %v883_v13, %v838_v49  ;;  %v973_v5 = vpop.f32.mrf.mxu0  ;;  %1416 = vperm.xlu2 %1932, %v1384_v58  }
  0xd2   : > { %1822 = vmatmul.msk.f32.gmra.mxu1 %vm532_vm2, %v2320_v8 }
  0xd3   : > { %v2508_v59 = vadd.f32 %v970_v29, %v921_v36  ;;  %1838 = vmatmul.msk.f32.gmra.mxu2 %vm532_vm2, %v2104_v10 }
  0xd4   : > { %1870 = vmatmul.msk.f32.gmra.mxu0 %vm532_vm2, %v2344_v14  ;;  %1441 = vperm.xlu0 %1930, %v1389_v63  }
  0xd5   : > { %1856 = vmatmul.msk.f32.gmra.mxu3 %vm532_vm2, %v2232_v51  ;;  %v1387_v51 = vld [vmem:[%s2723_s5 + $0x38] sm:$0xff] }
  0xd6   : > { %v803_v54 = vpop.f32.mrf.mxu2  ;;  %1431 = vperm.xlu1 %1931, %v1387_v51  }
  0xd7   : > { %v839_v62 = vadd.f32 %v803_v54, %v682_v48  ;;  %v684_v47 = vpop.f32.mrf.mxu1 }
  0xd8   : > { %v685_v8 = vadd.f32 %v684_v47, %v2384_v27  ;;  %v892_v10 = vpop.f32.mrf.mxu3 }
  0xd9   : > { %v922_v61 = vadd.f32 %v886_v1, %v839_v62  ;;  %v976_v6 = vpop.f32.mrf.mxu0 }
  0xda   : > { %1823 = vmatmul.msk.f32.gmra.mxu1 %vm532_vm2, %v2332_v11 }
  0xdb   : > { %v2522_v0 = vadd.f32 %v973_v5, %v922_v61  ;;  %1839 = vmatmul.msk.f32.gmra.mxu2 %vm532_vm2, %v2124_v17  ;;  %v1022_v5 = vrot.slane %v2373_v24, 2 }
  0xdc   : > { %1871 = vmatmul.msk.f32.gmra.mxu0 %vm532_vm2, %v2356_v18  ;;  %1456 = vperm.xlu0 %1930, %v1392_v21  }
  0xdd   : > { %1857 = vmatmul.msk.f32.gmra.mxu3 %vm532_vm2, %v2171_v34  ;;  %v1385_v34 = vld [vmem:[%s2723_s5 + $0x28] sm:$0xff]  ;;  %v1023_v62 = vsel %vm716_vm3, %v744_v33, %v1022_v5 }
  0xde   : > { %v806_v11 = vpop.f32.mrf.mxu2  ;;  %1421 = vperm.xlu2 %1932, %v1385_v34  }
  0xdf   : > { %v840_v27 = vadd.f32 %v806_v11, %v685_v8  ;;  %v687_v2 = vpop.f32.mrf.mxu1 }
  0xe0   : > { %v688_v17 = vadd.f32 %v687_v2, %v2414_v42  ;;  %v895_v9 = vpop.f32.mrf.mxu3  ;;  %v1390_v42 = vld [vmem:[%s2723_s5 + $0x50] sm:$0xff] }
  0xe1   : > { %v923_v4 = vadd.f32 %v889_v3, %v840_v27  ;;  %v979_v50 = vpop.f32.mrf.mxu0  ;;  %1446 = vperm.xlu1 %1931, %v1390_v42   ;;  %v483_v3 = vld [vmem:[%s2391_s18 + $0x8] sm:$0xff] }
  0xe2   : > { %1824 = vmatmul.msk.f32.gmra.mxu1 %vm532_vm2, %v2344_v14  ;;  %v1192_v48 = vrot.slane %v483_v3, 1 }
  0xe3   : > { %v2542_v13 = vadd.f32 %v976_v6, %v923_v4  ;;  %1840 = vmatmul.msk.f32.gmra.mxu2 %vm532_vm2, %v2187_v39  ;;  %v1278_v4 = vrot.slane %v483_v3, 2 }
  0xe4   : > { %1872 = vmatmul.msk.f32.gmra.mxu0 %vm532_vm2, %v2368_v22  ;;  %v1193_v8 = vsel %vm502_vm1, %v938_v40, %v1192_v48 }
  0xe5   : > { %1858 = vmatmul.msk.f32.gmra.mxu3 %vm532_vm2, %v2205_v45  ;;  %v1393_v45 = vld [vmem:[%s2723_s5 + $0x68] sm:$0xff] }
  0xe6   : > { %v809_v14 = vpop.f32.mrf.mxu2 }
  0xe7   : > { %v841_v15 = vadd.f32 %v809_v14, %v688_v17  ;;  %v690_v19 = vpop.f32.mrf.mxu1 }
  0xe8   : > { %v691_v39 = vadd.f32 %v690_v19, %v2441_v53  ;;  %v898_v29 = vpop.f32.mrf.mxu3 }
  0xe9   : > { %v924_v25 = vadd.f32 %v892_v10, %v841_v15  ;;  %v982_v26 = vpop.f32.mrf.mxu0  ;;  %1461 = vperm.xlu1 %1931, %v1393_v45  }
  0xea   : > { %1825 = vmatmul.msk.f32.gmra.mxu1 %vm532_vm2, %v2356_v18 }
  0xeb   : > { %v2562_v1 = vadd.f32 %v979_v50, %v924_v25  ;;  %1841 = vmatmul.msk.f32.gmra.mxu2 %vm532_vm2, %v2129_v20 }
  0xec   : > { %1873 = vmatmul.msk.f32.gmra.mxu0 %vm532_vm2, %v2394_v28 }
  0xed   : > { %1859 = vmatmul.msk.f32.gmra.mxu3 %vm532_vm2, %v2399_v30 }
  0xee   : > { %v812_v53 = vpop.f32.mrf.mxu2 }
  0xef   : > { %v842_v37 = vadd.f32 %v812_v53, %v691_v39  ;;  %v693_v43 = vpop.f32.mrf.mxu1 }
  0xf0   : > { %v694_v18 = vadd.f32 %v693_v43, %v2458_v35  ;;  %v901_v20 = vpop.f32.mrf.mxu3 }
  0xf1   : > { %v925_v49 = vadd.f32 %v895_v9, %v842_v37  ;;  %v985_v56 = vpop.f32.mrf.mxu0 }
  0xf2   : > { %1826 = vmatmul.msk.f32.gmra.mxu1 %vm532_vm2, %v2368_v22 }
  0xf3   : > { %v2576_v36 = vadd.f32 %v982_v26, %v925_v49  ;;  %1842 = vmatmul.msk.f32.gmra.mxu2 %vm532_vm2, %v2140_v23 }
  0xf4   : > { %1874 = vmatmul.msk.f32.gmra.mxu0 %vm532_vm2, %v2421_v38 }
  0xf5   : > { %1860 = vmatmul.msk.f32.gmra.mxu3 %vm532_vm2, %v2426_v44  ;;  %v1388_v44 = vld [vmem:[%s2723_s5 + $0x40] sm:$0xff] }
  0xf6   : > { %v815_v30 = vpop.f32.mrf.mxu2  ;;  %1436 = vperm.xlu2 %1932, %v1388_v44  }
  0xf7   : > { %v843_v7 = vadd.f32 %v815_v30, %v694_v18  ;;  %v696_v35 = vpop.f32.mrf.mxu1 }
  0xf8   : > { %v904_v23 = vpop.f32.mrf.mxu3  ;;  %v697_v33 = vadd.f32 %v696_v35, %v2412_v41 }
  0xf9   : > { %v926_v22 = vadd.f32 %v898_v29, %v843_v7  ;;  %v988_v54 = vpop.f32.mrf.mxu0 }
  0xfa   : > { %1827 = vmatmul.msk.f32.gmra.mxu1 %vm532_vm2, %v2394_v28  ;;  %v1024_v28 = vrot.slane %v2404_v31, 2 }
  0xfb   : > { %v2591_v47 = vadd.f32 %v985_v56, %v926_v22  ;;  %1843 = vmatmul.msk.f32.gmra.mxu2 %vm532_vm2, %v2164_v32  ;;  %v1975_v32 = vmov 0.0  }
  0xfc   : > { %1875 = vmatmul.msk.f32.gmra.mxu0 %vm532_vm2, %v1023_v62  ;;  %v1194_v58 = vrot.slane %v1975_v32, 1  ;;  %v1025_v27 = vsel %vm716_vm3, %v1022_v5, %v1024_v28  ;;  %v1280_v19 = vrot.slane %v1975_v32, 2 }
  0xfd   : > { %1861 = vmatmul.msk.f32.gmra.mxu3 %vm532_vm2, %v1193_v8 }
  0xfe   : > { %v818_v61 = vpop.f32.mrf.mxu2  ;;  %v1195_v41 = vsel %vm502_vm1, %v1192_v48, %v1194_v58  ;;  %v1281_v45 = vsel %vm716_vm3, %v1278_v4, %v1280_v19 }
  0xff   : > { %v844_v6 = vadd.f32 %v818_v61, %v697_v33  ;;  %v699_v10 = vpop.f32.mrf.mxu1 }
 0x100   : > { %v907_v40 = vpop.f32.mrf.mxu3  ;;  %v700_v17 = vadd.f32 %v699_v10, %v2439_v52 }
 0x101   : > { %v927_v51 = vadd.f32 %v901_v20, %v844_v6  ;;  %v991_v11 = vpop.f32.mrf.mxu0 }
 0x102   : > { %1828 = vmatmul.msk.f32.gmra.mxu1 %vm532_vm2, %v2421_v38  ;;  %v1391_v38 = vld [vmem:[%s2723_s5 + $0x58] sm:$0xff] }
 0x103   : > { %v2608_v2 = vadd.f32 %v988_v54, %v927_v51  ;;  %1844 = vmatmul.msk.f32.gmra.mxu2 %vm532_vm2, %v2373_v24  ;;  %1451 = vperm.xlu2 %1932, %v1391_v38   ;;  %v1279_v24 = vsel %vm716_vm3, %v1024_v28, %v1278_v4 }
 0x104   : > { %1876 = vmatmul.msk.f32.gmra.mxu0 %vm532_vm2, %v1025_v27 }
 0x105   : > { %1862 = vmatmul.msk.f32.gmra.mxu3 %vm532_vm2, %v1195_v41 }
 0x106   : > { %v821_v50 = vpop.f32.mrf.mxu2 }
 0x107   : > { %v845_v63 = vadd.f32 %v821_v50, %v700_v17  ;;  %v702_v9 = vpop.f32.mrf.mxu1 }
 0x108   : > { %v910_v14 = vpop.f32.mrf.mxu3  ;;  %v703_v52 = vadd.f32 %v702_v9, %v2456_v57 }
 0x109   : > { %v928_v34 = vadd.f32 %v904_v23, %v845_v63  ;;  %v994_v42 = vpop.f32.mrf.mxu0 }
 0x10a   : > { %1829 = vmatmul.msk.f32.gmra.mxu1 %vm532_vm2, %v1023_v62 }
 0x10b   : > { %v2621_v15 = vadd.f32 %v991_v11, %v928_v34  ;;  %1845 = vmatmul.msk.f32.gmra.mxu2 %vm532_vm2, %v2404_v31 }
 0x10c   : > { %1877 = vmatmul.msk.f32.gmra.mxu0 %vm532_vm2, %v1279_v24 }
 0x10e   : > { %v824_v39 = vpop.f32.mrf.mxu2 }
 0x10f   : > { %v846_v25 = vadd.f32 %v824_v39, %v703_v52  ;;  %v705_v26 = vpop.f32.mrf.mxu1 }
 0x110   : > { %v913_v53 = vpop.f32.mrf.mxu3  ;;  %v706_v31 = vadd.f32 %v705_v26, %v2471_v60 }
 0x111   : > { %v929_v21 = vadd.f32 %v907_v40, %v846_v25  ;;  %v997_v29 = vpop.f32.mrf.mxu0 }
 0x112   : > { %1830 = vmatmul.msk.f32.gmra.mxu1 %vm532_vm2, %v1025_v27  ;;  %v1397_v27 = vpop.permute.xlu0 %1396 }
 0x113   : > { %v2629_v37 = vadd.f32 %v994_v42, %v929_v21  ;;  %1846 = vmatmul.msk.f32.gmra.mxu2 %vm532_vm2, %v483_v3 }
 0x114   : > { %1878 = vmatmul.msk.f32.gmra.mxu0 %vm532_vm2, %v1281_v45 }
 0x116   : > { %v827_v57 = vpop.f32.mrf.mxu2 }
 0x117   : > { %v847_v43 = vadd.f32 %v827_v57, %v706_v31  ;;  %v708_v18 = vpop.f32.mrf.mxu1 }
 0x118   : > { %v916_v20 = vpop.f32.mrf.mxu3  ;;  %v709_v30 = vadd.f32 %v708_v18, %v2430_v46 }
 0x119   : > { %v930_v49 = vadd.f32 %v910_v14, %v847_v43  ;;  %v1000_v56 = vpop.f32.mrf.mxu0 }
 0x11a   : > { %v1402_v14 = vpop.permute.xlu0 %1401 }
 0x11b   : > { %v2634_v5 = vadd.f32 %v997_v29, %v930_v49 }
 0x11d   : > { %v1407_v57 = vpop.permute.xlu1 %1406 }
 0x11e   : > { %v830_v7 = vpop.f32.mrf.mxu2 }
 0x11f   : > { %v848_v35 = vadd.f32 %v830_v7, %v709_v30  ;;  %v711_v3 = vpop.f32.mrf.mxu1 }
 0x120   : > { %v1220_v54 = vpop.f32.mrf.mxu3  ;;  %v712_v62 = vadd.f32 %v711_v3, %v2447_v55  ;;  %v2649_v55 = vld [vmem:[%s2722_s4] ss:$0 sm:$0xff] }
 0x121   : > { %v931_v48 = vadd.f32 %v913_v53, %v848_v35  ;;  %v1003_v22 = vpop.f32.mrf.mxu0 }
 0x123   : > { %v2637_v60 = vadd.f32 %v1000_v56, %v931_v48 }
 0x126   : > { %v833_v23 = vpop.f32.mrf.mxu2 }
 0x127   : > { %v849_v44 = vadd.f32 %v833_v23, %v712_v62  ;;  %v1050_v8 = vpop.f32.mrf.mxu1 }
 0x128   : > { %v1223_v61 = vpop.f32.mrf.mxu3  ;;  %v1092_v6 = vadd.f32 %v1050_v8, %v2488_v12  ;;  %v1412_v8 = vpop.permute.xlu1 %1411 }
 0x129   : > { %v932_v33 = vadd.f32 %v916_v20, %v849_v44  ;;  %v1306_v28 = vpop.f32.mrf.mxu0 }
 0x12b   : > { %v2641_v46 = vadd.f32 %v1003_v22, %v932_v33 }
 0x12e   : > { %v1133_v10 = vpop.f32.mrf.mxu2 }
 0x12f   : > { %v1175_v32 = vadd.f32 %v1133_v10, %v1092_v6  ;;  %v1053_v58 = vpop.f32.mrf.mxu1 }
 0x130   : > { %v1226_v40 = vpop.f32.mrf.mxu3  ;;  %v1093_v17 = vadd.f32 %v1053_v58, %v2498_v16 }
 0x131   : > { %v1262_v51 = vadd.f32 %v1220_v54, %v1175_v32  ;;  %v1309_v11 = vpop.f32.mrf.mxu0 }
 0x133   : > { %v1348_v41 = vadd.f32 %v1306_v28, %v1262_v51 }
 0x135   : > { %v1366_v4 = vadd.f32 %v2649_v55, %v1348_v41 }
 0x136   : > { %v1136_v12 = vpop.f32.mrf.mxu2 }
 0x137   : > { %v1464_v50 = vmul.f32 %v1397_v27, %v1366_v4  ;;  %v1176_v63 = vadd.f32 %v1136_v12, %v1093_v17  ;;  %v1056_v9 = vpop.f32.mrf.mxu1  ;;  %v1417_v27 = vpop.permute.xlu2 %1416 }
 0x138   : > { %v1229_v42 = vpop.f32.mrf.mxu3  ;;  %v1094_v16 = vadd.f32 %v1056_v9, %v2508_v59 }
 0x139   : > { %1478 = vst [vmem:[%s2656_s11] sm:$0xff] %v1464_v50  ;;  %v1263_v38 = vadd.f32 %v1223_v61, %v1176_v63  ;;  %v1312_v34 = vpop.f32.mrf.mxu0  ;;  %v1511_v21 = vmul.f32 %v1464_v50, %v1464_v50 }
 0x13b   : > { %v1349_v24 = vadd.f32 %v1309_v11, %v1263_v38 }
 0x13d   : > { %v1367_v52 = vadd.f32 %v2649_v55, %v1349_v24 }
 0x13e   : > { %v1139_v19 = vpop.f32.mrf.mxu2 }
 0x13f   : > { %v1465_v39 = vmul.f32 %v1402_v14, %v1367_v52  ;;  %v1177_v25 = vadd.f32 %v1139_v19, %v1094_v16  ;;  %v1059_v26 = vpop.f32.mrf.mxu1  ;;  %v1422_v19 = vpop.permute.xlu2 %1421 }
 0x140   : > { %v1232_v43 = vpop.f32.mrf.mxu3  ;;  %v1095_v56 = vadd.f32 %v1059_v26, %v2522_v0 }
 0x141   : > { %1479 = vst [vmem:[%s2656_s11 + $0x8] sm:$0xff] %v1465_v39  ;;  %v1492_v29 = vadd.f32 %v1465_v39, %v1464_v50  ;;  %v1512_v45 = vmul.f32 %v1465_v39, %v1465_v39  ;;  %v1264_v53 = vadd.f32 %v1226_v40, %v1177_v25  ;;  %v1315_v31 = vpop.f32.mrf.mxu0 }
 0x143   : > { %v1525_v18 = vadd.f32 %v1512_v45, %v1511_v21  ;;  %v1350_v49 = vadd.f32 %v1312_v34, %v1264_v53 }
 0x145   : > { %v1368_v59 = vadd.f32 %v2649_v55, %v1350_v49  ;;  %v1427_v49 = vpop.permute.xlu0 %1426 }
 0x146   : > { %v1142_v20 = vpop.f32.mrf.mxu2 }
 0x147   : > { %v1466_v30 = vmul.f32 %v1407_v57, %v1368_v59  ;;  %v1178_v7 = vadd.f32 %v1142_v20, %v1095_v56  ;;  %v1062_v35 = vpop.f32.mrf.mxu1 }
 0x148   : > { %v1235_v62 = vpop.f32.mrf.mxu3  ;;  %v1096_v33 = vadd.f32 %v1062_v35, %v2542_v13 }
 0x149   : > { %1480 = vst [vmem:[%s2656_s11 + $0x10] sm:$0xff] %v1466_v30  ;;  %v1493_v3 = vadd.f32 %v1492_v29, %v1466_v30  ;;  %v1513_v48 = vmul.f32 %v1466_v30, %v1466_v30  ;;  %v1265_v22 = vadd.f32 %v1229_v42, %v1178_v7  ;;  %v1318_v54 = vpop.f32.mrf.mxu0 }
 0x14b   : > { %v1526_v23 = vadd.f32 %v1525_v18, %v1513_v48  ;;  %v1351_v44 = vadd.f32 %v1315_v31, %v1265_v22 }
 0x14d   : > { %v1369_v0 = vadd.f32 %v2649_v55, %v1351_v44  ;;  %v1432_v44 = vpop.permute.xlu1 %1431 }
 0x14e   : > { %v1145_v28 = vpop.f32.mrf.mxu2 }
 0x14f   : > { %v1467_v61 = vmul.f32 %v1412_v8, %v1369_v0  ;;  %v1179_v6 = vadd.f32 %v1145_v28, %v1096_v33  ;;  %v1065_v10 = vpop.f32.mrf.mxu1 }
 0x150   : > { %v1238_v40 = vpop.f32.mrf.mxu3  ;;  %v1097_v4 = vadd.f32 %v1065_v10, %v2562_v1 }
 0x151   : > { %1481 = vst [vmem:[%s2656_s11 + $0x18] sm:$0xff] %v1467_v61  ;;  %v1494_v32 = vadd.f32 %v1493_v3, %v1467_v61  ;;  %v1514_v58 = vmul.f32 %v1467_v61, %v1467_v61  ;;  %v1266_v51 = vadd.f32 %v1232_v43, %v1179_v6  ;;  %v1321_v11 = vpop.f32.mrf.mxu0 }
 0x153   : > { %v1527_v41 = vadd.f32 %v1526_v23, %v1514_v58  ;;  %v1352_v17 = vadd.f32 %v1318_v54, %v1266_v51 }
 0x155   : > { %v1370_v13 = vadd.f32 %v2649_v55, %v1352_v17 }
 0x156   : > { %v1148_v12 = vpop.f32.mrf.mxu2 }
 0x157   : > { %v1468_v50 = vmul.f32 %v1417_v27, %v1370_v13  ;;  %v1180_v63 = vadd.f32 %v1148_v12, %v1097_v4  ;;  %v1068_v9 = vpop.f32.mrf.mxu1 }
 0x158   : > { %v1241_v14 = vpop.f32.mrf.mxu3  ;;  %v1098_v39 = vadd.f32 %v1068_v9, %v2576_v36 }
 0x159   : > { %1482 = vst [vmem:[%s2656_s11 + $0x20] sm:$0xff] %v1468_v50  ;;  %v1495_v38 = vadd.f32 %v1494_v32, %v1468_v50  ;;  %v1515_v34 = vmul.f32 %v1468_v50, %v1468_v50  ;;  %v1267_v42 = vadd.f32 %v1235_v62, %v1180_v63  ;;  %v1324_v24 = vpop.f32.mrf.mxu0 }
 0x15b   : > { %v1528_v16 = vadd.f32 %v1527_v41, %v1515_v34  ;;  %v1353_v52 = vadd.f32 %v1321_v11, %v1267_v42 }
 0x15d   : > { %v1371_v1 = vadd.f32 %v2649_v55, %v1353_v52 }
 0x15e   : > { %v1151_v25 = vpop.f32.mrf.mxu2 }
 0x15f   : > { %v1469_v26 = vmul.f32 %v1422_v19, %v1371_v1  ;;  %v1181_v21 = vadd.f32 %v1151_v25, %v1098_v39  ;;  %v1071_v29 = vpop.f32.mrf.mxu1 }
 0x160   : > { %v1244_v56 = vpop.f32.mrf.mxu3  ;;  %v1099_v59 = vadd.f32 %v1071_v29, %v2591_v47 }
 0x161   : > { %1483 = vst [vmem:[%s2656_s11 + $0x28] sm:$0xff] %v1469_v26  ;;  %v1496_v45 = vadd.f32 %v1495_v38, %v1469_v26  ;;  %v1516_v53 = vmul.f32 %v1469_v26, %v1469_v26  ;;  %v1268_v31 = vadd.f32 %v1238_v40, %v1181_v21  ;;  %v1327_v57 = vpop.f32.mrf.mxu0  ;;  %v1437_v40 = vpop.permute.xlu2 %1436 }
 0x163   : > { %v1529_v43 = vadd.f32 %v1528_v16, %v1516_v53  ;;  %v1354_v18 = vadd.f32 %v1324_v24, %v1268_v31 }
 0x165   : > { %v1372_v36 = vadd.f32 %v2649_v55, %v1354_v18 }
 0x166   : > { %v1154_v20 = vpop.f32.mrf.mxu2 }
 0x167   : > { %v1470_v30 = vmul.f32 %v1427_v49, %v1372_v36  ;;  %v1182_v7 = vadd.f32 %v1154_v20, %v1099_v59  ;;  %v1074_v35 = vpop.f32.mrf.mxu1 }
 0x168   : > { %v1100_v8 = vadd.f32 %v1074_v35, %v2608_v2  ;;  %v1247_v0 = vpop.f32.mrf.mxu3 }
 0x169   : > { %1484 = vst [vmem:[%s2656_s11 + $0x30] sm:$0xff] %v1470_v30  ;;  %v1497_v3 = vadd.f32 %v1496_v45, %v1470_v30  ;;  %v1517_v48 = vmul.f32 %v1470_v30, %v1470_v30  ;;  %v1269_v22 = vadd.f32 %v1241_v14, %v1182_v7  ;;  %v1330_v54 = vpop.f32.mrf.mxu0 }
 0x16b   : > { %v1530_v62 = vadd.f32 %v1529_v43, %v1517_v48  ;;  %v1355_v23 = vadd.f32 %v1327_v57, %v1269_v22  ;;  %v1447_v43 = vpop.permute.xlu1 %1446  ;;  %v1452_v48 = vpop.permute.xlu2 %1451 }
 0x16d   : > { %v1373_v33 = vadd.f32 %v2649_v55, %v1355_v23 }
 0x16e   : > { %v1157_v47 = vpop.f32.mrf.mxu2 }
 0x16f   : > { %v1471_v28 = vmul.f32 %v1432_v44, %v1373_v33  ;;  %v1183_v61 = vadd.f32 %v1157_v47, %v1100_v8  ;;  %v1077_v6 = vpop.f32.mrf.mxu1 }
 0x170   : > { %v1101_v41 = vadd.f32 %v1077_v6, %v2621_v15  ;;  %v1250_v50 = vpop.f32.mrf.mxu3  ;;  %v1442_v15 = vpop.permute.xlu0 %1441 }
 0x171   : > { %1485 = vst [vmem:[%s2656_s11 + $0x38] sm:$0xff] %v1471_v28  ;;  %v1498_v10 = vadd.f32 %v1497_v3, %v1471_v28  ;;  %v1518_v32 = vmul.f32 %v1471_v28, %v1471_v28  ;;  %v1270_v58 = vadd.f32 %v1244_v56, %v1183_v61  ;;  %v1333_v51 = vpop.f32.mrf.mxu0 }
 0x173   : > { %v1531_v11 = vadd.f32 %v1530_v62, %v1518_v32  ;;  %v1356_v27 = vadd.f32 %v1330_v54, %v1270_v58 }
 0x175   : > { %v1374_v2 = vadd.f32 %v2649_v55, %v1356_v27 }
 0x176   : > { %v1160_v17 = vpop.f32.mrf.mxu2 }
 0x177   : > { %v1472_v4 = vmul.f32 %v1437_v40, %v1374_v2  ;;  %v1184_v13 = vadd.f32 %v1160_v17, %v1101_v41  ;;  %v1080_v12 = vpop.f32.mrf.mxu1 }
 0x178   : > { %v1102_v14 = vadd.f32 %v1080_v12, %v2629_v37  ;;  %v1253_v29 = vpop.f32.mrf.mxu3  ;;  %v1457_v6 = vpop.permute.xlu0 %1456 }
 0x179   : > { %1486 = vst [vmem:[%s2656_s11 + $0x40] sm:$0xff] %v1472_v4  ;;  %v1499_v63 = vadd.f32 %v1498_v10, %v1472_v4  ;;  %v1519_v9 = vmul.f32 %v1472_v4, %v1472_v4  ;;  %v1271_v38 = vadd.f32 %v1247_v0, %v1184_v13  ;;  %v1336_v34 = vpop.f32.mrf.mxu0 }
 0x17b   : > { %v1532_v42 = vadd.f32 %v1531_v11, %v1519_v9  ;;  %v1357_v24 = vadd.f32 %v1333_v51, %v1271_v38 }
 0x17d   : > { %v1375_v16 = vadd.f32 %v2649_v55, %v1357_v24 }
 0x17e   : > { %v1163_v52 = vpop.f32.mrf.mxu2 }
 0x17f   : > { %v1473_v19 = vmul.f32 %v1442_v15, %v1375_v16  ;;  %v1185_v39 = vadd.f32 %v1163_v52, %v1102_v14  ;;  %v1083_v1 = vpop.f32.mrf.mxu1 }
 0x180   : > { %v1103_v57 = vadd.f32 %v1083_v1, %v2634_v5  ;;  %v1256_v3 = vpop.f32.mrf.mxu3 }
 0x181   : > { %1487 = vst [vmem:[%s2656_s11 + $0x48] sm:$0xff] %v1473_v19  ;;  %v1500_v25 = vadd.f32 %v1499_v63, %v1473_v19  ;;  %v1520_v26 = vmul.f32 %v1473_v19, %v1473_v19  ;;  %v1272_v21 = vadd.f32 %v1250_v50, %v1185_v39  ;;  %v1339_v31 = vpop.f32.mrf.mxu0 }
 0x183   : > { %v1533_v45 = vadd.f32 %v1532_v42, %v1520_v26  ;;  %v1358_v53 = vadd.f32 %v1336_v34, %v1272_v21 }
 0x185   : > { %v1376_v37 = vadd.f32 %v2649_v55, %v1358_v53 }
 0x186   : > { %v1166_v18 = vpop.f32.mrf.mxu2 }
 0x187   : > { %v1474_v49 = vmul.f32 %v1447_v43, %v1376_v37  ;;  %v1186_v56 = vadd.f32 %v1166_v18, %v1103_v57  ;;  %v1086_v59 = vpop.f32.mrf.mxu1 }
 0x188   : > { %v1104_v22 = vadd.f32 %v1086_v59, %v2637_v60  ;;  %v1259_v58 = vpop.f32.mrf.mxu3 }
 0x189   : > { %1488 = vst [vmem:[%s2656_s11 + $0x50] sm:$0xff] %v1474_v49  ;;  %v1501_v36 = vadd.f32 %v1500_v25, %v1474_v49  ;;  %v1521_v20 = vmul.f32 %v1474_v49, %v1474_v49  ;;  %v1273_v30 = vadd.f32 %v1253_v29, %v1186_v56  ;;  %v1342_v62 = vpop.f32.mrf.mxu0 }
 0x18b   : > { %v1534_v7 = vadd.f32 %v1533_v45, %v1521_v20  ;;  %v1359_v35 = vadd.f32 %v1339_v31, %v1273_v30 }
 0x18d   : > { %v1377_v5 = vadd.f32 %v2649_v55, %v1359_v35 }
 0x18e   : > { %v1169_v54 = vpop.f32.mrf.mxu2 }
 0x18f   : > { %v1475_v23 = vmul.f32 %v1452_v48, %v1377_v5  ;;  %v1187_v44 = vadd.f32 %v1169_v54, %v1104_v22  ;;  %v1089_v0 = vpop.f32.mrf.mxu1 }
 0x190   : > { %v1105_v10 = vadd.f32 %v1089_v0, %v2641_v46  ;;  %v1462_v46 = vpop.permute.xlu1 %1461 }
 0x191   : > { %1489 = vst [vmem:[%s2656_s11 + $0x58] sm:$0xff] %v1475_v23  ;;  %v1502_v8 = vadd.f32 %v1501_v36, %v1475_v23  ;;  %v1522_v33 = vmul.f32 %v1475_v23, %v1475_v23  ;;  %v1274_v47 = vadd.f32 %v1256_v3, %v1187_v44  ;;  %v1345_v27 = vpop.f32.mrf.mxu0 }
 0x193   : > { %v1535_v28 = vadd.f32 %v1534_v7, %v1522_v33  ;;  %v1360_v61 = vadd.f32 %v1342_v62, %v1274_v47 }
 0x195   : > { %v1378_v60 = vadd.f32 %v2649_v55, %v1360_v61 }
 0x196   : > { %v1172_v32 = vpop.f32.mrf.mxu2 }
 0x197   : > { %v1476_v51 = vmul.f32 %v1457_v6, %v1378_v60  ;;  %v1188_v11 = vadd.f32 %v1172_v32, %v1105_v10 }
 0x199   : > { %1490 = vst [vmem:[%s2656_s11 + $0x60] sm:$0xff] %v1476_v51  ;;  %v1503_v40 = vadd.f32 %v1502_v8, %v1476_v51  ;;  %v1523_v41 = vmul.f32 %v1476_v51, %v1476_v51  ;;  %v1275_v2 = vadd.f32 %v1259_v58, %v1188_v11 }
 0x19b   : > { %v1536_v17 = vadd.f32 %v1535_v28, %v1523_v41  ;;  %v1361_v4 = vadd.f32 %v1345_v27, %v1275_v2 }
 0x19d   : > { %v1379_v13 = vadd.f32 %v2649_v55, %v1361_v4 }
 0x19f   : > { %v1477_v12 = vmul.f32 %v1462_v46, %v1379_v13 }
 0x1a1   : > { %1491 = vst [vmem:[%s2656_s11 + $0x68] sm:$0xff] %v1477_v12  ;;  %v1504_v50 = vadd.f32 %v1503_v40, %v1477_v12  ;;  %v1524_v63 = vmul.f32 %v1477_v12, %v1477_v12 }
 0x1a3   : > { %v1505_v9 = vrot.slane %v1504_v50, 4  ;;  %v1537_v38 = vadd.f32 %v1536_v17, %v1524_v63 }
 0x1a5   : > { %v1506_v34 = vadd.f32 %v1505_v9, %v1504_v50  ;;  %v1538_v42 = vrot.slane %v1537_v38, 4 }
 0x1a7   : > { %v1507_v24 = vrot.slane %v1506_v34, 2  ;;  %v1539_v14 = vadd.f32 %v1538_v42, %v1537_v38 }
 0x1a9   : > { %v1508_v16 = vadd.f32 %v1507_v24, %v1506_v34  ;;  %v1540_v15 = vrot.slane %v1539_v14, 2 }
 0x1ab   : > { %v1509_v52 = vrot.slane %v1508_v16, 1  ;;  %v1541_v19 = vadd.f32 %v1540_v15, %v1539_v14 }
 0x1ad   : > { %v1542_v55 = vrot.slane %v1541_v19, 1  ;;  %v1510_v39 = vadd.f32 %v1509_v52, %v1508_v16 }
 0x1af   : > { %v1543_v1 = vadd.f32 %v1542_v55, %v1541_v19 }
 0x1b1   : > { %v1545_v25 = vsel %vm1544_vm4, %v1510_v39, %v1543_v1 }
 0x1b2   : > { %1546 = vst [vmem:[%s465_s20] sm:$0x3] %v1545_v25 }
 0x1b3 PF: > { %s18_s28 = sadd.s32 1, %s1972_s28   ;;  %s2726_s24 = smov %s1964_s26 }
 0x1b4   : > { %p15_p11 = scmp.ge.s32.totalorder %s18_s28, 6   ;;  %s2727_s25 = smov %s1968_s27 }
 0x1b5   : > { %s2728_s26 = smov %s2731_s29  ;;  %s2729_s27 = smov %s2735_s30 }
 0x1b6   :  { %17 = sbr.rel (!%p15_p11) target bundleno = 3 (0x3), region = 100 }

// kernel: double_convolution.4
= control target key start
LH: loop header
LB: loop body
LE: loop exit
PB: predicated region body
PF: predicated region fallthrough
CT: control target
= control target key end

     0   :  { %s2095_s30 = smov 0   ;;  %s2097_s10 = smov 0   ;;  %s3140_s0 = inlined_call_operand.vmem [shape: f32[2,224,128], index: 0, kind: input, shape index: {}, may-alias: {0,1,2}]   ;;  %s3141_s1 = inlined_call_operand.vmem [shape: f32[2,224,128], index: 1, kind: input, shape index: {}, may-alias: {0,1,2}]   ;;  %s3142_s2 = inlined_call_operand.vmem [shape: f32[2,224,128], index: 2, kind: input, shape index: {}, may-alias: {0,1,2}]   ;;  %s3143_s3 = inlined_call_operand.vmem [shape: f32[1,128], index: 3, kind: input, shape index: {}]   ;;  %s3144_s4 = inlined_call_operand.vmem [shape: f32[1,128], index: 4, kind: input, shape index: {}]   ;;  %s3145_s5 = inlined_call_operand.vmem [shape: f32[9,128,128], index: 5, kind: input, shape index: {}]   ;;  %s3146_s6 = inlined_call_operand.vmem [shape: f32[1,128], index: 6, kind: input, shape index: {}]   ;;  %s3147_s7 = inlined_call_operand.vmem [shape: f32[96,1], index: 7, kind: input, shape index: {}]   ;;  %s3148_s8 = inlined_call_operand.vmem [shape: f32[2,192,128], index: 8, kind: output, shape index: {0}]   ;;  %s3149_s9 = inlined_call_operand.vmem [shape: f32[2,2,2,128], index: 9, kind: output, shape index: {1}]  }
   0x1   :  { %s2099_s11 = smov 0   ;;  %s2101_s12 = smov 0  }
   0x2   :  { %s2103_s13 = smov 0  }
   0x3 LB: > { %s29_s14 = sadd.s32 1, %s2034_s11  ;;  %s32_s15 = sadd.s32 1, %s2038_s12  ;;  %s2042_s13 = sphi %s2103_s13, %s20_s13   ;;  %s2038_s12 = sphi %s2101_s12, %s3154_s12   ;;  %s2034_s11 = sphi %s2099_s11, %s3153_s11   ;;  %s2030_s10 = sphi %s2097_s10, %s3152_s10   ;;  %s2026_s30 = sphi %s2095_s30, %s3151_s30  }
   0x4   : > { %p30_p0 = scmp.ge.s32.totalorder %s29_s14, 2  ;;  %p1763_p1 = scmp.ge.s32.totalorder %s2042_s13, 1 }
   0x5   : > { %p375_p2 = scmp.lt.s32.totalorder %s2042_s13, 5 }
   0x6   : > { %s3156_s14 = smov (%p30_p0, %s29_s14), 0  ;;  %s3158_s15 = smov (!%p30_p0, %s32_s15), %s2038_s12 }
   0x7   : > { %p376_p3 = pnand %p1763_p1, %p375_p2  ;;  %p34_p4 = scmp.ge.s32.totalorder %s3158_s15, 2 }
   0x8   : > { %s2134_s20 = smul.u32 (!%p376_p3), 12, %s2026_s30  ;;  %p459_p5 = scmp.lt.s32.totalorder (!%p376_p3), %s2030_s10, 1 }
   0x9   : > { %s3160_s15 = smov (%p34_p4, %s3158_s15), 0  ;;  %379 = sbr.rel (%p376_p3) target bundleno = 423 (0x1a7), region = 52 }
   0xa   : > { %p461_p6 = scmp.lt.s32.totalorder (!%p376_p3), %s2134_s20, 27  ;;  %s472_s28 = sadd.s32 (!%p376_p3), 1, %s2026_s30 }
   0xb   : > { %p505_p9 = scmp.lt.s32.totalorder (!%p376_p3), %s2134_s20, 23  ;;  %p514_p10 = scmp.lt.s32.totalorder (!%p376_p3), %s2026_s30, 1 }
   0xe   : > { %v1787_v0 = vld [vmem:[%s3145_s5 + $0xf8] sm:$0xff]  ;;  %v1786_v1 = vld [vmem:[%s3145_s5 + $0xf0] sm:$0xff]  ;;  %v1785_v2 = vld [vmem:[%s3145_s5 + $0xe8] sm:$0xff]  ;;  %s3162_s10 = smov (!%p459_p5, %s2030_s10), 1  ;;  %vm641_vm0 = vcmask 1046528   ;;  %vm802_vm1 = vcmask 1045504  }
   0xf   : > { %1905 = vmatpush.msra.mxu1 %v1787_v0  ;;  %1906 = vmatpush.msra.mxu2 %v1787_v0  ;;  %v1784_v3 = vld [vmem:[%s3145_s5 + $0xe0] sm:$0xff]  ;;  %s2146_s25 = smul.u32 28, %s3162_s10  ;;  %v1819_v4 = vld [vmem:[%s3145_s5 + $0x1f8] sm:$0xff]  ;;  %v1818_v5 = vld [vmem:[%s3145_s5 + $0x1f0] sm:$0xff]  ;;  %s3170_s30 = smov (!%p514_p10, %s2026_s30), 1  ;;  %vm1583_vm2 = vcmask 1040384  }
  0x10   : > { %679 = vmatpush.msra.mxu0 %v1787_v0  ;;  %s462_s16 = scalar_select %p461_p6, %s2134_s20, 27  ;;  %v1783_v6 = vld [vmem:[%s3145_s5 + $0xd8] sm:$0xff]  ;;  %922 = vmatpush.msra.mxu3 %v1819_v4  ;;  %v2162_v7 = vld [vmem:[%s3143_s3] ss:$0 sm:$0xff]  ;;  %v1782_v8 = vld [vmem:[%s3145_s5 + $0xd0] sm:$0xff] }
  0x11   : > { %1907 = vmatpush.msra.mxu1 %v1786_v1  ;;  %1908 = vmatpush.msra.mxu2 %v1786_v1  ;;  %v1817_v9 = vld [vmem:[%s3145_s5 + $0x1e8] sm:$0xff]  ;;  %v1816_v11 = vld [vmem:[%s3145_s5 + $0x1e0] sm:$0xff]  ;;  %v1815_v18 = vld [vmem:[%s3145_s5 + $0x1d8] sm:$0xff]  ;;  %s1954_s27 = smul.u32 24, %s3162_s10  ;;  %s3168_s20 = smov (!%p505_p9, %s2134_s20), 23 }
  0x12   : > { %680 = vmatpush.msra.mxu0 %v1786_v1  ;;  %s464_s19 = sadd.s32 %s2146_s25, %s462_s16  ;;  %923 = vmatpush.msra.mxu3 %v1818_v5  ;;  %v1781_v10 = vld [vmem:[%s3145_s5 + $0xc8] sm:$0xff]  ;;  %v2188_v16 = vld [vmem:[%s3144_s4] ss:$0 sm:$0xff]  ;;  %v1814_v23 = vld [vmem:[%s3145_s5 + $0x1d0] sm:$0xff] }
  0x13   : > { %1909 = vmatpush.msra.mxu1 %v1785_v2  ;;  %1910 = vmatpush.msra.mxu2 %v1785_v2  ;;  %s1764_s26 = sshll.u32 %s464_s19, 3  ;;  %v1780_v19 = vld [vmem:[%s3145_s5 + $0xc0] sm:$0xff]  ;;  %v1779_v24 = vld [vmem:[%s3145_s5 + $0xb8] sm:$0xff]  ;;  %s2209_s19 = smul.u32 12, %s472_s28  ;;  %v1813_v28 = vld [vmem:[%s3145_s5 + $0x1c8] sm:$0xff] }
  0x14   : > { %681 = vmatpush.msra.mxu0 %v1785_v2  ;;  %s2176_s21 = scalar_lea.vmem %s3140_s0, %s1764_s26  ;;  %924 = vmatpush.msra.mxu3 %v1817_v9  ;;  %v1778_v29 = vld [vmem:[%s3145_s5 + $0xb0] sm:$0xff]  ;;  %v1812_v37 = vld [vmem:[%s3145_s5 + $0x1c0] sm:$0xff]  ;;  %v1777_v38 = vld [vmem:[%s3145_s5 + $0xa8] sm:$0xff]  ;;  %s508_s29 = sadd.s32 %s1954_s27, %s3168_s20 }
  0x15   : > { %1911 = vmatpush.msra.mxu1 %v1784_v3  ;;  %1912 = vmatpush.msra.mxu2 %v1784_v3  ;;  %v524_v12 = vld [vmem:[%s2176_s21 + $0x20] sm:$0xff]  ;;  %v525_v13 = vld [vmem:[%s2176_s21 + $0x28] sm:$0xff]  ;;  %v526_v33 = vld [vmem:[%s2176_s21 + $0x30] sm:$0xff]  ;;  %p477_p7 = scmp.lt.s32.totalorder %s2209_s19, 27  ;;  %s1903_s24 = sadd.s32 2, %s2209_s19 }
  0x16   : > { %682 = vmatpush.msra.mxu0 %v1784_v3  ;;  %v528_v14 = vld [vmem:[%s2176_s21 + $0x40] sm:$0xff]  ;;  %v544_v15 = vmul.f32 %v2162_v7, %v524_v12  ;;  %v529_v17 = vld [vmem:[%s2176_s21 + $0x48] sm:$0xff]  ;;  %v545_v20 = vmul.f32 %v2162_v7, %v525_v13  ;;  %925 = vmatpush.msra.mxu3 %v1816_v11  ;;  %v530_v34 = vld [vmem:[%s2176_s21 + $0x50] sm:$0xff]  ;;  %v546_v39 = vmul.f32 %v2162_v7, %v526_v33  ;;  %p492_p8 = scmp.lt.s32.totalorder %s1903_s24, 27  ;;  %s1770_s20 = sshll.u32 %s3162_s10, 1 }
  0x17   : > { %1913 = vmatpush.msra.mxu1 %v1783_v6  ;;  %1914 = vmatpush.msra.mxu2 %v1783_v6  ;;  %v548_v21 = vmul.f32 %v2162_v7, %v528_v14  ;;  %v549_v22 = vmul.f32 %v2162_v7, %v529_v17  ;;  %v520_v25 = vld [vmem:[%s2176_s21] sm:$0xff]  ;;  %v521_v26 = vld [vmem:[%s2176_s21 + $0x8] sm:$0xff]  ;;  %v550_v40 = vmul.f32 %v2162_v7, %v530_v34  ;;  %v1811_v41 = vld [vmem:[%s3145_s5 + $0x1b8] sm:$0xff]  ;;  %s3164_s19 = smov (!%p477_p7, %s2209_s19), 27 }
  0x18   : > { %683 = vmatpush.msra.mxu0 %v1783_v6  ;;  %926 = vmatpush.msra.mxu3 %v1815_v18  ;;  %v565_v27 = vadd.f32 %v2188_v16, %v544_v15  ;;  %v566_v30 = vadd.f32 %v2188_v16, %v545_v20  ;;  %v540_v35 = vmul.f32 %v2162_v7, %v520_v25  ;;  %v1776_v42 = vld [vmem:[%s3145_s5 + $0xa0] sm:$0xff]  ;;  %v1810_v49 = vld [vmem:[%s3145_s5 + $0x1b0] sm:$0xff]  ;;  %v1775_v50 = vld [vmem:[%s3145_s5 + $0x98] sm:$0xff]  ;;  %s3166_s24 = smov (!%p492_p8, %s1903_s24), 27  ;;  %s480_s18 = sadd.s32 %s2146_s25, %s3164_s19 }
  0x19   : > { %1915 = vmatpush.msra.mxu1 %v1782_v8  ;;  %1916 = vmatpush.msra.mxu2 %v1782_v8  ;;  %v569_v31 = vadd.f32 %v2188_v16, %v548_v21  ;;  %v570_v32 = vadd.f32 %v2188_v16, %v549_v22  ;;  %v541_v36 = vmul.f32 %v2162_v7, %v521_v26  ;;  %v1809_v53 = vld [vmem:[%s3145_s5 + $0x1a8] sm:$0xff]  ;;  %v1774_v54 = vld [vmem:[%s3145_s5 + $0x90] sm:$0xff]  ;;  %v1808_v61 = vld [vmem:[%s3145_s5 + $0x1a0] sm:$0xff]  ;;  %s1766_s19 = sshll.u32 %s480_s18, 3  ;;  %s3150_s22 = sadd.s32 %s2146_s25, %s3166_s24 }
  0x1a   : > { %684 = vmatpush.msra.mxu0 %v1782_v8  ;;  %927 = vmatpush.msra.mxu3 %v1814_v23  ;;  %v2241_v43 = vmax.f32 %v565_v27, 0.0  ;;  %v2243_v44 = vmax.f32 %v566_v30, 0.0  ;;  %v561_v47 = vadd.f32 %v2188_v16, %v540_v35  ;;  %v567_v51 = vadd.f32 %v2188_v16, %v546_v39  ;;  %v1773_v62 = vld [vmem:[%s3145_s5 + $0x88] sm:$0xff]  ;;  %v527_v63 = vld [vmem:[%s2176_s21 + $0x38] sm:$0xff]  ;;  %v1772_v2 = vld [vmem:[%s3145_s5 + $0x80] sm:$0xff]  ;;  %s2343_s28 = scalar_lea.vmem %s3141_s1, %s1766_s19  ;;  %s1768_s23 = sshll.u32 %s3150_s22, 3 }
  0x1b   : > { %1917 = vmatpush.msra.mxu1 %v1781_v10  ;;  %1918 = vmatpush.msra.mxu2 %v1781_v10  ;;  %v2245_v45 = vmax.f32 %v569_v31, 0.0  ;;  %v2247_v46 = vmax.f32 %v570_v32, 0.0  ;;  %v562_v48 = vadd.f32 %v2188_v16, %v541_v36  ;;  %v571_v52 = vadd.f32 %v2188_v16, %v550_v40  ;;  %v531_v0 = vld [vmem:[%s2176_s21 + $0x58] sm:$0xff]  ;;  %v522_v8 = vld [vmem:[%s2176_s21 + $0x10] sm:$0xff]  ;;  %v1805_v25 = vld [vmem:[%s3145_s5 + $0x188] sm:$0xff]  ;;  %s2883_s19 = scalar_lea.vmem %s3142_s2, %s1768_s23  ;;  %s1769_s22 = sshll.u32 %s508_s29, 3 }
  0x1c   : > { %685 = vmatpush.msra.mxu0 %v1781_v10  ;;  %928 = vmatpush.msra.mxu3 %v1813_v28  ;;  %v649_v55 = vrot.slane %v2241_v43, 1  ;;  %v651_v56 = vrot.slane %v2243_v44, 1  ;;  %v2276_v59 = vmax.f32 %v561_v47, 0.0  ;;  %v1807_v1 = vld [vmem:[%s3145_s5 + $0x198] sm:$0xff]  ;;  %v2312_v5 = vmax.f32 %v567_v51, 0.0  ;;  %v1806_v17 = vld [vmem:[%s3145_s5 + $0x190] sm:$0xff] }
  0x1d   : > { %1919 = vmatpush.msra.mxu1 %v1780_v19  ;;  %1920 = vmatpush.msra.mxu2 %v1780_v19  ;;  %v657_v57 = vrot.slane %v2245_v45, 1  ;;  %v659_v58 = vrot.slane %v2247_v46, 1  ;;  %v2278_v60 = vmax.f32 %v562_v48, 0.0  ;;  %v2314_v6 = vmax.f32 %v571_v52, 0.0  ;;  %v1803_v13 = vld [vmem:[%s3145_s5 + $0x178] sm:$0xff]  ;;  %v1802_v18 = vld [vmem:[%s3145_s5 + $0x170] sm:$0xff] }
  0x1e   : > { %686 = vmatpush.msra.mxu0 %v1780_v19  ;;  %929 = vmatpush.msra.mxu3 %v1812_v37  ;;  %v2303_v3 = vsel %vm641_vm0, %v649_v55, %v651_v56  ;;  %v642_v9 = vrot.slane %v2276_v59, 1  ;;  %v547_v11 = vmul.f32 %v2162_v7, %v527_v63  ;;  %v551_v12 = vmul.f32 %v2162_v7, %v531_v0  ;;  %v610_v14 = vld [vmem:[%s3145_s5 + $0x78] sm:$0xff]  ;;  %v609_v19 = vld [vmem:[%s3145_s5 + $0x70] sm:$0xff]  ;;  %v1801_v26 = vld [vmem:[%s3145_s5 + $0x168] sm:$0xff] }
  0x1f   : > { %1921 = vmatpush.msra.mxu1 %v1779_v24  ;;  %1922 = vmatpush.msra.mxu2 %v1779_v24  ;;  %v2310_v4 = vsel %vm641_vm0, %v657_v57, %v659_v58  ;;  %v643_v10 = vrot.slane %v2278_v60, 1  ;;  %v542_v15 = vmul.f32 %v2162_v7, %v522_v8  ;;  %v653_v20 = vrot.slane %v2312_v5, 1  ;;  %v608_v27 = vld [vmem:[%s3145_s5 + $0x68] sm:$0xff]  ;;  %v1835_v28 = vld [vmem:[%s3145_s5 + $0x278] sm:$0xff]  ;;  %v532_v30 = vld [vmem:[%s2343_s28] sm:$0xff] }
  0x20   : > { %687 = vmatpush.msra.mxu0 %v1779_v24  ;;  %930 = vmatpush.msra.mxu3 %v1811_v41  ;;  %v661_v21 = vrot.slane %v2314_v6, 1  ;;  %v568_v23 = vadd.f32 %v2188_v16, %v547_v11  ;;  %v572_v24 = vadd.f32 %v2188_v16, %v551_v12  ;;  %v1804_v31 = vld [vmem:[%s3145_s5 + $0x180] sm:$0xff]  ;;  %v1799_v39 = vld [vmem:[%s3145_s5 + $0x158] sm:$0xff]  ;;  %v552_v41 = vmul.f32 %v2162_v7, %v532_v30  ;;  %v1798_v48 = vld [vmem:[%s3145_s5 + $0x150] sm:$0xff] }
  0x21   : > { %1923 = vmatpush.msra.mxu1 %v1778_v29  ;;  %1924 = vmatpush.msra.mxu2 %v1778_v29  ;;  %v644_v22 = vsel %vm641_vm0, %v642_v9, %v643_v10  ;;  %v1800_v32 = vld [vmem:[%s3145_s5 + $0x160] sm:$0xff]  ;;  %v2379_v34 = vsel %vm641_vm0, %v651_v56, %v653_v20  ;;  %v606_v40 = vld [vmem:[%s3145_s5 + $0x58] sm:$0xff]  ;;  %v1833_v51 = vld [vmem:[%s3145_s5 + $0x268] sm:$0xff] }
  0x22   : > { %688 = vmatpush.msra.mxu0 %v1778_v29  ;;  %931 = vmatpush.msra.mxu3 %v1810_v49  ;;  %v563_v29 = vadd.f32 %v2188_v16, %v542_v15  ;;  %v607_v33 = vld [vmem:[%s3145_s5 + $0x60] sm:$0xff]  ;;  %v2386_v35 = vsel %vm641_vm0, %v659_v58, %v661_v21  ;;  %v2388_v36 = vmax.f32 %v568_v23, 0.0  ;;  %v2390_v37 = vmax.f32 %v572_v24, 0.0  ;;  %v605_v49 = vld [vmem:[%s3145_s5 + $0x50] sm:$0xff]  ;;  %v1797_v56 = vld [vmem:[%s3145_s5 + $0x148] sm:$0xff] }
  0x23   : > { %1925 = vmatpush.msra.mxu1 %v1777_v38  ;;  %1926 = vmatpush.msra.mxu2 %v1777_v38  ;;  %v604_v58 = vld [vmem:[%s3145_s5 + $0x48] sm:$0xff]  ;;  %v1882_v0 = vld [vmem:[%s3145_s5 + $0x3f0] sm:$0xff]  ;;  %v1795_v12 = vld [vmem:[%s3145_s5 + $0x138] sm:$0xff] }
  0x24   : > { %689 = vmatpush.msra.mxu0 %v1777_v38  ;;  %932 = vmatpush.msra.mxu3 %v1809_v53  ;;  %v523_v38 = vld [vmem:[%s2176_s21 + $0x18] sm:$0xff]  ;;  %v2403_v47 = vmax.f32 %v563_v29, 0.0  ;;  %v655_v52 = vrot.slane %v2388_v36, 1  ;;  %v663_v53 = vrot.slane %v2390_v37, 1  ;;  %v1830_v24 = vld [vmem:[%s3145_s5 + $0x250] sm:$0xff]  ;;  %v1829_v29 = vld [vmem:[%s3145_s5 + $0x248] sm:$0xff]  ;;  %s517_s21 = sadd.s32 %s1770_s20, %s3170_s30 }
  0x25   : > { %1927 = vmatpush.msra.mxu1 %v1776_v42  ;;  %1928 = vmatpush.msra.mxu2 %v1776_v42  ;;  %s1771_s18 = sshll.u32 %s517_s21, 1 }
  0x26   : > { %690 = vmatpush.msra.mxu0 %v1776_v42  ;;  %933 = vmatpush.msra.mxu3 %v1808_v61  ;;  %v1834_v42 = vld [vmem:[%s3145_s5 + $0x270] sm:$0xff]  ;;  %v573_v61 = vadd.f32 %v2188_v16, %v552_v41  ;;  %v645_v63 = vrot.slane %v2403_v47, 1  ;;  %v2447_v9 = vsel %vm641_vm0, %v653_v20, %v655_v52  ;;  %v2452_v11 = vsel %vm641_vm0, %v661_v21, %v663_v53  ;;  %v1881_v20 = vld [vmem:[%s3145_s5 + $0x3e8] sm:$0xff]  ;;  %v1827_v41 = vld [vmem:[%s3145_s5 + $0x238] sm:$0xff]  ;;  %s519_s24 = scalar_lea.vmem %s3149_s9, %s1771_s18 }
  0x27   : > { %1929 = vmatpush.msra.mxu1 %v1775_v50  ;;  %1930 = vmatpush.msra.mxu2 %v1775_v50  ;;  %v1793_v21 = vld [vmem:[%s3145_s5 + $0x128] sm:$0xff]  ;;  %v2508_v30 = vsel %vm641_vm0, %v655_v52, %v657_v57  ;;  %v1828_v57 = vld [vmem:[%s3145_s5 + $0x240] sm:$0xff] }
  0x28   : > { %691 = vmatpush.msra.mxu0 %v1775_v50  ;;  %934 = vmatpush.msra.mxu3 %v1807_v1  ;;  %v543_v50 = vmul.f32 %v2162_v7, %v523_v38  ;;  %v1796_v1 = vld [vmem:[%s3145_s5 + $0x140] sm:$0xff]  ;;  %v646_v15 = vsel %vm641_vm0, %v643_v10, %v645_v63  ;;  %v1831_v10 = vld [vmem:[%s3145_s5 + $0x258] sm:$0xff] }
  0x29   : > { %1931 = vmatpush.msra.mxu1 %v1774_v54  ;;  %1932 = vmatpush.msra.mxu2 %v1774_v54  ;;  %v595_v52 = vld [vmem:[%s3145_s5] sm:$0xff] }
  0x2a   : > { %692 = vmatpush.msra.mxu0 %v1774_v54  ;;  %935 = vmatpush.msra.mxu3 %v1806_v17  ;;  %v1883_v54 = vld [vmem:[%s3145_s5 + $0x3f8] sm:$0xff]  ;;  %v564_v8 = vadd.f32 %v2188_v16, %v543_v50  ;;  %v1794_v17 = vld [vmem:[%s3145_s5 + $0x130] sm:$0xff]  ;;  %v1789_v50 = vld [vmem:[%s3145_s5 + $0x108] sm:$0xff] }
  0x2b   : > { %1933 = vmatpush.msra.mxu1 %v1773_v62  ;;  %1934 = vmatpush.msra.mxu2 %v1773_v62 }
  0x2c   : > { %693 = vmatpush.msra.mxu0 %v1773_v62  ;;  %936 = vmatpush.msra.mxu3 %v1805_v25  ;;  %v1832_v62 = vld [vmem:[%s3145_s5 + $0x260] sm:$0xff] }
  0x2d   : > { %1935 = vmatpush.msra.mxu1 %v1772_v2  ;;  %1936 = vmatpush.msra.mxu2 %v1772_v2  ;;  %v1880_v25 = vld [vmem:[%s3145_s5 + $0x3e0] sm:$0xff] }
  0x2e   : > { %707 = vmatmul.f32.vlgmr.msra.gmra.mxu1 %v2303_v3  ;;  %719 = vmatmul.f32.vlgmr.msra.gmra.mxu2 %v2310_v4 }
  0x2f   : > { %840 = vmatpush.msrb.mxu2 %v1803_v13  ;;  %732 = vmatpush.msrb.mxu1 %v610_v14  ;;  %v602_v13 = vld [vmem:[%s3145_s5 + $0x38] sm:$0xff]  ;;  %v2460_v14 = vmax.f32 %v573_v61, 0.0 }
  0x30   : > { %694 = vmatpush.msra.mxu0 %v1772_v2  ;;  %937 = vmatpush.msra.mxu3 %v1804_v31  ;;  %v603_v2 = vld [vmem:[%s3145_s5 + $0x40] sm:$0xff]  ;;  %v1867_v61 = vld [vmem:[%s3145_s5 + $0x378] sm:$0xff] }
  0x31   : > { %841 = vmatpush.msrb.mxu2 %v1802_v18  ;;  %733 = vmatpush.msrb.mxu1 %v609_v19  ;;  %v601_v18 = vld [vmem:[%s3145_s5 + $0x30] sm:$0xff]  ;;  %v2473_v19 = vmax.f32 %v564_v8, 0.0  ;;  %v665_v23 = vrot.slane %v2460_v14, 1 }
  0x32   : > { %695 = vmatmul.f32.vlgmr.msra.gmra.mxu0 %v644_v22  ;;  %938 = vmatmul.f32.vlgmr.msra.gmra.mxu3 %v2403_v47  ;;  %v600_v22 = vld [vmem:[%s3145_s5 + $0x28] sm:$0xff]  ;;  %v1850_v8 = vld [vmem:[%s3145_s5 + $0x2f0] sm:$0xff] }
  0x33   : > { %842 = vmatpush.msrb.mxu2 %v1801_v26  ;;  %734 = vmatpush.msrb.mxu1 %v608_v27  ;;  %v1792_v26 = vld [vmem:[%s3145_s5 + $0x120] sm:$0xff]  ;;  %v2513_v31 = vsel %vm641_vm0, %v663_v53, %v665_v23  ;;  %v1879_v53 = vld [vmem:[%s3145_s5 + $0x3d8] sm:$0xff] }
  0x34   : > { %1012 = vmatpush.msrb.mxu0 %v1835_v28  ;;  %1272 = vmatpush.msrb.mxu3 %v1883_v54  ;;  %v599_v27 = vld [vmem:[%s3145_s5 + $0x20] sm:$0xff]  ;;  %v647_v28 = vrot.slane %v2473_v19, 1 }
  0x35   : > { %843 = vmatpush.msrb.mxu2 %v1800_v32  ;;  %735 = vmatpush.msrb.mxu1 %v607_v33  ;;  %v598_v32 = vld [vmem:[%s3145_s5 + $0x18] sm:$0xff]  ;;  %v1788_v54 = vld [vmem:[%s3145_s5 + $0x100] sm:$0xff] }
  0x36   : > { %710 = vmatmul.f32.gmra.mxu1 %v2379_v34  ;;  %722 = vmatmul.f32.gmra.mxu2 %v2386_v35  ;;  %v1791_v33 = vld [vmem:[%s3145_s5 + $0x118] sm:$0xff]  ;;  %v2526_v38 = vsel %vm641_vm0, %v645_v63, %v647_v28  ;;  %v2573_v63 = vsel %vm641_vm0, %v647_v28, %v649_v55  ;;  %v806_v55 = vrot.slane %v2403_v47, 2  ;;  %v1877_v28 = vld [vmem:[%s3145_s5 + $0x3c8] sm:$0xff] }
  0x37   : > { %844 = vmatpush.msrb.mxu2 %v1799_v39  ;;  %736 = vmatpush.msrb.mxu1 %v606_v40  ;;  %v597_v39 = vld [vmem:[%s3145_s5 + $0x10] sm:$0xff] }
  0x38   : > { %1013 = vmatpush.msrb.mxu0 %v1834_v42  ;;  %1273 = vmatpush.msrb.mxu3 %v1882_v0  ;;  %v1790_v40 = vld [vmem:[%s3145_s5 + $0x110] sm:$0xff]  ;;  %v596_v42 = vld [vmem:[%s3145_s5 + $0x8] sm:$0xff]  ;;  %v1851_v0 = vld [vmem:[%s3145_s5 + $0x2f8] sm:$0xff] }
  0x39   : > { %845 = vmatpush.msrb.mxu2 %v1798_v48  ;;  %737 = vmatpush.msrb.mxu1 %v605_v49  ;;  %v803_v48 = vrot.slane %v2276_v59, 2  ;;  %v804_v49 = vrot.slane %v2278_v60, 2 }
  0x3a   : > { %1014 = vmatpush.msrb.mxu0 %v1833_v51  ;;  %941 = vmatmul.f32.gmra.mxu3 %v2473_v19  ;;  %v1826_v51 = vld [vmem:[%s3145_s5 + $0x230] sm:$0xff] }
  0x3b   : > { %846 = vmatpush.msrb.mxu2 %v1797_v56  ;;  %738 = vmatpush.msrb.mxu1 %v604_v58  ;;  %v1825_v56 = vld [vmem:[%s3145_s5 + $0x228] sm:$0xff]  ;;  %v805_v58 = vsel %vm802_vm1, %v803_v48, %v804_v49  ;;  %v1875_v48 = vld [vmem:[%s3145_s5 + $0x3b8] sm:$0xff] }
  0x3c   : > { %1015 = vmatpush.msrb.mxu0 %v1832_v62  ;;  %1274 = vmatpush.msrb.mxu3 %v1881_v20  ;;  %v1824_v62 = vld [vmem:[%s3145_s5 + $0x220] sm:$0xff] }
  0x3d   : > { %847 = vmatpush.msrb.mxu2 %v1796_v1  ;;  %739 = vmatpush.msrb.mxu1 %v603_v2  ;;  %v1823_v1 = vld [vmem:[%s3145_s5 + $0x218] sm:$0xff]  ;;  %v1866_v2 = vld [vmem:[%s3145_s5 + $0x370] sm:$0xff]  ;;  %v1820_v20 = vld [vmem:[%s3145_s5 + $0x200] sm:$0xff] }
  0x3e   : > { %713 = vmatmul.f32.gmra.mxu1 %v2447_v9  ;;  %725 = vmatmul.f32.gmra.mxu2 %v2452_v11 }
  0x3f   : > { %848 = vmatpush.msrb.mxu2 %v1795_v12  ;;  %740 = vmatpush.msrb.mxu1 %v602_v13  ;;  %v1865_v12 = vld [vmem:[%s3145_s5 + $0x368] sm:$0xff] }
  0x40   : > { %698 = vmatmul.f32.gmra.mxu0 %v646_v15  ;;  %1275 = vmatpush.msrb.mxu3 %v1880_v25  ;;  %v1849_v13 = vld [vmem:[%s3145_s5 + $0x2e8] sm:$0xff]  ;;  %v1878_v15 = vld [vmem:[%s3145_s5 + $0x3d0] sm:$0xff]  ;;  %v1847_v25 = vld [vmem:[%s3145_s5 + $0x2d8] sm:$0xff] }
  0x41   : > { %849 = vmatpush.msrb.mxu2 %v1794_v17  ;;  %741 = vmatpush.msrb.mxu1 %v601_v18  ;;  %v1821_v17 = vld [vmem:[%s3145_s5 + $0x208] sm:$0xff]  ;;  %v1864_v18 = vld [vmem:[%s3145_s5 + $0x360] sm:$0xff] }
  0x42   : > { %1016 = vmatpush.msrb.mxu0 %v1831_v10  ;;  %944 = vmatmul.f32.gmra.mxu3 %v2241_v43  ;;  %v807_v10 = vsel %vm802_vm1, %v804_v49, %v806_v55  ;;  %v810_v49 = vrot.slane %v2241_v43, 2 }
  0x43   : > { %850 = vmatpush.msrb.mxu2 %v1793_v21  ;;  %742 = vmatpush.msrb.mxu1 %v600_v22  ;;  %v1848_v21 = vld [vmem:[%s3145_s5 + $0x2e0] sm:$0xff]  ;;  %v1863_v22 = vld [vmem:[%s3145_s5 + $0x358] sm:$0xff] }
  0x44   : > { %1017 = vmatpush.msrb.mxu0 %v1830_v24  ;;  %1276 = vmatpush.msrb.mxu3 %v1879_v53  ;;  %v2623_v24 = vld [vmem:[%s3145_s5 + $0x478] sm:$0xff] }
  0x45   : > { %851 = vmatpush.msrb.mxu2 %v1792_v26  ;;  %743 = vmatpush.msrb.mxu1 %v599_v27  ;;  %v808_v26 = vrot.slane %v2473_v19, 2  ;;  %v1862_v27 = vld [vmem:[%s3145_s5 + $0x350] sm:$0xff]  ;;  %v1843_v53 = vld [vmem:[%s3145_s5 + $0x2b8] sm:$0xff] }
  0x46   : > { %1018 = vmatpush.msrb.mxu0 %v1829_v29  ;;  %716 = vmatmul.f32.gmra.mxu1 %v2508_v30  ;;  %v1846_v29 = vld [vmem:[%s3145_s5 + $0x2d0] sm:$0xff] }
  0x47   : > { %728 = vmatmul.f32.gmra.mxu2 %v2513_v31  ;;  %744 = vmatpush.msrb.mxu1 %v598_v32  ;;  %v1861_v32 = vld [vmem:[%s3145_s5 + $0x348] sm:$0xff] }
  0x48   : > { %852 = vmatpush.msrb.mxu2 %v1791_v33  ;;  %1019 = vmatpush.msrb.mxu0 %v1828_v57  ;;  %v2652_v33 = vld [vmem:[%s3145_s5 + $0x468] sm:$0xff]  ;;  %v1876_v57 = vld [vmem:[%s3145_s5 + $0x3c0] sm:$0xff] }
  0x49   : > { %701 = vmatmul.f32.gmra.mxu0 %v2526_v38  ;;  %745 = vmatpush.msrb.mxu1 %v597_v39  ;;  %v2664_v39 = vld [vmem:[%s3145_s5 + $0x460] sm:$0xff] }
  0x4a   : > { %853 = vmatpush.msrb.mxu2 %v1790_v40  ;;  %1020 = vmatpush.msrb.mxu0 %v1827_v41  ;;  %v1845_v40 = vld [vmem:[%s3145_s5 + $0x2c8] sm:$0xff]  ;;  %v1860_v41 = vld [vmem:[%s3145_s5 + $0x340] sm:$0xff] }
  0x4b   : > { %746 = vmatpush.msrb.mxu1 %v596_v42  ;;  %947 = vmatmul.f32.gmra.mxu3 %v2243_v44  ;;  %v2678_v42 = vld [vmem:[%s3145_s5 + $0x458] sm:$0xff] }
  0x4c   : > { %854 = vmatpush.msrb.mxu2 %v1789_v50  ;;  %1021 = vmatpush.msrb.mxu0 %v1826_v51  ;;  %v2692_v50 = vld [vmem:[%s3145_s5 + $0x450] sm:$0xff]  ;;  %v1859_v51 = vld [vmem:[%s3145_s5 + $0x338] sm:$0xff] }
  0x4d   : > { %747 = vmatpush.msrb.mxu1 %v595_v52  ;;  %1277 = vmatpush.msrb.mxu3 %v1878_v15  ;;  %v1874_v52 = vld [vmem:[%s3145_s5 + $0x3b0] sm:$0xff]  ;;  %v1840_v15 = vld [vmem:[%s3145_s5 + $0x2a0] sm:$0xff] }
  0x4e   : > { %855 = vmatpush.msrb.mxu2 %v1788_v54  ;;  %1022 = vmatpush.msrb.mxu0 %v1825_v56  ;;  %v2708_v54 = vld [vmem:[%s3145_s5 + $0x448] sm:$0xff]  ;;  %v1858_v56 = vld [vmem:[%s3145_s5 + $0x330] sm:$0xff] }
  0x4f   : > { %748 = vmatmul.f32.vlgmr.msrb.gmra.mxu1 %v2276_v59  ;;  %856 = vmatmul.f32.vlgmr.msrb.gmra.mxu2 %v805_v58  ;;  %v1822_v59 = vld [vmem:[%s3145_s5 + $0x210] sm:$0xff]  ;;  %v2714_v58 = vsel %vm802_vm1, %v808_v26, %v810_v49 }
  0x50   : > { %1182 = vmatpush.msra.mxu2 %v1867_v61  ;;  %1023 = vmatpush.msrb.mxu0 %v1824_v62  ;;  %v1873_v61 = vld [vmem:[%s3145_s5 + $0x3a8] sm:$0xff]  ;;  %v812_v62 = vrot.slane %v2243_v44, 2 }
  0x51   : > { %704 = vmatmul.f32.gmra.mxu0 %v2573_v63  ;;  %1100 = vmatpush.msra.mxu1 %v1851_v0  ;;  %v2731_v0 = vld [vmem:[%s3145_s5 + $0x440] sm:$0xff] }
  0x52   : > { %1024 = vmatpush.msrb.mxu0 %v1823_v1  ;;  %1183 = vmatpush.msra.mxu2 %v1866_v2  ;;  %v1872_v1 = vld [vmem:[%s3145_s5 + $0x3a0] sm:$0xff]  ;;  %v2742_v2 = vsel %vm802_vm1, %v810_v49, %v812_v62  ;;  %v533_v49 = vld [vmem:[%s2343_s28 + $0x8] sm:$0xff]  ;;  %s3084_s28 = scalar_lea.vmem %s3148_s8, %s1769_s22 }
  0x53   : > { %1101 = vmatpush.msra.mxu1 %v1850_v8  ;;  %950 = vmatmul.f32.gmra.mxu3 %v2312_v5  ;;  %v2752_v8 = vld [vmem:[%s3145_s5 + $0x438] sm:$0xff] }
  0x54   : > { %1025 = vmatpush.msrb.mxu0 %v1822_v59  ;;  %1184 = vmatpush.msra.mxu2 %v1865_v12  ;;  %v814_v59 = vrot.slane %v2312_v5, 2  ;;  %v1856_v12 = vld [vmem:[%s3145_s5 + $0x320] sm:$0xff] }
  0x55   : > { %1102 = vmatpush.msra.mxu1 %v1849_v13  ;;  %1278 = vmatpush.msrb.mxu3 %v1877_v28  ;;  %v1871_v13 = vld [vmem:[%s3145_s5 + $0x398] sm:$0xff]  ;;  %v1869_v28 = vld [vmem:[%s3145_s5 + $0x388] sm:$0xff] }
  0x56   : > { %1026 = vmatpush.msrb.mxu0 %v1821_v17  ;;  %1185 = vmatpush.msra.mxu2 %v1864_v18  ;;  %v2769_v17 = vld [vmem:[%s3145_s5 + $0x430] sm:$0xff]  ;;  %v2773_v18 = vsel %vm802_vm1, %v812_v62, %v814_v59 }
  0x57   : > { %751 = vmatmul.f32.gmra.mxu1 %v2278_v60  ;;  %859 = vmatmul.f32.gmra.mxu2 %v807_v10  ;;  %v2636_v60 = vld [vmem:[%s3145_s5 + $0x470] sm:$0xff]  ;;  %v1855_v10 = vld [vmem:[%s3145_s5 + $0x318] sm:$0xff] }
  0x58   : > { %1027 = vmatpush.msrb.mxu0 %v1820_v20  ;;  %1103 = vmatpush.msra.mxu1 %v1848_v21  ;;  %v816_v20 = vrot.slane %v2388_v36, 2  ;;  %v1870_v21 = vld [vmem:[%s3145_s5 + $0x390] sm:$0xff] }
  0x59   : > { %1028 = vmatmul.f32.vlgmr.msrb.gmra.mxu0 %v2526_v38  ;;  %1186 = vmatpush.msra.mxu2 %v1863_v22  ;;  %v2658_v38 = vsel %vm802_vm1, %v806_v55, %v808_v26  ;;  %v1841_v55 = vld [vmem:[%s3145_s5 + $0x2a8] sm:$0xff]  ;;  %v1839_v22 = vld [vmem:[%s3145_s5 + $0x298] sm:$0xff]  ;;  %v1854_v26 = vld [vmem:[%s3145_s5 + $0x310] sm:$0xff] }
  0x5a   : > { %1360 = vmatpush.msra.mxu0 %v2623_v24  ;;  %1104 = vmatpush.msra.mxu1 %v1847_v25  ;;  %v2792_v25 = vld [vmem:[%s3145_s5 + $0x428] sm:$0xff]  ;;  %v1886_v62 = vld [vmem:[%s3145_s5 + $0x410] sm:$0xff] }
  0x5b   : > { %1187 = vmatpush.msra.mxu2 %v1862_v27  ;;  %1279 = vmatpush.msrb.mxu3 %v1876_v57  ;;  %v2800_v27 = vsel %vm802_vm1, %v814_v59, %v816_v20  ;;  %v1888_v57 = vld [vmem:[%s3145_s5 + $0x420] sm:$0xff] }
  0x5c   : > { %1361 = vmatpush.msra.mxu0 %v2636_v60  ;;  %1105 = vmatpush.msra.mxu1 %v1846_v29  ;;  %v818_v29 = vrot.slane %v2245_v45, 2 }
  0x5d   : > { %1188 = vmatpush.msra.mxu2 %v1861_v32  ;;  %1280 = vmatpush.msrb.mxu3 %v1875_v48  ;;  %v1838_v32 = vld [vmem:[%s3145_s5 + $0x290] sm:$0xff] }
  0x5e   : > { %1362 = vmatpush.msra.mxu0 %v2652_v33  ;;  %1106 = vmatpush.msra.mxu1 %v1845_v40  ;;  %v1853_v40 = vld [vmem:[%s3145_s5 + $0x308] sm:$0xff]  ;;  %v2823_v48 = vsel %vm802_vm1, %v816_v20, %v818_v29 }
  0x5f   : > { %754 = vmatmul.f32.gmra.mxu1 %v2403_v47  ;;  %862 = vmatmul.f32.gmra.mxu2 %v2658_v38  ;;  %v1844_v47 = vld [vmem:[%s3145_s5 + $0x2c0] sm:$0xff] }
  0x60   : > { %1363 = vmatpush.msra.mxu0 %v2664_v39  ;;  %1189 = vmatpush.msra.mxu2 %v1860_v41  ;;  %v1868_v41 = vld [vmem:[%s3145_s5 + $0x380] sm:$0xff] }
  0x61   : > { %1031 = vmatmul.f32.gmra.mxu0 %v2573_v63  ;;  %953 = vmatmul.f32.gmra.mxu3 %v2388_v36  ;;  %v1842_v63 = vld [vmem:[%s3145_s5 + $0x2b0] sm:$0xff] }
  0x62   : > { %1364 = vmatpush.msra.mxu0 %v2678_v42  ;;  %1107 = vmatpush.msra.mxu1 %v1844_v47  ;;  %v553_v47 = vmul.f32 %v2162_v7, %v533_v49 }
  0x63   : > { %1190 = vmatpush.msra.mxu2 %v1859_v51  ;;  %1281 = vmatpush.msrb.mxu3 %v1874_v52  ;;  %v1837_v51 = vld [vmem:[%s3145_s5 + $0x288] sm:$0xff]  ;;  %v1887_v52 = vld [vmem:[%s3145_s5 + $0x418] sm:$0xff] }
  0x64   : > { %1365 = vmatpush.msra.mxu0 %v2692_v50  ;;  %1108 = vmatpush.msra.mxu1 %v1843_v53  ;;  %v820_v53 = vrot.slane %v2247_v46, 2 }
  0x65   : > { %1191 = vmatpush.msra.mxu2 %v1858_v56  ;;  %1282 = vmatpush.msrb.mxu3 %v1873_v61  ;;  %v574_v56 = vadd.f32 %v2188_v16, %v553_v47  ;;  %v1836_v61 = vld [vmem:[%s3145_s5 + $0x280] sm:$0xff] }
  0x66   : > { %1366 = vmatpush.msra.mxu0 %v2708_v54  ;;  %1109 = vmatpush.msra.mxu1 %v1842_v63  ;;  %v2851_v63 = vsel %vm802_vm1, %v818_v29, %v820_v53 }
  0x67   : > { %757 = vmatmul.f32.gmra.mxu1 %v2473_v19  ;;  %865 = vmatmul.f32.gmra.mxu2 %v2714_v58  ;;  %v1857_v19 = vld [vmem:[%s3145_s5 + $0x328] sm:$0xff] }
  0x68   : > { %1367 = vmatpush.msra.mxu0 %v2731_v0  ;;  %1192 = vmatpush.msra.mxu2 %v1857_v19  ;;  %v822_v19 = vrot.slane %v2314_v6, 2 }
  0x69   : > { %1034 = vmatmul.f32.gmra.mxu0 %v2303_v3  ;;  %956 = vmatmul.f32.gmra.mxu3 %v2245_v45 }
  0x6a   : > { %1283 = vmatpush.msrb.mxu3 %v1872_v1  ;;  %1110 = vmatpush.msra.mxu1 %v1841_v55  ;;  %v1885_v1 = vld [vmem:[%s3145_s5 + $0x408] sm:$0xff] }
  0x6b   : > { %1368 = vmatpush.msra.mxu0 %v2752_v8  ;;  %1193 = vmatpush.msra.mxu2 %v1856_v12 }
  0x6c   : > { %1284 = vmatpush.msrb.mxu3 %v1871_v13  ;;  %1111 = vmatpush.msra.mxu1 %v1840_v15 }
  0x6d   : > { %1369 = vmatpush.msra.mxu0 %v2769_v17  ;;  %1194 = vmatpush.msra.mxu2 %v1855_v10 }
  0x6e   : > { %1285 = vmatpush.msrb.mxu3 %v1870_v21  ;;  %1112 = vmatpush.msra.mxu1 %v1839_v22 }
  0x6f   : > { %760 = vmatmul.f32.gmra.mxu1 %v2241_v43  ;;  %868 = vmatmul.f32.gmra.mxu2 %v2742_v2 }
  0x70   : > { %1370 = vmatpush.msra.mxu0 %v2792_v25  ;;  %1195 = vmatpush.msra.mxu2 %v1854_v26 }
  0x71   : > { %1037 = vmatmul.f32.gmra.mxu0 %v2379_v34  ;;  %959 = vmatmul.f32.gmra.mxu3 %v2247_v46 }
  0x72   : > { %1286 = vmatpush.msrb.mxu3 %v1869_v28  ;;  %1113 = vmatpush.msra.mxu1 %v1838_v32 }
  0x73   : > { %1371 = vmatpush.msra.mxu0 %v1888_v57  ;;  %1196 = vmatpush.msra.mxu2 %v1853_v40 }
  0x74   : > { %1287 = vmatpush.msrb.mxu3 %v1868_v41  ;;  %1114 = vmatpush.msra.mxu1 %v1837_v51  ;;  %v535_v41 = vld [vmem:[%s2883_s19 + $0x8] sm:$0xff] }
  0x75   : > { %1372 = vmatpush.msra.mxu0 %v1887_v52 }
  0x76   : > { %1937 = vmatpush.msra.mxu3 %v2623_v24  ;;  %v1852_v24 = vld [vmem:[%s3145_s5 + $0x300] sm:$0xff]  ;;  %1115 = vmatpush.msra.mxu1 %v1836_v61  ;;  %v1448_v61 = vld [vmem:[%s3147_s7 + $0x38] sm:$0xff] }
  0x77   : > { %763 = vmatmul.f32.gmra.mxu1 %v2243_v44  ;;  %871 = vmatmul.f32.gmra.mxu2 %v2773_v18 }
  0x78   : > { %1938 = vmatpush.msra.mxu3 %v2636_v60  ;;  %1197 = vmatpush.msra.mxu2 %v1852_v24  ;;  %v2856_v60 = vmax.f32 %v574_v56, 0.0 }
  0x79   : > { %1040 = vmatmul.f32.gmra.mxu0 %v2447_v9  ;;  %962 = vmatmul.f32.gmra.mxu3 %v2314_v6 }
  0x7a   : > { %1373 = vmatpush.msra.mxu0 %v1886_v62  ;;  %1939 = vmatpush.msra.mxu3 %v2652_v33  ;;  %v2867_v33 = vsel %vm802_vm1, %v820_v53, %v822_v19 }
  0x7c   : > { %1940 = vmatpush.msra.mxu3 %v2664_v39  ;;  %1374 = vmatpush.msra.mxu0 %v1885_v1  ;;  %v1884_v39 = vld [vmem:[%s3145_s5 + $0x400] sm:$0xff] }
  0x7e   : > { %1941 = vmatpush.msra.mxu3 %v2678_v42  ;;  %v824_v42 = vrot.slane %v2390_v37, 2  ;;  %1375 = vmatpush.msra.mxu0 %v1884_v39 }
  0x7f   : > { %766 = vmatmul.f32.gmra.mxu1 %v2312_v5  ;;  %874 = vmatmul.f32.gmra.mxu2 %v2800_v27 }
  0x80   : > { %1942 = vmatpush.msra.mxu3 %v2692_v50  ;;  %v534_v50 = vld [vmem:[%s2883_s19] sm:$0xff] }
  0x81   : > { %1043 = vmatmul.f32.gmra.mxu0 %v2508_v30  ;;  %965 = vmatmul.f32.gmra.mxu3 %v2390_v37  ;;  %v554_v55 = vmul.f32 %v2162_v7, %v534_v50 }
  0x82   : > { %1943 = vmatpush.msra.mxu3 %v2708_v54  ;;  %v2891_v54 = vsel %vm802_vm1, %v822_v19, %v824_v42 }
  0x84   : > { %1944 = vmatpush.msra.mxu3 %v2731_v0  ;;  %v826_v0 = vrot.slane %v2460_v14, 2 }
  0x86   : > { %1945 = vmatpush.msra.mxu3 %v2752_v8  ;;  %v575_v8 = vadd.f32 %v2188_v16, %v554_v55  ;;  %v2906_v7 = vsel %vm802_vm1, %v824_v42, %v826_v0  ;;  %v1441_v16 = vld [vmem:[%s3147_s7] sm:$0xff] }
  0x87   : > { %769 = vmatmul.f32.gmra.mxu1 %v2388_v36  ;;  %877 = vmatmul.f32.gmra.mxu2 %v2823_v48 }
  0x88   : > { %1946 = vmatpush.msra.mxu3 %v2769_v17  ;;  %v2913_v12 = vmax.f32 %v575_v8, 0.0  ;;  %v1442_v17 = vld [vmem:[%s3147_s7 + $0x8] sm:$0xff] }
  0x89   : > { %1046 = vmatmul.f32.gmra.mxu0 %v2310_v4  ;;  %968 = vmatmul.f32.gmra.mxu3 %v2460_v14 }
  0x8a   : > { %1947 = vmatpush.msra.mxu3 %v2792_v25 }
  0x8c   : > { %1948 = vmatpush.msra.mxu3 %v1888_v57 }
  0x8e   : > { %1949 = vmatpush.msra.mxu3 %v1887_v52 }
  0x8f   : > { %772 = vmatmul.f32.gmra.mxu1 %v2245_v45  ;;  %880 = vmatmul.f32.gmra.mxu2 %v2851_v63 }
  0x90   : > { %1950 = vmatpush.msra.mxu3 %v1886_v62 }
  0x91   : > { %1049 = vmatmul.f32.gmra.mxu0 %v2386_v35  ;;  %971 = vmatmul.f32.gmra.mxu3 %v2856_v60 }
  0x92   : > { %1951 = vmatpush.msra.mxu3 %v1885_v1 }
  0x94   : > { %1952 = vmatpush.msra.mxu3 %v1884_v39  ;;  %v1445_v39 = vld [vmem:[%s3147_s7 + $0x20] sm:$0xff] }
  0x97   : > { %775 = vmatmul.f32.gmra.mxu1 %v2247_v46  ;;  %883 = vmatmul.f32.gmra.mxu2 %v2867_v33 }
  0x99   : > { %1052 = vmatmul.f32.gmra.mxu0 %v2452_v11  ;;  %1288 = vmatmul.f32.vlgmr.msrb.gmra.mxu3 %v2303_v3  ;;  %v1006_v3 = vrot.slane %v2856_v60, 1 }
  0x9b   : > { %v2911_v59 = vsel %vm641_vm0, %v665_v23, %v1006_v3  ;;  %v1008_v23 = vrot.slane %v2913_v12, 1 }
  0x9d   : > { %v2928_v15 = vsel %vm641_vm0, %v1006_v3, %v1008_v23 }
  0x9f   : > { %778 = vmatmul.f32.gmra.mxu1 %v2314_v6  ;;  %886 = vmatmul.f32.gmra.mxu2 %v2891_v54 }
  0xa1   : > { %1055 = vmatmul.f32.gmra.mxu0 %v2513_v31  ;;  %1291 = vmatmul.f32.gmra.mxu3 %v2379_v34  ;;  %v2044_v34 = vmov 0  }
  0xa2   : > { %1996 = vset.pattern.permute.xlu0 %v2044_v34  ;;  %1997 = vset.pattern.permute.xlu1 %v2044_v34 }
  0xa3   : > { %1455 = vperm.xlu0 %1996, %v1441_v16   ;;  %1998 = vset.pattern.permute.xlu2 %v2044_v34 }
  0xa4   : > { %1475 = vperm.xlu2 %1998, %v1445_v39  }
  0xa7   : > { %781 = vmatmul.f32.gmra.mxu1 %v2390_v37  ;;  %889 = vmatmul.f32.gmra.mxu2 %v2906_v7 }
  0xa9   : > { %1058 = vmatmul.f32.gmra.mxu0 %v2911_v59  ;;  %1294 = vmatmul.f32.gmra.mxu3 %v2447_v9 }
  0xab   : > { %v2922_v13 = vpop.f32.mrf.mxu1  ;;  %1460 = vperm.xlu0 %1996, %v1442_v17   ;;  %v1451_v17 = vld [vmem:[%s3147_s7 + $0x50] sm:$0xff] }
  0xaf   : > { %1116 = vmatmul.f32.vlgmr.msra.gmra.mxu1 %v2658_v38  ;;  %1198 = vmatmul.f32.vlgmr.msra.gmra.mxu2 %v2241_v43  ;;  %v696_v9 = vpop.f32.mrf.mxu0  ;;  %v1443_v43 = vld [vmem:[%s3147_s7 + $0x10] sm:$0xff] }
  0xb0   : > { %1465 = vperm.xlu1 %1997, %v1443_v43  }
  0xb1   : > { %1061 = vmatmul.f32.gmra.mxu0 %v2928_v15  ;;  %v2936_v10 = vpop.f32.mrf.mxu2  ;;  %1297 = vmatmul.f32.gmra.mxu3 %v2508_v30 }
  0xb3   : > { %v2938_v20 = vpop.f32.mrf.mxu1 }
  0xb5   : > { %v939_v22 = vpop.f32.mrf.mxu3 }
  0xb7   : > { %1119 = vmatmul.f32.gmra.mxu1 %v2714_v58  ;;  %1201 = vmatmul.f32.gmra.mxu2 %v2243_v44  ;;  %v1444_v44 = vld [vmem:[%s3147_s7 + $0x18] sm:$0xff] }
  0xb8   : > { %1470 = vperm.xlu1 %1997, %v1444_v44  }
  0xb9   : > { %1376 = vmatmul.f32.vlgmr.msra.gmra.mxu0 %v2742_v2  ;;  %v2947_v38 = vpop.f32.mrf.mxu2  ;;  %1300 = vmatmul.f32.gmra.mxu3 %v2310_v4 }
  0xbb   : > { %v2949_v21 = vpop.f32.mrf.mxu1 }
  0xbd   : > { %v699_v25 = vpop.f32.mrf.mxu0  ;;  %v942_v4 = vpop.f32.mrf.mxu3 }
  0xbf   : > { %1122 = vmatmul.f32.gmra.mxu1 %v2742_v2  ;;  %1204 = vmatmul.f32.gmra.mxu2 %v2312_v5 }
  0xc0   : > { %1490 = vperm.xlu1 %1997, %v1448_v61   ;;  %v1452_v61 = vld [vmem:[%s3147_s7 + $0x58] sm:$0xff] }
  0xc1   : > { %1379 = vmatmul.f32.gmra.mxu0 %v2773_v18  ;;  %v2958_v30 = vpop.f32.mrf.mxu2  ;;  %1303 = vmatmul.f32.gmra.mxu3 %v2386_v35 }
  0xc3   : > { %v2960_v58 = vpop.f32.mrf.mxu1 }
  0xc5   : > { %v945_v32 = vpop.f32.mrf.mxu3 }
  0xc6   : > { %v702_v26 = vpop.f32.mrf.mxu0 }
  0xc7   : > { %1125 = vmatmul.f32.gmra.mxu1 %v2773_v18  ;;  %1207 = vmatmul.f32.gmra.mxu2 %v2388_v36 }
  0xc8   : > { %1505 = vperm.xlu1 %1997, %v1451_v17  }
  0xc9   : > { %1382 = vmatmul.f32.gmra.mxu0 %v2800_v27  ;;  %1306 = vmatmul.f32.gmra.mxu3 %v2452_v11 }
  0xca   : > { %v2966_v5 = vpop.f32.mrf.mxu2 }
  0xcc   : > { %v749_v2 = vpop.f32.mrf.mxu1 }
  0xcd   : > { %v750_v28 = vadd.f32 %v749_v2, %v696_v9 }
  0xce   : > { %v705_v29 = vpop.f32.mrf.mxu0  ;;  %v948_v11 = vpop.f32.mrf.mxu3 }
  0xcf   : > { %1128 = vmatmul.f32.gmra.mxu1 %v2800_v27  ;;  %1210 = vmatmul.f32.gmra.mxu2 %v2245_v45  ;;  %v1447_v45 = vld [vmem:[%s3147_s7 + $0x30] sm:$0xff] }
  0xd0   : > { %1485 = vperm.xlu0 %1996, %v1447_v45  }
  0xd1   : > { %1385 = vmatmul.f32.gmra.mxu0 %v2823_v48  ;;  %1309 = vmatmul.f32.gmra.mxu3 %v2513_v31  ;;  %v2002_v31 = vld [vmem:[%s3143_s3] ss:$0 sm:$0xff] }
  0xd2   : > { %v857_v35 = vpop.f32.mrf.mxu2  ;;  %v555_v27 = vmul.f32 %v2002_v31, %v535_v41  ;;  %v556_v50 = vmul.f32 0.0, %v2002_v31 }
  0xd3   : > { %v893_v18 = vadd.f32 %v857_v35, %v750_v28 }
  0xd4   : > { %v752_v36 = vpop.f32.mrf.mxu1 }
  0xd5   : > { %v753_v57 = vadd.f32 %v752_v36, %v699_v25  ;;  %v975_v40 = vadd.f32 %v939_v22, %v893_v18  ;;  %v1094_v36 = vrot.slane %v2856_v60, 2 }
  0xd6   : > { %v1029_v49 = vpop.f32.mrf.mxu0  ;;  %v951_v19 = vpop.f32.mrf.mxu3 }
  0xd7   : > { %v2974_v47 = vadd.f32 %v1029_v49, %v975_v40  ;;  %1131 = vmatmul.f32.gmra.mxu1 %v2823_v48  ;;  %1213 = vmatmul.f32.gmra.mxu2 %v2247_v46  ;;  %v2003_v46 = vld [vmem:[%s3144_s4] ss:$0 sm:$0xff] }
  0xd8   : > { %v576_v48 = vadd.f32 %v2003_v46, %v555_v27 }
  0xd9   : > { %1388 = vmatmul.f32.gmra.mxu0 %v2851_v63  ;;  %1312 = vmatmul.f32.gmra.mxu3 %v2911_v59  ;;  %v577_v59 = vadd.f32 %v2003_v46, %v556_v50 }
  0xda   : > { %v860_v51 = vpop.f32.mrf.mxu2  ;;  %v2999_v42 = vmax.f32 %v576_v48, 0.0 }
  0xdb   : > { %v894_v52 = vadd.f32 %v860_v51, %v753_v57  ;;  %v594_v44 = vmax.f32 %v577_v59, 0.0  ;;  %v1449_v51 = vld [vmem:[%s3147_s7 + $0x40] sm:$0xff] }
  0xdc   : > { %v755_v53 = vpop.f32.mrf.mxu1  ;;  %v1354_v31 = vrot.slane %v2999_v42, 2 }
  0xdd   : > { %v756_v24 = vadd.f32 %v755_v53, %v702_v26  ;;  %v976_v56 = vadd.f32 %v942_v4, %v894_v52  ;;  %v1268_v28 = vrot.slane %v594_v44, 1 }
  0xde   : > { %v1032_v62 = vpop.f32.mrf.mxu0 }
  0xdf   : > { %v2992_v1 = vadd.f32 %v1032_v62, %v976_v56  ;;  %1134 = vmatmul.f32.gmra.mxu1 %v2851_v63  ;;  %1216 = vmatmul.f32.gmra.mxu2 %v2314_v6  ;;  %v1450_v63 = vld [vmem:[%s3147_s7 + $0x48] sm:$0xff]  ;;  %v1266_v6 = vrot.slane %v2999_v42, 1 }
  0xe0   : > { %1500 = vperm.xlu0 %1996, %v1450_v63  }
  0xe1   : > { %1391 = vmatmul.f32.gmra.mxu0 %v2867_v33  ;;  %1315 = vmatmul.f32.gmra.mxu3 %v2928_v15  ;;  %v1446_v15 = vld [vmem:[%s3147_s7 + $0x28] sm:$0xff]  ;;  %v1267_v25 = vsel %vm641_vm0, %v1008_v23, %v1266_v6  ;;  %v1269_v23 = vsel %vm641_vm0, %v1266_v6, %v1268_v28 }
  0xe2   : > { %v863_v55 = vpop.f32.mrf.mxu2  ;;  %1480 = vperm.xlu2 %1998, %v1446_v15  }
  0xe3   : > { %v895_v3 = vadd.f32 %v863_v55, %v756_v24 }
  0xe4   : > { %v758_v8 = vpop.f32.mrf.mxu1  ;;  %v954_v43 = vpop.f32.mrf.mxu3 }
  0xe5   : > { %v759_v16 = vadd.f32 %v758_v8, %v705_v29  ;;  %v977_v34 = vadd.f32 %v945_v32, %v895_v3 }
  0xe6   : > { %v1035_v9 = vpop.f32.mrf.mxu0 }
  0xe7   : > { %v3010_v22 = vadd.f32 %v1035_v9, %v977_v34  ;;  %1137 = vmatmul.f32.gmra.mxu1 %v2867_v33  ;;  %1219 = vmatmul.f32.gmra.mxu2 %v2390_v37 }
  0xe9   : > { %1394 = vmatmul.f32.gmra.mxu0 %v2891_v54  ;;  %1318 = vmatmul.f32.gmra.mxu3 %v1267_v25 }
  0xea   : > { %v866_v4 = vpop.f32.mrf.mxu2  ;;  %1495 = vperm.xlu2 %1998, %v1449_v51  }
  0xeb   : > { %v896_v26 = vadd.f32 %v866_v4, %v759_v16 }
  0xec   : > { %v761_v2 = vpop.f32.mrf.mxu1  ;;  %v957_v32 = vpop.f32.mrf.mxu3 }
  0xed   : > { %v762_v33 = vadd.f32 %v761_v2, %v2922_v13  ;;  %v978_v37 = vadd.f32 %v948_v11, %v896_v26  ;;  %v1356_v13 = vrot.slane %v594_v44, 2 }
  0xee   : > { %v1038_v29 = vpop.f32.mrf.mxu0 }
  0xef   : > { %v3022_v35 = vadd.f32 %v1038_v29, %v978_v37  ;;  %1140 = vmatmul.f32.gmra.mxu1 %v2891_v54  ;;  %1222 = vmatmul.f32.gmra.mxu2 %v2460_v14  ;;  %v1095_v54 = vsel %vm802_vm1, %v826_v0, %v1094_v36  ;;  %v1096_v0 = vrot.slane %v2913_v12, 2 }
  0xf1   : > { %1397 = vmatmul.f32.gmra.mxu0 %v2906_v7  ;;  %1321 = vmatmul.f32.gmra.mxu3 %v1269_v23  ;;  %v1355_v3 = vsel %vm802_vm1, %v1096_v0, %v1354_v31 }
  0xf2   : > { %v869_v18 = vpop.f32.mrf.mxu2  ;;  %1510 = vperm.xlu2 %1998, %v1452_v61  }
  0xf3   : > { %v897_v57 = vadd.f32 %v869_v18, %v762_v33 }
  0xf4   : > { %v764_v40 = vpop.f32.mrf.mxu1  ;;  %v960_v45 = vpop.f32.mrf.mxu3 }
  0xf5   : > { %v765_v41 = vadd.f32 %v764_v40, %v2938_v20  ;;  %v979_v49 = vadd.f32 %v951_v19, %v897_v57  ;;  %v1357_v20 = vsel %vm802_vm1, %v1354_v31, %v1356_v13 }
  0xf6   : > { %v1041_v11 = vpop.f32.mrf.mxu0 }
  0xf7   : > { %v3034_v27 = vadd.f32 %v1041_v11, %v979_v49  ;;  %1143 = vmatmul.f32.gmra.mxu1 %v2906_v7  ;;  %1225 = vmatmul.f32.gmra.mxu2 %v2856_v60  ;;  %v1097_v60 = vsel %vm802_vm1, %v1094_v36, %v1096_v0 }
  0xf9   : > { %1400 = vmatmul.f32.gmra.mxu0 %v1095_v54  ;;  %1409 = vmatmul.f32.vlgmr.msra.gmra.mxu3 %v1357_v20 }
  0xfa   : > { %v872_v14 = vpop.f32.mrf.mxu2 }
  0xfb   : > { %v898_v52 = vadd.f32 %v872_v14, %v765_v41 }
  0xfc   : > { %v767_v53 = vpop.f32.mrf.mxu1  ;;  %v963_v24 = vpop.f32.mrf.mxu3 }
  0xfd   : > { %v768_v46 = vadd.f32 %v767_v53, %v2949_v21  ;;  %v980_v48 = vadd.f32 %v954_v43, %v898_v52 }
  0xfe   : > { %v1044_v7 = vpop.f32.mrf.mxu0 }
  0xff   : > { %v3045_v56 = vadd.f32 %v1044_v7, %v980_v48  ;;  %1146 = vmatmul.f32.gmra.mxu1 %v1095_v54  ;;  %1228 = vmatmul.f32.gmra.mxu2 %v2913_v12 }
 0x101   : > { %1403 = vmatmul.f32.gmra.mxu0 %v1097_v60 }
 0x102   : > { %v875_v62 = vpop.f32.mrf.mxu2 }
 0x103   : > { %v899_v19 = vadd.f32 %v875_v62, %v768_v46 }
 0x104   : > { %v770_v39 = vpop.f32.mrf.mxu1  ;;  %v966_v63 = vpop.f32.mrf.mxu3 }
 0x105   : > { %v771_v21 = vadd.f32 %v770_v39, %v2960_v58  ;;  %v981_v50 = vadd.f32 %v957_v32, %v899_v19 }
 0x106   : > { %v1047_v55 = vpop.f32.mrf.mxu0 }
 0x107   : > { %v3053_v8 = vadd.f32 %v1047_v55, %v981_v50  ;;  %1149 = vmatmul.f32.gmra.mxu1 %v1097_v60  ;;  %1231 = vmatmul.f32.gmra.mxu2 %v2999_v42 }
 0x109   : > { %1406 = vmatmul.f32.gmra.mxu0 %v1355_v3 }
 0x10a   : > { %v878_v12 = vpop.f32.mrf.mxu2 }
 0x10b   : > { %v900_v6 = vadd.f32 %v878_v12, %v771_v21 }
 0x10c   : > { %v773_v59 = vpop.f32.mrf.mxu1  ;;  %v969_v17 = vpop.f32.mrf.mxu3 }
 0x10d   : > { %v982_v16 = vadd.f32 %v960_v45, %v900_v6  ;;  %v774_v58 = vadd.f32 %v773_v59, %v2936_v10 }
 0x10e   : > { %v1050_v34 = vpop.f32.mrf.mxu0 }
 0x10f   : > { %v3056_v9 = vadd.f32 %v1050_v34, %v982_v16 }
 0x112   : > { %v881_v43 = vpop.f32.mrf.mxu2 }
 0x113   : > { %v901_v15 = vadd.f32 %v881_v43, %v774_v58 }
 0x114   : > { %v776_v25 = vpop.f32.mrf.mxu1  ;;  %v972_v26 = vpop.f32.mrf.mxu3 }
 0x115   : > { %v983_v44 = vadd.f32 %v963_v24, %v901_v15  ;;  %v777_v42 = vadd.f32 %v776_v25, %v2947_v38  ;;  %v1456_v7 = vpop.permute.xlu0 %1455 }
 0x116   : > { %v1053_v4 = vpop.f32.mrf.mxu0 }
 0x117   : > { %v3059_v2 = vadd.f32 %v1053_v4, %v983_v44 }
 0x11a   : > { %v884_v28 = vpop.f32.mrf.mxu2 }
 0x11b   : > { %v902_v33 = vadd.f32 %v884_v28, %v777_v42 }
 0x11c   : > { %v779_v37 = vpop.f32.mrf.mxu1  ;;  %v1289_v23 = vpop.f32.mrf.mxu3 }
 0x11d   : > { %v984_v29 = vadd.f32 %v966_v63, %v902_v33  ;;  %v780_v10 = vadd.f32 %v779_v37, %v2958_v30  ;;  %v1461_v6 = vpop.permute.xlu0 %1460 }
 0x11e   : > { %v1056_v32 = vpop.f32.mrf.mxu0 }
 0x11f   : > { %v3062_v18 = vadd.f32 %v1056_v32, %v984_v29 }
 0x122   : > { %v887_v36 = vpop.f32.mrf.mxu2  ;;  %v1466_v4 = vpop.permute.xlu1 %1465 }
 0x123   : > { %v903_v57 = vadd.f32 %v887_v36, %v780_v10 }
 0x124   : > { %v782_v40 = vpop.f32.mrf.mxu1  ;;  %v1292_v49 = vpop.f32.mrf.mxu3 }
 0x125   : > { %v985_v13 = vadd.f32 %v969_v17, %v903_v57  ;;  %v783_v11 = vadd.f32 %v782_v40, %v2966_v5  ;;  %v3077_v5 = vld [vmem:[%s3146_s6] ss:$0 sm:$0xff] }
 0x126   : > { %v1059_v41 = vpop.f32.mrf.mxu0 }
 0x127   : > { %v3065_v38 = vadd.f32 %v1059_v41, %v985_v13 }
 0x12a   : > { %v890_v54 = vpop.f32.mrf.mxu2 }
 0x12b   : > { %v904_v45 = vadd.f32 %v890_v54, %v783_v11  ;;  %v1471_v11 = vpop.permute.xlu1 %1470 }
 0x12c   : > { %v1117_v31 = vpop.f32.mrf.mxu1  ;;  %v1295_v14 = vpop.f32.mrf.mxu3 }
 0x12d   : > { %v986_v51 = vadd.f32 %v972_v26, %v904_v45  ;;  %v1153_v0 = vadd.f32 %v1117_v31, %v2974_v47 }
 0x12e   : > { %v1062_v20 = vpop.f32.mrf.mxu0 }
 0x12f   : > { %v3069_v30 = vadd.f32 %v1062_v20, %v986_v51 }
 0x132   : > { %v1199_v52 = vpop.f32.mrf.mxu2 }
 0x133   : > { %v1235_v53 = vadd.f32 %v1199_v52, %v1153_v0 }
 0x134   : > { %v1120_v46 = vpop.f32.mrf.mxu1  ;;  %v1298_v24 = vpop.f32.mrf.mxu3 }
 0x135   : > { %v1325_v48 = vadd.f32 %v1289_v23, %v1235_v53  ;;  %v1154_v62 = vadd.f32 %v1120_v46, %v2992_v1 }
 0x136   : > { %v1377_v60 = vpop.f32.mrf.mxu0 }
 0x137   : > { %v1413_v61 = vadd.f32 %v1377_v60, %v1325_v48  ;;  %v1476_v48 = vpop.permute.xlu2 %1475 }
 0x139   : > { %v1429_v19 = vadd.f32 %v3077_v5, %v1413_v61 }
 0x13a   : > { %v1202_v47 = vpop.f32.mrf.mxu2 }
 0x13b   : > { %v1513_v39 = vmul.f32 %v1456_v7, %v1429_v19  ;;  %v1236_v21 = vadd.f32 %v1202_v47, %v1154_v62 }
 0x13c   : > { %v1123_v50 = vpop.f32.mrf.mxu1  ;;  %v1301_v63 = vpop.f32.mrf.mxu3 }
 0x13d   : > { %1525 = vst [vmem:[%s3084_s28] sm:$0xff] %v1513_v39  ;;  %v1326_v55 = vadd.f32 %v1292_v49, %v1236_v21  ;;  %v1155_v1 = vadd.f32 %v1123_v50, %v3010_v22  ;;  %v1554_v43 = vmul.f32 %v1513_v39, %v1513_v39 }
 0x13e   : > { %v1380_v3 = vpop.f32.mrf.mxu0 }
 0x13f   : > { %v1414_v12 = vadd.f32 %v1380_v3, %v1326_v55 }
 0x141   : > { %v1430_v59 = vadd.f32 %v3077_v5, %v1414_v12 }
 0x142   : > { %v1205_v16 = vpop.f32.mrf.mxu2 }
 0x143   : > { %v1514_v34 = vmul.f32 %v1461_v6, %v1430_v59  ;;  %v1237_v17 = vadd.f32 %v1205_v16, %v1155_v1  ;;  %v1481_v6 = vpop.permute.xlu2 %1480 }
 0x144   : > { %v1126_v58 = vpop.f32.mrf.mxu1  ;;  %v1304_v42 = vpop.f32.mrf.mxu3 }
 0x145   : > { %1526 = vst [vmem:[%s3084_s28 + $0x8] sm:$0xff] %v1514_v34  ;;  %v1537_v15 = vadd.f32 %v1514_v34, %v1513_v39  ;;  %v1555_v25 = vmul.f32 %v1514_v34, %v1514_v34  ;;  %v1327_v44 = vadd.f32 %v1295_v14, %v1237_v17  ;;  %v1156_v37 = vadd.f32 %v1126_v58, %v3022_v35 }
 0x146   : > { %v1383_v26 = vpop.f32.mrf.mxu0 }
 0x147   : > { %v1566_v28 = vadd.f32 %v1555_v25, %v1554_v43  ;;  %v1415_v33 = vadd.f32 %v1383_v26, %v1327_v44 }
 0x149   : > { %v1431_v22 = vadd.f32 %v3077_v5, %v1415_v33 }
 0x14a   : > { %v1208_v29 = vpop.f32.mrf.mxu2 }
 0x14b   : > { %v1515_v32 = vmul.f32 %v1466_v4, %v1431_v22  ;;  %v1238_v23 = vadd.f32 %v1208_v29, %v1156_v37 }
 0x14c   : > { %v1129_v10 = vpop.f32.mrf.mxu1  ;;  %v1307_v54 = vpop.f32.mrf.mxu3 }
 0x14d   : > { %1527 = vst [vmem:[%s3084_s28 + $0x10] sm:$0xff] %v1515_v32  ;;  %v1538_v36 = vadd.f32 %v1537_v15, %v1515_v32  ;;  %v1556_v57 = vmul.f32 %v1515_v32, %v1515_v32  ;;  %v1328_v40 = vadd.f32 %v1298_v24, %v1238_v23  ;;  %v1157_v45 = vadd.f32 %v1129_v10, %v3034_v27 }
 0x14e   : > { %v1386_v13 = vpop.f32.mrf.mxu0 }
 0x14f   : > { %v1567_v41 = vadd.f32 %v1566_v28, %v1556_v57  ;;  %v1416_v49 = vadd.f32 %v1386_v13, %v1328_v40 }
 0x151   : > { %v1432_v35 = vadd.f32 %v3077_v5, %v1416_v49 }
 0x152   : > { %v1211_v31 = vpop.f32.mrf.mxu2 }
 0x153   : > { %v1516_v51 = vmul.f32 %v1471_v11, %v1432_v35  ;;  %v1239_v20 = vadd.f32 %v1211_v31, %v1157_v45 }
 0x154   : > { %v1132_v14 = vpop.f32.mrf.mxu1  ;;  %v1310_v62 = vpop.f32.mrf.mxu3 }
 0x155   : > { %1528 = vst [vmem:[%s3084_s28 + $0x18] sm:$0xff] %v1516_v51  ;;  %v1539_v0 = vadd.f32 %v1538_v36, %v1516_v51  ;;  %v1557_v52 = vmul.f32 %v1516_v51, %v1516_v51  ;;  %v1329_v53 = vadd.f32 %v1301_v63, %v1239_v20  ;;  %v1158_v24 = vadd.f32 %v1132_v14, %v3045_v56 }
 0x156   : > { %v1389_v46 = vpop.f32.mrf.mxu0 }
 0x157   : > { %v1568_v7 = vadd.f32 %v1567_v41, %v1557_v52  ;;  %v1417_v60 = vadd.f32 %v1389_v46, %v1329_v53 }
 0x159   : > { %v1433_v61 = vadd.f32 %v3077_v5, %v1417_v60 }
 0x15a   : > { %v1214_v27 = vpop.f32.mrf.mxu2 }
 0x15b   : > { %v1517_v19 = vmul.f32 %v1476_v48, %v1433_v61  ;;  %v1240_v47 = vadd.f32 %v1214_v27, %v1158_v24  ;;  %v1496_v48 = vpop.permute.xlu2 %1495 }
 0x15c   : > { %v1135_v39 = vpop.f32.mrf.mxu1  ;;  %v1313_v58 = vpop.f32.mrf.mxu3 }
 0x15d   : > { %1529 = vst [vmem:[%s3084_s28 + $0x20] sm:$0xff] %v1517_v19  ;;  %v1540_v21 = vadd.f32 %v1539_v0, %v1517_v19  ;;  %v1558_v50 = vmul.f32 %v1517_v19, %v1517_v19  ;;  %v1330_v55 = vadd.f32 %v1304_v42, %v1240_v47  ;;  %v1159_v1 = vadd.f32 %v1135_v39, %v3053_v8  ;;  %v1486_v42 = vpop.permute.xlu0 %1485 }
 0x15e   : > { %v1392_v3 = vpop.f32.mrf.mxu0 }
 0x15f   : > { %v1569_v63 = vadd.f32 %v1568_v7, %v1558_v50  ;;  %v1418_v12 = vadd.f32 %v1392_v3, %v1330_v55 }
 0x161   : > { %v1434_v56 = vadd.f32 %v3077_v5, %v1418_v12 }
 0x162   : > { %v1217_v59 = vpop.f32.mrf.mxu2 }
 0x163   : > { %v1518_v16 = vmul.f32 %v1481_v6, %v1434_v56  ;;  %v1241_v34 = vadd.f32 %v1217_v59, %v1159_v1 }
 0x164   : > { %v1138_v17 = vpop.f32.mrf.mxu1  ;;  %v1316_v57 = vpop.f32.mrf.mxu3 }
 0x165   : > { %1530 = vst [vmem:[%s3084_s28 + $0x28] sm:$0xff] %v1518_v16  ;;  %v1541_v43 = vadd.f32 %v1540_v21, %v1518_v16  ;;  %v1559_v15 = vmul.f32 %v1518_v16, %v1518_v16  ;;  %v1331_v25 = vadd.f32 %v1307_v54, %v1241_v34  ;;  %v1160_v28 = vadd.f32 %v1138_v17, %v3056_v9  ;;  %v1491_v9 = vpop.permute.xlu1 %1490  ;;  %v1501_v50 = vpop.permute.xlu0 %1500 }
 0x166   : > { %v1395_v44 = vpop.f32.mrf.mxu0 }
 0x167   : > { %v1570_v4 = vadd.f32 %v1569_v63, %v1559_v15  ;;  %v1419_v26 = vadd.f32 %v1395_v44, %v1331_v25 }
 0x169   : > { %v1435_v8 = vadd.f32 %v3077_v5, %v1419_v26 }
 0x16a   : > { %v1220_v33 = vpop.f32.mrf.mxu2 }
 0x16b   : > { %v1519_v37 = vmul.f32 %v1486_v42, %v1435_v8  ;;  %v1242_v22 = vadd.f32 %v1220_v33, %v1160_v28 }
 0x16c   : > { %v1141_v29 = vpop.f32.mrf.mxu1  ;;  %v1319_v53 = vpop.f32.mrf.mxu3 }
 0x16d   : > { %1531 = vst [vmem:[%s3084_s28 + $0x30] sm:$0xff] %v1519_v37  ;;  %v1542_v32 = vadd.f32 %v1541_v43, %v1519_v37  ;;  %v1560_v23 = vmul.f32 %v1519_v37, %v1519_v37  ;;  %v1332_v10 = vadd.f32 %v1310_v62, %v1242_v22  ;;  %v1161_v41 = vadd.f32 %v1141_v29, %v3059_v2  ;;  %v1506_v15 = vpop.permute.xlu1 %1505 }
 0x16e   : > { %v1398_v36 = vpop.f32.mrf.mxu0 }
 0x16f   : > { %v1571_v40 = vadd.f32 %v1570_v4, %v1560_v23  ;;  %v1420_v13 = vadd.f32 %v1398_v36, %v1332_v10 }
 0x171   : > { %v1436_v49 = vadd.f32 %v3077_v5, %v1420_v13 }
 0x172   : > { %v1223_v11 = vpop.f32.mrf.mxu2 }
 0x173   : > { %v1520_v54 = vmul.f32 %v1491_v9, %v1436_v49  ;;  %v1243_v45 = vadd.f32 %v1223_v11, %v1161_v41 }
 0x174   : > { %v1144_v35 = vpop.f32.mrf.mxu1  ;;  %v1322_v63 = vpop.f32.mrf.mxu3 }
 0x175   : > { %1532 = vst [vmem:[%s3084_s28 + $0x38] sm:$0xff] %v1520_v54  ;;  %v1543_v31 = vadd.f32 %v1542_v32, %v1520_v54  ;;  %v1561_v51 = vmul.f32 %v1520_v54, %v1520_v54  ;;  %v1333_v20 = vadd.f32 %v1313_v58, %v1243_v45  ;;  %v1162_v46 = vadd.f32 %v1144_v35, %v3062_v18 }
 0x176   : > { %v1401_v14 = vpop.f32.mrf.mxu0 }
 0x177   : > { %v1572_v0 = vadd.f32 %v1571_v40, %v1561_v51  ;;  %v1421_v52 = vadd.f32 %v1401_v14, %v1333_v20 }
 0x179   : > { %v1437_v2 = vadd.f32 %v3077_v5, %v1421_v52 }
 0x17a   : > { %v1226_v7 = vpop.f32.mrf.mxu2 }
 0x17b   : > { %v1521_v60 = vmul.f32 %v1496_v48, %v1437_v2  ;;  %v1244_v24 = vadd.f32 %v1226_v7, %v1162_v46 }
 0x17c   : > { %v1147_v61 = vpop.f32.mrf.mxu1  ;;  %v1410_v26 = vpop.f32.mrf.mxu3 }
 0x17d   : > { %1533 = vst [vmem:[%s3084_s28 + $0x40] sm:$0xff] %v1521_v60  ;;  %v1544_v27 = vadd.f32 %v1543_v31, %v1521_v60  ;;  %v1562_v62 = vmul.f32 %v1521_v60, %v1521_v60  ;;  %v1334_v19 = vadd.f32 %v1316_v57, %v1244_v24  ;;  %v1163_v55 = vadd.f32 %v1147_v61, %v3065_v38 }
 0x17e   : > { %v1404_v47 = vpop.f32.mrf.mxu0 }
 0x17f   : > { %v1573_v39 = vadd.f32 %v1572_v0, %v1562_v62  ;;  %v1422_v21 = vadd.f32 %v1404_v47, %v1334_v19 }
 0x181   : > { %v1438_v18 = vadd.f32 %v3077_v5, %v1422_v21 }
 0x182   : > { %v1229_v3 = vpop.f32.mrf.mxu2 }
 0x183   : > { %v1522_v12 = vmul.f32 %v1501_v50, %v1438_v18  ;;  %v1245_v6 = vadd.f32 %v1229_v3, %v1163_v55 }
 0x184   : > { %v1150_v16 = vpop.f32.mrf.mxu1 }
 0x185   : > { %1534 = vst [vmem:[%s3084_s28 + $0x48] sm:$0xff] %v1522_v12  ;;  %v1545_v1 = vadd.f32 %v1544_v27, %v1522_v12  ;;  %v1563_v56 = vmul.f32 %v1522_v12, %v1522_v12  ;;  %v1335_v59 = vadd.f32 %v1319_v53, %v1245_v6  ;;  %v1164_v43 = vadd.f32 %v1150_v16, %v3069_v30  ;;  %v1511_v30 = vpop.permute.xlu2 %1510 }
 0x186   : > { %v1407_v34 = vpop.f32.mrf.mxu0 }
 0x187   : > { %v1574_v17 = vadd.f32 %v1573_v39, %v1563_v56  ;;  %v1423_v58 = vadd.f32 %v1407_v34, %v1335_v59 }
 0x189   : > { %v1439_v38 = vadd.f32 %v3077_v5, %v1423_v58 }
 0x18a   : > { %v1232_v25 = vpop.f32.mrf.mxu2 }
 0x18b   : > { %v1523_v44 = vmul.f32 %v1506_v15, %v1439_v38  ;;  %v1246_v4 = vadd.f32 %v1232_v25, %v1164_v43 }
 0x18d   : > { %1535 = vst [vmem:[%s3084_s28 + $0x50] sm:$0xff] %v1523_v44  ;;  %v1546_v42 = vadd.f32 %v1545_v1, %v1523_v44  ;;  %v1564_v28 = vmul.f32 %v1523_v44, %v1523_v44  ;;  %v1336_v8 = vadd.f32 %v1322_v63, %v1246_v4 }
 0x18f   : > { %v1575_v33 = vadd.f32 %v1574_v17, %v1564_v28  ;;  %v1424_v37 = vadd.f32 %v1410_v26, %v1336_v8 }
 0x191   : > { %v1440_v22 = vadd.f32 %v3077_v5, %v1424_v37 }
 0x193   : > { %v1524_v29 = vmul.f32 %v1511_v30, %v1440_v22 }
 0x195   : > { %1536 = vst [vmem:[%s3084_s28 + $0x58] sm:$0xff] %v1524_v29  ;;  %v1547_v32 = vadd.f32 %v1546_v42, %v1524_v29  ;;  %v1565_v23 = vmul.f32 %v1524_v29, %v1524_v29 }
 0x197   : > { %v1548_v10 = vrot.slane %v1547_v32, 4  ;;  %v1576_v36 = vadd.f32 %v1575_v33, %v1565_v23 }
 0x199   : > { %v1549_v57 = vadd.f32 %v1548_v10, %v1547_v32  ;;  %v1577_v40 = vrot.slane %v1576_v36, 4 }
 0x19b   : > { %v1550_v13 = vrot.slane %v1549_v57, 2  ;;  %v1578_v41 = vadd.f32 %v1577_v40, %v1576_v36 }
 0x19d   : > { %v1551_v49 = vadd.f32 %v1550_v13, %v1549_v57  ;;  %v1579_v9 = vrot.slane %v1578_v41, 2 }
 0x19f   : > { %v1552_v11 = vrot.slane %v1551_v49, 1  ;;  %v1580_v54 = vadd.f32 %v1579_v9, %v1578_v41 }
 0x1a1   : > { %v1581_v5 = vrot.slane %v1580_v54, 1  ;;  %v1553_v45 = vadd.f32 %v1552_v11, %v1551_v49 }
 0x1a3   : > { %v1582_v35 = vadd.f32 %v1581_v5, %v1580_v54 }
 0x1a5   : > { %v1584_v31 = vsel %vm1583_vm2, %v1553_v45, %v1582_v35 }
 0x1a6   : > { %1585 = vst [vmem:[%s519_s24] sm:$0x3] %v1584_v31 }
 0x1a7 PF: > { %s20_s13 = sadd.s32 1, %s2042_s13   ;;  %s3151_s30 = smov %s2034_s11 }
 0x1a8   : > { %p17_p11 = scmp.ge.s32.totalorder %s20_s13, 6   ;;  %s3152_s10 = smov %s2038_s12 }
 0x1a9   : > { %s3153_s11 = smov %s3156_s14  ;;  %s3154_s12 = smov %s3160_s15 }
 0x1aa   :  { %19 = sbr.rel (!%p17_p11) target bundleno = 3 (0x3), region = 108 }

</bundles_post_ra>
